<compile_context>
chip_gen: v7x
topology: tpu7x:2x2x1
jax: 0.10.0
libtpu: 0.0.40
codegen_flags: <defaults>
</compile_context>

<pallas_src>
import jax
import jax.numpy as jnp
from jax import lax
from jax.experimental import pallas as pl
from jax.experimental.pallas import tpu as pltpu


def _make_kernel(H, W, Wp, Cin, Cout, Bb):
    HWp = H * Wp                 # rows of one image's output slab
    FRM = (H + 2) * Wp           # conv window length (1 halo row above/below)
    EXT = (H + 4) * Wp           # extended frame length (2 zero rows above/below)
    f32 = jnp.float32
    bf16 = jnp.bfloat16

    def fill_im2col(col_ref, b, ext_f32, C):
        """Write image b's 9 K-folded tap columns into col_ref[b*HWp:(b+1)*HWp, :].

        ext_f32: (EXT, C) f32 zero-extended frame: image at rows 2..H+1,
        real columns 0..W-1, everything else exactly zero.
        """
        # Three row-shifted windows of the frame: win[dw][j] = frame[j + dw - 1]
        # where frame = ext rows [Wp, Wp+FRM).  Only dw=0 / dw=2 are
        # sublane-misaligned (2 shifted copies per conv, down from 6 in v2);
        # every slice below is 8/16-aligned.
        win = [ext_f32[Wp - 1 + dw: Wp - 1 + dw + FRM, :].astype(bf16)
               for dw in range(3)]
        for dh in range(3):
            for dw in range(3):
                t = dh * 3 + dw
                col_ref[b * HWp:(b + 1) * HWp, t * C:(t + 1) * C] = \
                    win[dw][dh * Wp: dh * Wp + HWp, :]

    def kernel(x_ref, mask_ref, w1_ref, w2_ref, wsc_ref,
               bn1s_ref, bn1b_ref, bn2s_ref, bn2b_ref, scs_ref, scb_ref,
               fc1w_ref, fc1b_ref, fc2w_ref, fc2b_ref,
               o_ref, col1_ref, col2_ref):
        mask = mask_ref[...]                       # (HWp, 1): 1.0 on real columns

        # ---- conv1 (3x3) + BN1 + ReLU: one (Bb*HWp, 9*Cin)x(9*Cin, Cout) dot --
        for b in range(Bb):
            fill_im2col(col1_ref, b, x_ref[b].astype(f32), Cin)
        relu1 = jnp.maximum(
            jnp.dot(col1_ref[...], w1_ref[...], preferred_element_type=f32)
            * bn1s_ref[...] + bn1b_ref[...], 0.0)             # (Bb*HWp, Cout) f32

        # ---- conv2 (3x3) + BN2: rebuild zero-extended frames from relu1 -------
        zblk = jnp.zeros((2 * Wp, Cout), f32)
        for b in range(Bb):
            r = relu1[b * HWp:(b + 1) * HWp, :] * mask        # zero pitch columns
            fill_im2col(col2_ref, b,
                        jnp.concatenate([zblk, r, zblk], axis=0), Cout)
        out2 = (jnp.dot(col2_ref[...], w2_ref[...], preferred_element_type=f32)
                * bn2s_ref[...] + bn2b_ref[...])              # (Bb*HWp, Cout) f32

        # ---- shortcut 1x1 conv + folded BN (sunk: computed just before use) ----
        xc = jnp.concatenate(
            [x_ref[b][2 * Wp: 2 * Wp + HWp, :] for b in range(Bb)], axis=0)
        residual = (jnp.dot(xc, wsc_ref[...], preferred_element_type=f32)
                    * scs_ref[...] + scb_ref[...])            # (Bb*HWp, Cout) f32

        # ---- per-image SE gate, residual add, final ReLU ------------------------
        inv_hw = 1.0 / (H * W)
        for b in range(Bb):
            o2 = out2[b * HWp:(b + 1) * HWp, :]
            pooled = jnp.sum(o2 * mask, axis=0, keepdims=True) * inv_hw  # (1, Cout)
            hid = jnp.maximum(
                jnp.dot(pooled, fc1w_ref[...], preferred_element_type=f32)
                + fc1b_ref[...], 0.0)
            gate = jax.nn.sigmoid(
                jnp.dot(hid, fc2w_ref[...], preferred_element_type=f32)
                + fc2b_ref[...])                                          # (1, Cout)
            o_ref[b] = jnp.maximum(
                o2 * gate + residual[b * HWp:(b + 1) * HWp, :], 0.0)

    return kernel


def residual_block_forward(x_nchw, P, images_per_step=2):
    """x_nchw: (B, Cin, H, W) float32.  Returns (B, Cout, H, W) float32."""
    B, Cin, H, W = x_nchw.shape
    Cout = P["w1_hwio"].shape[-1]
    Bb = min(images_per_step, B)
    assert B % Bb == 0, "batch must be divisible by images_per_step"
    Wp = ((W + 1 + 7) // 8) * 8     # row pitch: >= W+1 zero cols, sublane aligned
    HWp = H * Wp
    EXT = (H + 4) * Wp

    # zero-extended bf16 input frames: image at rows 2..H+1, cols 0..W-1
    x_nhwc = jnp.transpose(x_nchw, (0, 2, 3, 1)).astype(jnp.float32)
    x_ext = jnp.pad(x_nhwc, ((0, 0), (2, 2), (0, Wp - W), (0, 0)))
    x_flat = x_ext.reshape(B, EXT, Cin).astype(jnp.bfloat16)

    # pitch-column validity mask, precomputed once (review item: hoist the mask)
    mask = jnp.tile((jnp.arange(Wp) < W).astype(jnp.float32), (H,)).reshape(HWp, 1)

    # K-folded conv weights (tap-major), bf16 MXU operands
    w1 = P["w1_hwio"].reshape(9 * Cin, Cout).astype(jnp.bfloat16)
    w2 = P["w2_hwio"].reshape(9 * Cout, Cout).astype(jnp.bfloat16)
    wsc = P["wsc"].astype(jnp.bfloat16)

    kernel = _make_kernel(H, W, Wp, Cin, Cout, Bb)

    def rep(arr):
        ndim = arr.ndim
        return pl.BlockSpec(arr.shape, lambda g: (0,) * ndim)

    small = [mask, w1, w2, wsc,
             P["bn1_s"], P["bn1_b"], P["bn2_s"], P["bn2_b"],
             P["sc_s"], P["sc_b"],
             P["fc1_w"], P["fc1_b"], P["fc2_w"], P["fc2_b"]]

    out_flat = pl.pallas_call(
        kernel,
        out_shape=jax.ShapeDtypeStruct((B, HWp, Cout), jnp.float32),
        grid_spec=pltpu.PrefetchScalarGridSpec(
            num_scalar_prefetch=0,
            grid=(B // Bb,),
            in_specs=[pl.BlockSpec((Bb, EXT, Cin), lambda g: (g, 0, 0))]
                     + [rep(a) for a in small],
            out_specs=pl.BlockSpec((Bb, HWp, Cout), lambda g: (g, 0, 0)),
            scratch_shapes=[
                pltpu.VMEM((Bb * HWp, 9 * Cin), jnp.bfloat16),   # conv1 im2col
                pltpu.VMEM((Bb * HWp, 9 * Cout), jnp.bfloat16),  # conv2 im2col
            ],
        ),
        compiler_params=pltpu.CompilerParams(
            dimension_semantics=("parallel",),        # >=2 steps -> both v7x TCs
            vmem_limit_bytes=32 * 1024 * 1024),
    )(x_flat, *small)

    out = out_flat.reshape(B, H, Wp, Cout)[:, :, :W, :]   # drop pitch padding
    return jnp.transpose(out, (0, 3, 1, 2))


def init_params(key, Cin, Cout, reduction=16):
    assert Cout >= reduction
    Cr = Cout // reduction
    ks = jax.random.split(key, 10)
    f32 = jnp.float32

    def bn_fold(k, C):
        kg, kb, km, kv = jax.random.split(k, 4)
        gamma = 1.0 + 0.1 * jax.random.normal(kg, (1, C), f32)
        beta = 0.1 * jax.random.normal(kb, (1, C), f32)
        mean = 0.1 * jax.random.normal(km, (1, C), f32)
        var = jax.random.uniform(kv, (1, C), f32, 0.5, 1.5)
        scale = gamma / jnp.sqrt(var + 1e-5)
        bias = beta - mean * scale
        return scale, bias

    bn1_s, bn1_b = bn_fold(ks[3], Cout)
    bn2_s, bn2_b = bn_fold(ks[4], Cout)
    sc_s, sc_b = bn_fold(ks[5], Cout)

    return dict(
        w1_hwio=0.1 * jax.random.normal(ks[0], (3, 3, Cin, Cout), f32),
        w2_hwio=0.1 * jax.random.normal(ks[1], (3, 3, Cout, Cout), f32),
        wsc=0.1 * jax.random.normal(ks[2], (Cin, Cout), f32),
        bn1_s=bn1_s, bn1_b=bn1_b, bn2_s=bn2_s, bn2_b=bn2_b,
        sc_s=sc_s, sc_b=sc_b,
        fc1_w=0.2 * jax.random.normal(ks[6], (Cout, Cr), f32),
        fc1_b=0.05 * jax.random.normal(ks[7], (1, Cr), f32),
        fc2_w=0.2 * jax.random.normal(ks[8], (Cr, Cout), f32),
        fc2_b=0.05 * jax.random.normal(ks[9], (1, Cout), f32),
    )


def reference_forward(x_nchw, P, mxu_dtype=jnp.float32):
    """Pure-JAX reference.  mxu_dtype=bfloat16 mirrors the kernel's precision
    policy (bf16 matmul operands, f32 accumulation / elementwise)."""
    c = lambda a: a.astype(mxu_dtype)
    x = jnp.transpose(x_nchw, (0, 2, 3, 1)).astype(jnp.float32)
    conv = lambda a, w: lax.conv_general_dilated(
        c(a), c(w), (1, 1), "SAME",
        dimension_numbers=("NHWC", "HWIO", "NHWC"),
        preferred_element_type=jnp.float32,
        precision=lax.Precision.HIGHEST)
    res = jnp.einsum("bhwc,cd->bhwd", c(x), c(P["wsc"]),
                     preferred_element_type=jnp.float32,
                     precision=lax.Precision.HIGHEST) * P["sc_s"] + P["sc_b"]
    o = jax.nn.relu(conv(x, P["w1_hwio"]) * P["bn1_s"] + P["bn1_b"])
    o = conv(o, P["w2_hwio"]) * P["bn2_s"] + P["bn2_b"]
    y = o.mean(axis=(1, 2))
    h = jax.nn.relu(y @ P["fc1_w"] + P["fc1_b"][0])
    s = jax.nn.sigmoid(h @ P["fc2_w"] + P["fc2_b"][0])
    o = jax.nn.relu(o * s[:, None, None, :] + res)
    return jnp.transpose(o, (0, 3, 1, 2))


if __name__ == "__main__":
    B, Cin, Cout, H, W = 4, 16, 32, 8, 8          # SE needs channels >= 16
    key = jax.random.PRNGKey(0)
    kx, kp = jax.random.split(key)
    x = jax.random.normal(kx, (B, Cin, H, W), jnp.float32)   # NCHW, like PyTorch
    P = init_params(kp, Cin, Cout)

    out = jax.block_until_ready(residual_block_forward(x, P))
    assert out.shape == (B, Cout, H, W)
    assert bool(jnp.all(jnp.isfinite(out)))

    # 1) precision-matched reference (same bf16-operand / f32-accumulate policy)
    ref_match = jax.block_until_ready(reference_forward(x, P, jnp.bfloat16))
    assert jnp.allclose(out, ref_match, rtol=2e-2, atol=2e-2), (
        float(jnp.max(jnp.abs(out - ref_match))))

    # 2) pure-f32 module semantics: looser bound covering bf16 MXU rounding drift
    ref_f32 = jax.block_until_ready(reference_forward(x, P, jnp.float32))
    assert jnp.allclose(out, ref_f32, rtol=5e-2, atol=1e-1), (
        float(jnp.max(jnp.abs(out - ref_f32))))

    print("KERNEL_OK")
</pallas_src>

<mosaic_0001>
module attributes {stable_mosaic.version = 11 : i64} {
  func.func @kernel(%arg0: i32, %arg1: memref<2x192x16xbf16, #tpu.memory_space<vmem>>, %arg2: memref<128x1xf32, #tpu.memory_space<vmem>>, %arg3: memref<144x32xbf16, #tpu.memory_space<vmem>>, %arg4: memref<288x32xbf16, #tpu.memory_space<vmem>>, %arg5: memref<16x32xbf16, #tpu.memory_space<vmem>>, %arg6: memref<1x32xf32, #tpu.memory_space<vmem>>, %arg7: memref<1x32xf32, #tpu.memory_space<vmem>>, %arg8: memref<1x32xf32, #tpu.memory_space<vmem>>, %arg9: memref<1x32xf32, #tpu.memory_space<vmem>>, %arg10: memref<1x32xf32, #tpu.memory_space<vmem>>, %arg11: memref<1x32xf32, #tpu.memory_space<vmem>>, %arg12: memref<32x2xf32, #tpu.memory_space<vmem>>, %arg13: memref<1x2xf32, #tpu.memory_space<vmem>>, %arg14: memref<2x32xf32, #tpu.memory_space<vmem>>, %arg15: memref<1x32xf32, #tpu.memory_space<vmem>>, %arg16: memref<2x128x32xf32, #tpu.memory_space<vmem>>, %arg17: memref<256x144xbf16, #tpu.memory_space<vmem>>, %arg18: memref<256x288xbf16, #tpu.memory_space<vmem>>) attributes {dimension_semantics = [#tpu.dimension_semantics<parallel>], iteration_bounds = array<i64: 2>, scalar_prefetch = 0 : i64, scratch_operands = 2 : i64, tpu.core_type = #tpu.core_type<tc>, window_params = [{transform_indices = @transform_0, window_bounds = array<i64: 2, 192, 16>}, {pipeline_mode = #tpu.pipeline_mode<synchronous>, transform_indices = @transform_1, window_bounds = array<i64: 128, 1>}, {pipeline_mode = #tpu.pipeline_mode<synchronous>, transform_indices = @transform_2, window_bounds = array<i64: 144, 32>}, {pipeline_mode = #tpu.pipeline_mode<synchronous>, transform_indices = @transform_3, window_bounds = array<i64: 288, 32>}, {pipeline_mode = #tpu.pipeline_mode<synchronous>, transform_indices = @transform_4, window_bounds = array<i64: 16, 32>}, {pipeline_mode = #tpu.pipeline_mode<synchronous>, transform_indices = @transform_5, window_bounds = array<i64: 1, 32>}, {pipeline_mode = #tpu.pipeline_mode<synchronous>, transform_indices = @transform_6, window_bounds = array<i64: 1, 32>}, {pipeline_mode = #tpu.pipeline_mode<synchronous>, transform_indices = @transform_7, window_bounds = array<i64: 1, 32>}, {pipeline_mode = #tpu.pipeline_mode<synchronous>, transform_indices = @transform_8, window_bounds = array<i64: 1, 32>}, {pipeline_mode = #tpu.pipeline_mode<synchronous>, transform_indices = @transform_9, window_bounds = array<i64: 1, 32>}, {pipeline_mode = #tpu.pipeline_mode<synchronous>, transform_indices = @transform_10, window_bounds = array<i64: 1, 32>}, {pipeline_mode = #tpu.pipeline_mode<synchronous>, transform_indices = @transform_11, window_bounds = array<i64: 32, 2>}, {pipeline_mode = #tpu.pipeline_mode<synchronous>, transform_indices = @transform_12, window_bounds = array<i64: 1, 2>}, {pipeline_mode = #tpu.pipeline_mode<synchronous>, transform_indices = @transform_13, window_bounds = array<i64: 2, 32>}, {pipeline_mode = #tpu.pipeline_mode<synchronous>, transform_indices = @transform_14, window_bounds = array<i64: 1, 32>}, {transform_indices = @transform_15, window_bounds = array<i64: 2, 128, 32>}]} {
    %c0 = arith.constant 0 : index
    %c0_0 = arith.constant 0 : index
    %0 = vector.load %arg2[%c0, %c0_0] : memref<128x1xf32, #tpu.memory_space<vmem>>, vector<128x1xf32>
    %c0_1 = arith.constant 0 : index
    %c0_2 = arith.constant 0 : index
    %c0_3 = arith.constant 0 : index
    %1 = vector.load %arg1[%c0_1, %c0_2, %c0_3] : memref<2x192x16xbf16, #tpu.memory_space<vmem>>, vector<1x192x16xbf16>
    %2 = vector.shape_cast %1 : vector<1x192x16xbf16> to vector<192x16xbf16>
    %3 = arith.extf %2 : vector<192x16xbf16> to vector<192x16xf32>
    %4 = vector.extract_strided_slice %3 {offsets = [15, 0], sizes = [160, 16], strides = [1, 1]} : vector<192x16xf32> to vector<160x16xf32>
    %5 = arith.truncf %4 : vector<160x16xf32> to vector<160x16xbf16>
    %6 = vector.extract_strided_slice %3 {offsets = [16, 0], sizes = [160, 16], strides = [1, 1]} : vector<192x16xf32> to vector<160x16xf32>
    %7 = arith.truncf %6 : vector<160x16xf32> to vector<160x16xbf16>
    %8 = vector.extract_strided_slice %3 {offsets = [17, 0], sizes = [160, 16], strides = [1, 1]} : vector<192x16xf32> to vector<160x16xf32>
    %9 = arith.truncf %8 : vector<160x16xf32> to vector<160x16xbf16>
    %10 = vector.extract_strided_slice %5 {offsets = [0, 0], sizes = [128, 16], strides = [1, 1]} : vector<160x16xbf16> to vector<128x16xbf16>
    %c0_4 = arith.constant 0 : index
    %c0_5 = arith.constant 0 : index
    %11 = vector.load %arg17[%c0_4, %c0_5] : memref<256x144xbf16, #tpu.memory_space<vmem>>, vector<128x16xbf16>
    tpu.vector_store %arg17[%c0_4, %c0_5], %10 {strides = array<i32>} : memref<256x144xbf16, #tpu.memory_space<vmem>>, vector<128x16xbf16>,
    %12 = vector.extract_strided_slice %7 {offsets = [0, 0], sizes = [128, 16], strides = [1, 1]} : vector<160x16xbf16> to vector<128x16xbf16>
    %c0_6 = arith.constant 0 : index
    %c16 = arith.constant 16 : index
    %13 = vector.load %arg17[%c0_6, %c16] : memref<256x144xbf16, #tpu.memory_space<vmem>>, vector<128x16xbf16>
    tpu.vector_store %arg17[%c0_6, %c16], %12 {strides = array<i32>} : memref<256x144xbf16, #tpu.memory_space<vmem>>, vector<128x16xbf16>,
    %14 = vector.extract_strided_slice %9 {offsets = [0, 0], sizes = [128, 16], strides = [1, 1]} : vector<160x16xbf16> to vector<128x16xbf16>
    %c0_7 = arith.constant 0 : index
    %c32 = arith.constant 32 : index
    %15 = vector.load %arg17[%c0_7, %c32] : memref<256x144xbf16, #tpu.memory_space<vmem>>, vector<128x16xbf16>
    tpu.vector_store %arg17[%c0_7, %c32], %14 {strides = array<i32>} : memref<256x144xbf16, #tpu.memory_space<vmem>>, vector<128x16xbf16>,
    %16 = vector.extract_strided_slice %5 {offsets = [16, 0], sizes = [128, 16], strides = [1, 1]} : vector<160x16xbf16> to vector<128x16xbf16>
    %c0_8 = arith.constant 0 : index
    %c48 = arith.constant 48 : index
    %17 = vector.load %arg17[%c0_8, %c48] : memref<256x144xbf16, #tpu.memory_space<vmem>>, vector<128x16xbf16>
    tpu.vector_store %arg17[%c0_8, %c48], %16 {strides = array<i32>} : memref<256x144xbf16, #tpu.memory_space<vmem>>, vector<128x16xbf16>,
    %18 = vector.extract_strided_slice %7 {offsets = [16, 0], sizes = [128, 16], strides = [1, 1]} : vector<160x16xbf16> to vector<128x16xbf16>
    %c0_9 = arith.constant 0 : index
    %c64 = arith.constant 64 : index
    %19 = vector.load %arg17[%c0_9, %c64] : memref<256x144xbf16, #tpu.memory_space<vmem>>, vector<128x16xbf16>
    tpu.vector_store %arg17[%c0_9, %c64], %18 {strides = array<i32>} : memref<256x144xbf16, #tpu.memory_space<vmem>>, vector<128x16xbf16>,
    %20 = vector.extract_strided_slice %9 {offsets = [16, 0], sizes = [128, 16], strides = [1, 1]} : vector<160x16xbf16> to vector<128x16xbf16>
    %c0_10 = arith.constant 0 : index
    %c80 = arith.constant 80 : index
    %21 = vector.load %arg17[%c0_10, %c80] : memref<256x144xbf16, #tpu.memory_space<vmem>>, vector<128x16xbf16>
    tpu.vector_store %arg17[%c0_10, %c80], %20 {strides = array<i32>} : memref<256x144xbf16, #tpu.memory_space<vmem>>, vector<128x16xbf16>,
    %22 = vector.extract_strided_slice %5 {offsets = [32, 0], sizes = [128, 16], strides = [1, 1]} : vector<160x16xbf16> to vector<128x16xbf16>
    %c0_11 = arith.constant 0 : index
    %c96 = arith.constant 96 : index
    %23 = vector.load %arg17[%c0_11, %c96] : memref<256x144xbf16, #tpu.memory_space<vmem>>, vector<128x16xbf16>
    tpu.vector_store %arg17[%c0_11, %c96], %22 {strides = array<i32>} : memref<256x144xbf16, #tpu.memory_space<vmem>>, vector<128x16xbf16>,
    %24 = vector.extract_strided_slice %7 {offsets = [32, 0], sizes = [128, 16], strides = [1, 1]} : vector<160x16xbf16> to vector<128x16xbf16>
    %c0_12 = arith.constant 0 : index
    %c112 = arith.constant 112 : index
    %25 = vector.load %arg17[%c0_12, %c112] : memref<256x144xbf16, #tpu.memory_space<vmem>>, vector<128x16xbf16>
    tpu.vector_store %arg17[%c0_12, %c112], %24 {strides = array<i32>} : memref<256x144xbf16, #tpu.memory_space<vmem>>, vector<128x16xbf16>,
    %26 = vector.extract_strided_slice %9 {offsets = [32, 0], sizes = [128, 16], strides = [1, 1]} : vector<160x16xbf16> to vector<128x16xbf16>
    %c0_13 = arith.constant 0 : index
    %c128 = arith.constant 128 : index
    %27 = vector.load %arg17[%c0_13, %c128] : memref<256x144xbf16, #tpu.memory_space<vmem>>, vector<128x16xbf16>
    tpu.vector_store %arg17[%c0_13, %c128], %26 {strides = array<i32>} : memref<256x144xbf16, #tpu.memory_space<vmem>>, vector<128x16xbf16>,
    %c1 = arith.constant 1 : index
    %c0_14 = arith.constant 0 : index
    %c0_15 = arith.constant 0 : index
    %28 = vector.load %arg1[%c1, %c0_14, %c0_15] : memref<2x192x16xbf16, #tpu.memory_space<vmem>>, vector<1x192x16xbf16>
    %29 = vector.shape_cast %28 : vector<1x192x16xbf16> to vector<192x16xbf16>
    %30 = arith.extf %29 : vector<192x16xbf16> to vector<192x16xf32>
    %31 = vector.extract_strided_slice %30 {offsets = [15, 0], sizes = [160, 16], strides = [1, 1]} : vector<192x16xf32> to vector<160x16xf32>
    %32 = arith.truncf %31 : vector<160x16xf32> to vector<160x16xbf16>
    %33 = vector.extract_strided_slice %30 {offsets = [16, 0], sizes = [160, 16], strides = [1, 1]} : vector<192x16xf32> to vector<160x16xf32>
    %34 = arith.truncf %33 : vector<160x16xf32> to vector<160x16xbf16>
    %35 = vector.extract_strided_slice %30 {offsets = [17, 0], sizes = [160, 16], strides = [1, 1]} : vector<192x16xf32> to vector<160x16xf32>
    %36 = arith.truncf %35 : vector<160x16xf32> to vector<160x16xbf16>
    %37 = vector.extract_strided_slice %32 {offsets = [0, 0], sizes = [128, 16], strides = [1, 1]} : vector<160x16xbf16> to vector<128x16xbf16>
    %c128_16 = arith.constant 128 : index
    %c0_17 = arith.constant 0 : index
    %38 = vector.load %arg17[%c128_16, %c0_17] : memref<256x144xbf16, #tpu.memory_space<vmem>>, vector<128x16xbf16>
    tpu.vector_store %arg17[%c128_16, %c0_17], %37 {strides = array<i32>} : memref<256x144xbf16, #tpu.memory_space<vmem>>, vector<128x16xbf16>,
    %39 = vector.extract_strided_slice %34 {offsets = [0, 0], sizes = [128, 16], strides = [1, 1]} : vector<160x16xbf16> to vector<128x16xbf16>
    %c128_18 = arith.constant 128 : index
    %c16_19 = arith.constant 16 : index
    %40 = vector.load %arg17[%c128_18, %c16_19] : memref<256x144xbf16, #tpu.memory_space<vmem>>, vector<128x16xbf16>
    tpu.vector_store %arg17[%c128_18, %c16_19], %39 {strides = array<i32>} : memref<256x144xbf16, #tpu.memory_space<vmem>>, vector<128x16xbf16>,
    %41 = vector.extract_strided_slice %36 {offsets = [0, 0], sizes = [128, 16], strides = [1, 1]} : vector<160x16xbf16> to vector<128x16xbf16>
    %c128_20 = arith.constant 128 : index
    %c32_21 = arith.constant 32 : index
    %42 = vector.load %arg17[%c128_20, %c32_21] : memref<256x144xbf16, #tpu.memory_space<vmem>>, vector<128x16xbf16>
    tpu.vector_store %arg17[%c128_20, %c32_21], %41 {strides = array<i32>} : memref<256x144xbf16, #tpu.memory_space<vmem>>, vector<128x16xbf16>,
    %43 = vector.extract_strided_slice %32 {offsets = [16, 0], sizes = [128, 16], strides = [1, 1]} : vector<160x16xbf16> to vector<128x16xbf16>
    %c128_22 = arith.constant 128 : index
    %c48_23 = arith.constant 48 : index
    %44 = vector.load %arg17[%c128_22, %c48_23] : memref<256x144xbf16, #tpu.memory_space<vmem>>, vector<128x16xbf16>
    tpu.vector_store %arg17[%c128_22, %c48_23], %43 {strides = array<i32>} : memref<256x144xbf16, #tpu.memory_space<vmem>>, vector<128x16xbf16>,
    %45 = vector.extract_strided_slice %34 {offsets = [16, 0], sizes = [128, 16], strides = [1, 1]} : vector<160x16xbf16> to vector<128x16xbf16>
    %c128_24 = arith.constant 128 : index
    %c64_25 = arith.constant 64 : index
    %46 = vector.load %arg17[%c128_24, %c64_25] : memref<256x144xbf16, #tpu.memory_space<vmem>>, vector<128x16xbf16>
    tpu.vector_store %arg17[%c128_24, %c64_25], %45 {strides = array<i32>} : memref<256x144xbf16, #tpu.memory_space<vmem>>, vector<128x16xbf16>,
    %47 = vector.extract_strided_slice %36 {offsets = [16, 0], sizes = [128, 16], strides = [1, 1]} : vector<160x16xbf16> to vector<128x16xbf16>
    %c128_26 = arith.constant 128 : index
    %c80_27 = arith.constant 80 : index
    %48 = vector.load %arg17[%c128_26, %c80_27] : memref<256x144xbf16, #tpu.memory_space<vmem>>, vector<128x16xbf16>
    tpu.vector_store %arg17[%c128_26, %c80_27], %47 {strides = array<i32>} : memref<256x144xbf16, #tpu.memory_space<vmem>>, vector<128x16xbf16>,
    %49 = vector.extract_strided_slice %32 {offsets = [32, 0], sizes = [128, 16], strides = [1, 1]} : vector<160x16xbf16> to vector<128x16xbf16>
    %c128_28 = arith.constant 128 : index
    %c96_29 = arith.constant 96 : index
    %50 = vector.load %arg17[%c128_28, %c96_29] : memref<256x144xbf16, #tpu.memory_space<vmem>>, vector<128x16xbf16>
    tpu.vector_store %arg17[%c128_28, %c96_29], %49 {strides = array<i32>} : memref<256x144xbf16, #tpu.memory_space<vmem>>, vector<128x16xbf16>,
    %51 = vector.extract_strided_slice %34 {offsets = [32, 0], sizes = [128, 16], strides = [1, 1]} : vector<160x16xbf16> to vector<128x16xbf16>
    %c128_30 = arith.constant 128 : index
    %c112_31 = arith.constant 112 : index
    %52 = vector.load %arg17[%c128_30, %c112_31] : memref<256x144xbf16, #tpu.memory_space<vmem>>, vector<128x16xbf16>
    tpu.vector_store %arg17[%c128_30, %c112_31], %51 {strides = array<i32>} : memref<256x144xbf16, #tpu.memory_space<vmem>>, vector<128x16xbf16>,
    %53 = vector.extract_strided_slice %36 {offsets = [32, 0], sizes = [128, 16], strides = [1, 1]} : vector<160x16xbf16> to vector<128x16xbf16>
    %c128_32 = arith.constant 128 : index
    %c128_33 = arith.constant 128 : index
    %54 = vector.load %arg17[%c128_32, %c128_33] : memref<256x144xbf16, #tpu.memory_space<vmem>>, vector<128x16xbf16>
    tpu.vector_store %arg17[%c128_32, %c128_33], %53 {strides = array<i32>} : memref<256x144xbf16, #tpu.memory_space<vmem>>, vector<128x16xbf16>,
    %c0_34 = arith.constant 0 : index
    %c0_35 = arith.constant 0 : index
    %55 = vector.load %arg17[%c0_34, %c0_35] : memref<256x144xbf16, #tpu.memory_space<vmem>>, vector<256x144xbf16>
    %c0_36 = arith.constant 0 : index
    %c0_37 = arith.constant 0 : index
    %56 = vector.load %arg3[%c0_36, %c0_37] : memref<144x32xbf16, #tpu.memory_space<vmem>>, vector<144x32xbf16>
    %cst = arith.constant dense<0.000000e+00> : vector<256x32xf32>
    %57 = tpu.matmul %55, %56, %cst {dimension_numbers = #tpu.dot_dimension_numbers<[1], [0], [0], [1], [0, 0, 1, 1], [], []>} : vector<256x144xbf16>, vector<144x32xbf16>, vector<256x32xf32> -> vector<256x32xf32>
    %c0_38 = arith.constant 0 : index
    %c0_39 = arith.constant 0 : index
    %58 = vector.load %arg6[%c0_38, %c0_39] : memref<1x32xf32, #tpu.memory_space<vmem>>, vector<1x32xf32>
    %59 = vector.broadcast %58 : vector<1x32xf32> to vector<256x32xf32>
    %60 = arith.mulf %57, %59 : vector<256x32xf32>
    %c0_40 = arith.constant 0 : index
    %c0_41 = arith.constant 0 : index
    %61 = vector.load %arg7[%c0_40, %c0_41] : memref<1x32xf32, #tpu.memory_space<vmem>>, vector<1x32xf32>
    %62 = vector.broadcast %61 : vector<1x32xf32> to vector<256x32xf32>
    %63 = arith.addf %60, %62 : vector<256x32xf32>
    %cst_42 = arith.constant 0.000000e+00 : f32
    %64 = vector.broadcast %cst_42 : f32 to vector<256x32xf32>
    %65 = arith.maximumf %63, %64 : vector<256x32xf32>
    %cst_43 = arith.constant 0.000000e+00 : f32
    %66 = vector.broadcast %cst_43 : f32 to vector<32x32xf32>
    %67 = vector.extract_strided_slice %65 {offsets = [0, 0], sizes = [128, 32], strides = [1, 1]} : vector<256x32xf32> to vector<128x32xf32>
    %68 = vector.broadcast %0 : vector<128x1xf32> to vector<128x32xf32>
    %69 = arith.mulf %67, %68 : vector<128x32xf32>
    %70 = tpu.concatenate %66, %69, %66 in 0 : vector<32x32xf32>, vector<128x32xf32>, vector<32x32xf32> -> vector<192x32xf32>
    %71 = vector.extract_strided_slice %70 {offsets = [15, 0], sizes = [160, 32], strides = [1, 1]} : vector<192x32xf32> to vector<160x32xf32>
    %72 = arith.truncf %71 : vector<160x32xf32> to vector<160x32xbf16>
    %73 = vector.extract_strided_slice %70 {offsets = [16, 0], sizes = [160, 32], strides = [1, 1]} : vector<192x32xf32> to vector<160x32xf32>
    %74 = arith.truncf %73 : vector<160x32xf32> to vector<160x32xbf16>
    %75 = vector.extract_strided_slice %70 {offsets = [17, 0], sizes = [160, 32], strides = [1, 1]} : vector<192x32xf32> to vector<160x32xf32>
    %76 = arith.truncf %75 : vector<160x32xf32> to vector<160x32xbf16>
    %77 = vector.extract_strided_slice %72 {offsets = [0, 0], sizes = [128, 32], strides = [1, 1]} : vector<160x32xbf16> to vector<128x32xbf16>
    %c0_44 = arith.constant 0 : index
    %c0_45 = arith.constant 0 : index
    %78 = vector.load %arg18[%c0_44, %c0_45] : memref<256x288xbf16, #tpu.memory_space<vmem>>, vector<128x32xbf16>
    tpu.vector_store %arg18[%c0_44, %c0_45], %77 {strides = array<i32>} : memref<256x288xbf16, #tpu.memory_space<vmem>>, vector<128x32xbf16>,
    %79 = vector.extract_strided_slice %74 {offsets = [0, 0], sizes = [128, 32], strides = [1, 1]} : vector<160x32xbf16> to vector<128x32xbf16>
    %c0_46 = arith.constant 0 : index
    %c32_47 = arith.constant 32 : index
    %80 = vector.load %arg18[%c0_46, %c32_47] : memref<256x288xbf16, #tpu.memory_space<vmem>>, vector<128x32xbf16>
    tpu.vector_store %arg18[%c0_46, %c32_47], %79 {strides = array<i32>} : memref<256x288xbf16, #tpu.memory_space<vmem>>, vector<128x32xbf16>,
    %81 = vector.extract_strided_slice %76 {offsets = [0, 0], sizes = [128, 32], strides = [1, 1]} : vector<160x32xbf16> to vector<128x32xbf16>
    %c0_48 = arith.constant 0 : index
    %c64_49 = arith.constant 64 : index
    %82 = vector.load %arg18[%c0_48, %c64_49] : memref<256x288xbf16, #tpu.memory_space<vmem>>, vector<128x32xbf16>
    tpu.vector_store %arg18[%c0_48, %c64_49], %81 {strides = array<i32>} : memref<256x288xbf16, #tpu.memory_space<vmem>>, vector<128x32xbf16>,
    %83 = vector.extract_strided_slice %72 {offsets = [16, 0], sizes = [128, 32], strides = [1, 1]} : vector<160x32xbf16> to vector<128x32xbf16>
    %c0_50 = arith.constant 0 : index
    %c96_51 = arith.constant 96 : index
    %84 = vector.load %arg18[%c0_50, %c96_51] : memref<256x288xbf16, #tpu.memory_space<vmem>>, vector<128x32xbf16>
    tpu.vector_store %arg18[%c0_50, %c96_51], %83 {strides = array<i32>} : memref<256x288xbf16, #tpu.memory_space<vmem>>, vector<128x32xbf16>,
    %85 = vector.extract_strided_slice %74 {offsets = [16, 0], sizes = [128, 32], strides = [1, 1]} : vector<160x32xbf16> to vector<128x32xbf16>
    %c0_52 = arith.constant 0 : index
    %c128_53 = arith.constant 128 : index
    %86 = vector.load %arg18[%c0_52, %c128_53] : memref<256x288xbf16, #tpu.memory_space<vmem>>, vector<128x32xbf16>
    tpu.vector_store %arg18[%c0_52, %c128_53], %85 {strides = array<i32>} : memref<256x288xbf16, #tpu.memory_space<vmem>>, vector<128x32xbf16>,
    %87 = vector.extract_strided_slice %76 {offsets = [16, 0], sizes = [128, 32], strides = [1, 1]} : vector<160x32xbf16> to vector<128x32xbf16>
    %c0_54 = arith.constant 0 : index
    %c160 = arith.constant 160 : index
    %88 = vector.load %arg18[%c0_54, %c160] : memref<256x288xbf16, #tpu.memory_space<vmem>>, vector<128x32xbf16>
    tpu.vector_store %arg18[%c0_54, %c160], %87 {strides = array<i32>} : memref<256x288xbf16, #tpu.memory_space<vmem>>, vector<128x32xbf16>,
    %89 = vector.extract_strided_slice %72 {offsets = [32, 0], sizes = [128, 32], strides = [1, 1]} : vector<160x32xbf16> to vector<128x32xbf16>
    %c0_55 = arith.constant 0 : index
    %c192 = arith.constant 192 : index
    %90 = vector.load %arg18[%c0_55, %c192] : memref<256x288xbf16, #tpu.memory_space<vmem>>, vector<128x32xbf16>
    tpu.vector_store %arg18[%c0_55, %c192], %89 {strides = array<i32>} : memref<256x288xbf16, #tpu.memory_space<vmem>>, vector<128x32xbf16>,
    %91 = vector.extract_strided_slice %74 {offsets = [32, 0], sizes = [128, 32], strides = [1, 1]} : vector<160x32xbf16> to vector<128x32xbf16>
    %c0_56 = arith.constant 0 : index
    %c224 = arith.constant 224 : index
    %92 = vector.load %arg18[%c0_56, %c224] : memref<256x288xbf16, #tpu.memory_space<vmem>>, vector<128x32xbf16>
    tpu.vector_store %arg18[%c0_56, %c224], %91 {strides = array<i32>} : memref<256x288xbf16, #tpu.memory_space<vmem>>, vector<128x32xbf16>,
    %93 = vector.extract_strided_slice %76 {offsets = [32, 0], sizes = [128, 32], strides = [1, 1]} : vector<160x32xbf16> to vector<128x32xbf16>
    %c0_57 = arith.constant 0 : index
    %c256 = arith.constant 256 : index
    %94 = vector.load %arg18[%c0_57, %c256] : memref<256x288xbf16, #tpu.memory_space<vmem>>, vector<128x32xbf16>
    tpu.vector_store %arg18[%c0_57, %c256], %93 {strides = array<i32>} : memref<256x288xbf16, #tpu.memory_space<vmem>>, vector<128x32xbf16>,
    %95 = vector.extract_strided_slice %65 {offsets = [128, 0], sizes = [128, 32], strides = [1, 1]} : vector<256x32xf32> to vector<128x32xf32>
    %96 = vector.broadcast %0 : vector<128x1xf32> to vector<128x32xf32>
    %97 = arith.mulf %95, %96 : vector<128x32xf32>
    %98 = tpu.concatenate %66, %97, %66 in 0 : vector<32x32xf32>, vector<128x32xf32>, vector<32x32xf32> -> vector<192x32xf32>
    %99 = vector.extract_strided_slice %98 {offsets = [15, 0], sizes = [160, 32], strides = [1, 1]} : vector<192x32xf32> to vector<160x32xf32>
    %100 = arith.truncf %99 : vector<160x32xf32> to vector<160x32xbf16>
    %101 = vector.extract_strided_slice %98 {offsets = [16, 0], sizes = [160, 32], strides = [1, 1]} : vector<192x32xf32> to vector<160x32xf32>
    %102 = arith.truncf %101 : vector<160x32xf32> to vector<160x32xbf16>
    %103 = vector.extract_strided_slice %98 {offsets = [17, 0], sizes = [160, 32], strides = [1, 1]} : vector<192x32xf32> to vector<160x32xf32>
    %104 = arith.truncf %103 : vector<160x32xf32> to vector<160x32xbf16>
    %105 = vector.extract_strided_slice %100 {offsets = [0, 0], sizes = [128, 32], strides = [1, 1]} : vector<160x32xbf16> to vector<128x32xbf16>
    %c128_58 = arith.constant 128 : index
    %c0_59 = arith.constant 0 : index
    %106 = vector.load %arg18[%c128_58, %c0_59] : memref<256x288xbf16, #tpu.memory_space<vmem>>, vector<128x32xbf16>
    tpu.vector_store %arg18[%c128_58, %c0_59], %105 {strides = array<i32>} : memref<256x288xbf16, #tpu.memory_space<vmem>>, vector<128x32xbf16>,
    %107 = vector.extract_strided_slice %102 {offsets = [0, 0], sizes = [128, 32], strides = [1, 1]} : vector<160x32xbf16> to vector<128x32xbf16>
    %c128_60 = arith.constant 128 : index
    %c32_61 = arith.constant 32 : index
    %108 = vector.load %arg18[%c128_60, %c32_61] : memref<256x288xbf16, #tpu.memory_space<vmem>>, vector<128x32xbf16>
    tpu.vector_store %arg18[%c128_60, %c32_61], %107 {strides = array<i32>} : memref<256x288xbf16, #tpu.memory_space<vmem>>, vector<128x32xbf16>,
    %109 = vector.extract_strided_slice %104 {offsets = [0, 0], sizes = [128, 32], strides = [1, 1]} : vector<160x32xbf16> to vector<128x32xbf16>
    %c128_62 = arith.constant 128 : index
    %c64_63 = arith.constant 64 : index
    %110 = vector.load %arg18[%c128_62, %c64_63] : memref<256x288xbf16, #tpu.memory_space<vmem>>, vector<128x32xbf16>
    tpu.vector_store %arg18[%c128_62, %c64_63], %109 {strides = array<i32>} : memref<256x288xbf16, #tpu.memory_space<vmem>>, vector<128x32xbf16>,
    %111 = vector.extract_strided_slice %100 {offsets = [16, 0], sizes = [128, 32], strides = [1, 1]} : vector<160x32xbf16> to vector<128x32xbf16>
    %c128_64 = arith.constant 128 : index
    %c96_65 = arith.constant 96 : index
    %112 = vector.load %arg18[%c128_64, %c96_65] : memref<256x288xbf16, #tpu.memory_space<vmem>>, vector<128x32xbf16>
    tpu.vector_store %arg18[%c128_64, %c96_65], %111 {strides = array<i32>} : memref<256x288xbf16, #tpu.memory_space<vmem>>, vector<128x32xbf16>,
    %113 = vector.extract_strided_slice %102 {offsets = [16, 0], sizes = [128, 32], strides = [1, 1]} : vector<160x32xbf16> to vector<128x32xbf16>
    %c128_66 = arith.constant 128 : index
    %c128_67 = arith.constant 128 : index
    %114 = vector.load %arg18[%c128_66, %c128_67] : memref<256x288xbf16, #tpu.memory_space<vmem>>, vector<128x32xbf16>
    tpu.vector_store %arg18[%c128_66, %c128_67], %113 {strides = array<i32>} : memref<256x288xbf16, #tpu.memory_space<vmem>>, vector<128x32xbf16>,
    %115 = vector.extract_strided_slice %104 {offsets = [16, 0], sizes = [128, 32], strides = [1, 1]} : vector<160x32xbf16> to vector<128x32xbf16>
    %c128_68 = arith.constant 128 : index
    %c160_69 = arith.constant 160 : index
    %116 = vector.load %arg18[%c128_68, %c160_69] : memref<256x288xbf16, #tpu.memory_space<vmem>>, vector<128x32xbf16>
    tpu.vector_store %arg18[%c128_68, %c160_69], %115 {strides = array<i32>} : memref<256x288xbf16, #tpu.memory_space<vmem>>, vector<128x32xbf16>,
    %117 = vector.extract_strided_slice %100 {offsets = [32, 0], sizes = [128, 32], strides = [1, 1]} : vector<160x32xbf16> to vector<128x32xbf16>
    %c128_70 = arith.constant 128 : index
    %c192_71 = arith.constant 192 : index
    %118 = vector.load %arg18[%c128_70, %c192_71] : memref<256x288xbf16, #tpu.memory_space<vmem>>, vector<128x32xbf16>
    tpu.vector_store %arg18[%c128_70, %c192_71], %117 {strides = array<i32>} : memref<256x288xbf16, #tpu.memory_space<vmem>>, vector<128x32xbf16>,
    %119 = vector.extract_strided_slice %102 {offsets = [32, 0], sizes = [128, 32], strides = [1, 1]} : vector<160x32xbf16> to vector<128x32xbf16>
    %c128_72 = arith.constant 128 : index
    %c224_73 = arith.constant 224 : index
    %120 = vector.load %arg18[%c128_72, %c224_73] : memref<256x288xbf16, #tpu.memory_space<vmem>>, vector<128x32xbf16>
    tpu.vector_store %arg18[%c128_72, %c224_73], %119 {strides = array<i32>} : memref<256x288xbf16, #tpu.memory_space<vmem>>, vector<128x32xbf16>,
    %121 = vector.extract_strided_slice %104 {offsets = [32, 0], sizes = [128, 32], strides = [1, 1]} : vector<160x32xbf16> to vector<128x32xbf16>
    %c128_74 = arith.constant 128 : index
    %c256_75 = arith.constant 256 : index
    %122 = vector.load %arg18[%c128_74, %c256_75] : memref<256x288xbf16, #tpu.memory_space<vmem>>, vector<128x32xbf16>
    tpu.vector_store %arg18[%c128_74, %c256_75], %121 {strides = array<i32>} : memref<256x288xbf16, #tpu.memory_space<vmem>>, vector<128x32xbf16>,
    %c0_76 = arith.constant 0 : index
    %c0_77 = arith.constant 0 : index
    %123 = vector.load %arg18[%c0_76, %c0_77] : memref<256x288xbf16, #tpu.memory_space<vmem>>, vector<256x288xbf16>
    %c0_78 = arith.constant 0 : index
    %c0_79 = arith.constant 0 : index
    %124 = vector.load %arg4[%c0_78, %c0_79] : memref<288x32xbf16, #tpu.memory_space<vmem>>, vector<288x32xbf16>
    %cst_80 = arith.constant dense<0.000000e+00> : vector<256x32xf32>
    %125 = tpu.matmul %123, %124, %cst_80 {dimension_numbers = #tpu.dot_dimension_numbers<[1], [0], [0], [1], [0, 0, 1, 1], [], []>} : vector<256x288xbf16>, vector<288x32xbf16>, vector<256x32xf32> -> vector<256x32xf32>
    %c0_81 = arith.constant 0 : index
    %c0_82 = arith.constant 0 : index
    %126 = vector.load %arg8[%c0_81, %c0_82] : memref<1x32xf32, #tpu.memory_space<vmem>>, vector<1x32xf32>
    %127 = vector.broadcast %126 : vector<1x32xf32> to vector<256x32xf32>
    %128 = arith.mulf %125, %127 : vector<256x32xf32>
    %c0_83 = arith.constant 0 : index
    %c0_84 = arith.constant 0 : index
    %129 = vector.load %arg9[%c0_83, %c0_84] : memref<1x32xf32, #tpu.memory_space<vmem>>, vector<1x32xf32>
    %130 = vector.broadcast %129 : vector<1x32xf32> to vector<256x32xf32>
    %131 = arith.addf %128, %130 : vector<256x32xf32>
    %c0_85 = arith.constant 0 : index
    %c0_86 = arith.constant 0 : index
    %c0_87 = arith.constant 0 : index
    %132 = vector.load %arg1[%c0_85, %c0_86, %c0_87] : memref<2x192x16xbf16, #tpu.memory_space<vmem>>, vector<1x192x16xbf16>
    %133 = vector.shape_cast %132 : vector<1x192x16xbf16> to vector<192x16xbf16>
    %134 = vector.extract_strided_slice %133 {offsets = [32, 0], sizes = [128, 16], strides = [1, 1]} : vector<192x16xbf16> to vector<128x16xbf16>
    %c1_88 = arith.constant 1 : index
    %c0_89 = arith.constant 0 : index
    %c0_90 = arith.constant 0 : index
    %135 = vector.load %arg1[%c1_88, %c0_89, %c0_90] : memref<2x192x16xbf16, #tpu.memory_space<vmem>>, vector<1x192x16xbf16>
    %136 = vector.shape_cast %135 : vector<1x192x16xbf16> to vector<192x16xbf16>
    %137 = vector.extract_strided_slice %136 {offsets = [32, 0], sizes = [128, 16], strides = [1, 1]} : vector<192x16xbf16> to vector<128x16xbf16>
    %138 = tpu.concatenate %134, %137 in 0 : vector<128x16xbf16>, vector<128x16xbf16> -> vector<256x16xbf16>
    %c0_91 = arith.constant 0 : index
    %c0_92 = arith.constant 0 : index
    %139 = vector.load %arg5[%c0_91, %c0_92] : memref<16x32xbf16, #tpu.memory_space<vmem>>, vector<16x32xbf16>
    %cst_93 = arith.constant dense<0.000000e+00> : vector<256x32xf32>
    %140 = tpu.matmul %138, %139, %cst_93 {dimension_numbers = #tpu.dot_dimension_numbers<[1], [0], [0], [1], [0, 0, 1, 1], [], []>} : vector<256x16xbf16>, vector<16x32xbf16>, vector<256x32xf32> -> vector<256x32xf32>
    %c0_94 = arith.constant 0 : index
    %c0_95 = arith.constant 0 : index
    %141 = vector.load %arg10[%c0_94, %c0_95] : memref<1x32xf32, #tpu.memory_space<vmem>>, vector<1x32xf32>
    %142 = vector.broadcast %141 : vector<1x32xf32> to vector<256x32xf32>
    %143 = arith.mulf %140, %142 : vector<256x32xf32>
    %c0_96 = arith.constant 0 : index
    %c0_97 = arith.constant 0 : index
    %144 = vector.load %arg11[%c0_96, %c0_97] : memref<1x32xf32, #tpu.memory_space<vmem>>, vector<1x32xf32>
    %145 = vector.broadcast %144 : vector<1x32xf32> to vector<256x32xf32>
    %146 = arith.addf %143, %145 : vector<256x32xf32>
    %147 = vector.extract_strided_slice %131 {offsets = [0, 0], sizes = [128, 32], strides = [1, 1]} : vector<256x32xf32> to vector<128x32xf32>
    %148 = vector.broadcast %0 : vector<128x1xf32> to vector<128x32xf32>
    %149 = arith.mulf %147, %148 : vector<128x32xf32>
    %cst_98 = arith.constant dense<0.000000e+00> : vector<32xf32>
    %150 = vector.multi_reduction <add>, %149, %cst_98 [0] : vector<128x32xf32> to vector<32xf32>
    %151 = vector.shape_cast %150 : vector<32xf32> to vector<1x32xf32>
    %cst_99 = arith.constant 1.562500e-02 : f32
    %152 = vector.broadcast %cst_99 : f32 to vector<1x32xf32>
    %153 = arith.mulf %151, %152 : vector<1x32xf32>
    %c0_100 = arith.constant 0 : index
    %c0_101 = arith.constant 0 : index
    %154 = vector.load %arg12[%c0_100, %c0_101] : memref<32x2xf32, #tpu.memory_space<vmem>>, vector<32x2xf32>
    %cst_102 = arith.constant dense<0.000000e+00> : vector<1x2xf32>
    %155 = tpu.matmul %153, %154, %cst_102 {dimension_numbers = #tpu.dot_dimension_numbers<[1], [0], [0], [1], [0, 0, 1, 1], [], []>} : vector<1x32xf32>, vector<32x2xf32>, vector<1x2xf32> -> vector<1x2xf32>
    %c0_103 = arith.constant 0 : index
    %c0_104 = arith.constant 0 : index
    %156 = vector.load %arg13[%c0_103, %c0_104] : memref<1x2xf32, #tpu.memory_space<vmem>>, vector<1x2xf32>
    %157 = arith.addf %155, %156 : vector<1x2xf32>
    %cst_105 = arith.constant 0.000000e+00 : f32
    %158 = vector.broadcast %cst_105 : f32 to vector<1x2xf32>
    %159 = arith.maximumf %157, %158 : vector<1x2xf32>
    %c0_106 = arith.constant 0 : index
    %c0_107 = arith.constant 0 : index
    %160 = vector.load %arg14[%c0_106, %c0_107] : memref<2x32xf32, #tpu.memory_space<vmem>>, vector<2x32xf32>
    %cst_108 = arith.constant dense<0.000000e+00> : vector<1x32xf32>
    %161 = tpu.matmul %159, %160, %cst_108 {dimension_numbers = #tpu.dot_dimension_numbers<[1], [0], [0], [1], [0, 0, 1, 1], [], []>} : vector<1x2xf32>, vector<2x32xf32>, vector<1x32xf32> -> vector<1x32xf32>
    %c0_109 = arith.constant 0 : index
    %c0_110 = arith.constant 0 : index
    %162 = vector.load %arg15[%c0_109, %c0_110] : memref<1x32xf32, #tpu.memory_space<vmem>>, vector<1x32xf32>
    %163 = arith.addf %161, %162 : vector<1x32xf32>
    %164 = arith.negf %163 : vector<1x32xf32>
    %165 = math.exp %164 : vector<1x32xf32>
    %cst_111 = arith.constant 1.000000e+00 : f32
    %166 = vector.broadcast %cst_111 : f32 to vector<1x32xf32>
    %167 = arith.addf %166, %165 : vector<1x32xf32>
    %168 = arith.divf %166, %167 : vector<1x32xf32>
    %169 = vector.broadcast %168 : vector<1x32xf32> to vector<128x32xf32>
    %170 = arith.mulf %147, %169 : vector<128x32xf32>
    %171 = vector.extract_strided_slice %146 {offsets = [0, 0], sizes = [128, 32], strides = [1, 1]} : vector<256x32xf32> to vector<128x32xf32>
    %172 = arith.addf %170, %171 : vector<128x32xf32>
    %cst_112 = arith.constant 0.000000e+00 : f32
    %173 = vector.broadcast %cst_112 : f32 to vector<128x32xf32>
    %174 = arith.maximumf %172, %173 : vector<128x32xf32>
    %c0_113 = arith.constant 0 : index
    %c0_114 = arith.constant 0 : index
    %c0_115 = arith.constant 0 : index
    %175 = vector.load %arg16[%c0_113, %c0_114, %c0_115] : memref<2x128x32xf32, #tpu.memory_space<vmem>>, vector<1x128x32xf32>
    %176 = vector.shape_cast %175 : vector<1x128x32xf32> to vector<128x32xf32>
    %177 = vector.shape_cast %174 : vector<128x32xf32> to vector<1x128x32xf32>
    tpu.vector_store %arg16[%c0_113, %c0_114, %c0_115], %177 {strides = array<i32>} : memref<2x128x32xf32, #tpu.memory_space<vmem>>, vector<1x128x32xf32>,
    %178 = vector.extract_strided_slice %131 {offsets = [128, 0], sizes = [128, 32], strides = [1, 1]} : vector<256x32xf32> to vector<128x32xf32>
    %179 = vector.broadcast %0 : vector<128x1xf32> to vector<128x32xf32>
    %180 = arith.mulf %178, %179 : vector<128x32xf32>
    %cst_116 = arith.constant dense<0.000000e+00> : vector<32xf32>
    %181 = vector.multi_reduction <add>, %180, %cst_116 [0] : vector<128x32xf32> to vector<32xf32>
    %182 = vector.shape_cast %181 : vector<32xf32> to vector<1x32xf32>
    %cst_117 = arith.constant 1.562500e-02 : f32
    %183 = vector.broadcast %cst_117 : f32 to vector<1x32xf32>
    %184 = arith.mulf %182, %183 : vector<1x32xf32>
    %c0_118 = arith.constant 0 : index
    %c0_119 = arith.constant 0 : index
    %185 = vector.load %arg12[%c0_118, %c0_119] : memref<32x2xf32, #tpu.memory_space<vmem>>, vector<32x2xf32>
    %cst_120 = arith.constant dense<0.000000e+00> : vector<1x2xf32>
    %186 = tpu.matmul %184, %185, %cst_120 {dimension_numbers = #tpu.dot_dimension_numbers<[1], [0], [0], [1], [0, 0, 1, 1], [], []>} : vector<1x32xf32>, vector<32x2xf32>, vector<1x2xf32> -> vector<1x2xf32>
    %c0_121 = arith.constant 0 : index
    %c0_122 = arith.constant 0 : index
    %187 = vector.load %arg13[%c0_121, %c0_122] : memref<1x2xf32, #tpu.memory_space<vmem>>, vector<1x2xf32>
    %188 = arith.addf %186, %187 : vector<1x2xf32>
    %cst_123 = arith.constant 0.000000e+00 : f32
    %189 = vector.broadcast %cst_123 : f32 to vector<1x2xf32>
    %190 = arith.maximumf %188, %189 : vector<1x2xf32>
    %c0_124 = arith.constant 0 : index
    %c0_125 = arith.constant 0 : index
    %191 = vector.load %arg14[%c0_124, %c0_125] : memref<2x32xf32, #tpu.memory_space<vmem>>, vector<2x32xf32>
    %cst_126 = arith.constant dense<0.000000e+00> : vector<1x32xf32>
    %192 = tpu.matmul %190, %191, %cst_126 {dimension_numbers = #tpu.dot_dimension_numbers<[1], [0], [0], [1], [0, 0, 1, 1], [], []>} : vector<1x2xf32>, vector<2x32xf32>, vector<1x32xf32> -> vector<1x32xf32>
    %c0_127 = arith.constant 0 : index
    %c0_128 = arith.constant 0 : index
    %193 = vector.load %arg15[%c0_127, %c0_128] : memref<1x32xf32, #tpu.memory_space<vmem>>, vector<1x32xf32>
    %194 = arith.addf %192, %193 : vector<1x32xf32>
    %195 = arith.negf %194 : vector<1x32xf32>
    %196 = math.exp %195 : vector<1x32xf32>
    %cst_129 = arith.constant 1.000000e+00 : f32
    %197 = vector.broadcast %cst_129 : f32 to vector<1x32xf32>
    %198 = arith.addf %197, %196 : vector<1x32xf32>
    %199 = arith.divf %197, %198 : vector<1x32xf32>
    %200 = vector.broadcast %199 : vector<1x32xf32> to vector<128x32xf32>
    %201 = arith.mulf %178, %200 : vector<128x32xf32>
    %202 = vector.extract_strided_slice %146 {offsets = [128, 0], sizes = [128, 32], strides = [1, 1]} : vector<256x32xf32> to vector<128x32xf32>
    %203 = arith.addf %201, %202 : vector<128x32xf32>
    %cst_130 = arith.constant 0.000000e+00 : f32
    %204 = vector.broadcast %cst_130 : f32 to vector<128x32xf32>
    %205 = arith.maximumf %203, %204 : vector<128x32xf32>
    %c1_131 = arith.constant 1 : index
    %c0_132 = arith.constant 0 : index
    %c0_133 = arith.constant 0 : index
    %206 = vector.load %arg16[%c1_131, %c0_132, %c0_133] : memref<2x128x32xf32, #tpu.memory_space<vmem>>, vector<1x128x32xf32>
    %207 = vector.shape_cast %206 : vector<1x128x32xf32> to vector<128x32xf32>
    %208 = vector.shape_cast %205 : vector<128x32xf32> to vector<1x128x32xf32>
    tpu.vector_store %arg16[%c1_131, %c0_132, %c0_133], %208 {strides = array<i32>} : memref<2x128x32xf32, #tpu.memory_space<vmem>>, vector<1x128x32xf32>,
    return
  }
  func.func @transform_0(%arg0: i32) -> (i32, i32, i32) {
    %c0_i32 = arith.constant 0 : i32
    %c0_i32_0 = arith.constant 0 : i32
    %c0_i32_1 = arith.constant 0 : i32
    return %arg0, %c0_i32, %c0_i32_0 : i32, i32, i32
  }
  func.func @transform_1(%arg0: i32) -> (i32, i32) {
    %c0_i32 = arith.constant 0 : i32
    %c0_i32_0 = arith.constant 0 : i32
    %c0_i32_1 = arith.constant 0 : i32
    return %c0_i32, %c0_i32_0 : i32, i32
  }
  func.func @transform_2(%arg0: i32) -> (i32, i32) {
    %c0_i32 = arith.constant 0 : i32
    %c0_i32_0 = arith.constant 0 : i32
    %c0_i32_1 = arith.constant 0 : i32
    return %c0_i32, %c0_i32_0 : i32, i32
  }
  func.func @transform_3(%arg0: i32) -> (i32, i32) {
    %c0_i32 = arith.constant 0 : i32
    %c0_i32_0 = arith.constant 0 : i32
    %c0_i32_1 = arith.constant 0 : i32
    return %c0_i32, %c0_i32_0 : i32, i32
  }
  func.func @transform_4(%arg0: i32) -> (i32, i32) {
    %c0_i32 = arith.constant 0 : i32
    %c0_i32_0 = arith.constant 0 : i32
    %c0_i32_1 = arith.constant 0 : i32
    return %c0_i32, %c0_i32_0 : i32, i32
  }
  func.func @transform_5(%arg0: i32) -> (i32, i32) {
    %c0_i32 = arith.constant 0 : i32
    %c0_i32_0 = arith.constant 0 : i32
    %c0_i32_1 = arith.constant 0 : i32
    return %c0_i32, %c0_i32_0 : i32, i32
  }
  func.func @transform_6(%arg0: i32) -> (i32, i32) {
    %c0_i32 = arith.constant 0 : i32
    %c0_i32_0 = arith.constant 0 : i32
    %c0_i32_1 = arith.constant 0 : i32
    return %c0_i32, %c0_i32_0 : i32, i32
  }
  func.func @transform_7(%arg0: i32) -> (i32, i32) {
    %c0_i32 = arith.constant 0 : i32
    %c0_i32_0 = arith.constant 0 : i32
    %c0_i32_1 = arith.constant 0 : i32
    return %c0_i32, %c0_i32_0 : i32, i32
  }
  func.func @transform_8(%arg0: i32) -> (i32, i32) {
    %c0_i32 = arith.constant 0 : i32
    %c0_i32_0 = arith.constant 0 : i32
    %c0_i32_1 = arith.constant 0 : i32
    return %c0_i32, %c0_i32_0 : i32, i32
  }
  func.func @transform_9(%arg0: i32) -> (i32, i32) {
    %c0_i32 = arith.constant 0 : i32
    %c0_i32_0 = arith.constant 0 : i32
    %c0_i32_1 = arith.constant 0 : i32
    return %c0_i32, %c0_i32_0 : i32, i32
  }
  func.func @transform_10(%arg0: i32) -> (i32, i32) {
    %c0_i32 = arith.constant 0 : i32
    %c0_i32_0 = arith.constant 0 : i32
    %c0_i32_1 = arith.constant 0 : i32
    return %c0_i32, %c0_i32_0 : i32, i32
  }
  func.func @transform_11(%arg0: i32) -> (i32, i32) {
    %c0_i32 = arith.constant 0 : i32
    %c0_i32_0 = arith.constant 0 : i32
    %c0_i32_1 = arith.constant 0 : i32
    return %c0_i32, %c0_i32_0 : i32, i32
  }
  func.func @transform_12(%arg0: i32) -> (i32, i32) {
    %c0_i32 = arith.constant 0 : i32
    %c0_i32_0 = arith.constant 0 : i32
    %c0_i32_1 = arith.constant 0 : i32
    return %c0_i32, %c0_i32_0 : i32, i32
  }
  func.func @transform_13(%arg0: i32) -> (i32, i32) {
    %c0_i32 = arith.constant 0 : i32
    %c0_i32_0 = arith.constant 0 : i32
    %c0_i32_1 = arith.constant 0 : i32
    return %c0_i32, %c0_i32_0 : i32, i32
  }
  func.func @transform_14(%arg0: i32) -> (i32, i32) {
    %c0_i32 = arith.constant 0 : i32
    %c0_i32_0 = arith.constant 0 : i32
    %c0_i32_1 = arith.constant 0 : i32
    return %c0_i32, %c0_i32_0 : i32, i32
  }
  func.func @transform_15(%arg0: i32) -> (i32, i32, i32) {
    %c0_i32 = arith.constant 0 : i32
    %c0_i32_0 = arith.constant 0 : i32
    %c0_i32_1 = arith.constant 0 : i32
    return %arg0, %c0_i32, %c0_i32_0 : i32, i32, i32
  }
}

</mosaic_0001>

<bundles_post_ra>
// kernel: tpu_custom_call.1
= control target key start
LH: loop header
LB: loop body
LE: loop exit
PB: predicated region body
PF: predicated region fallthrough
CT: control target
= control target key end

     0   :  { %s5284_s18 = smov 0   ;;  %s7298_s0 = inlined_call_operand.vmem [shape: bf16[4,192,16], index: 0, kind: input, shape index: {}]   ;;  %s7299_s1 = inlined_call_operand.vmem [shape: f32[128,1], index: 1, kind: input, shape index: {}]   ;;  %s7300_s2 = inlined_call_operand.vmem [shape: bf16[144,32], index: 2, kind: input, shape index: {}]   ;;  %s7301_s3 = inlined_call_operand.vmem [shape: bf16[288,32], index: 3, kind: input, shape index: {}]   ;;  %s7302_s4 = inlined_call_operand.vmem [shape: bf16[16,32], index: 4, kind: input, shape index: {}]   ;;  %s7303_s5 = inlined_call_operand.vmem [shape: f32[1,32], index: 5, kind: input, shape index: {}]   ;;  %s7304_s6 = inlined_call_operand.vmem [shape: f32[1,32], index: 6, kind: input, shape index: {}]   ;;  %s7305_s7 = inlined_call_operand.vmem [shape: f32[1,32], index: 7, kind: input, shape index: {}]   ;;  %s7306_s8 = inlined_call_operand.vmem [shape: f32[1,32], index: 8, kind: input, shape index: {}]   ;;  %s7307_s9 = inlined_call_operand.vmem [shape: f32[1,32], index: 9, kind: input, shape index: {}]   ;;  %s7308_s10 = inlined_call_operand.vmem [shape: f32[1,32], index: 10, kind: input, shape index: {}]   ;;  %s7309_s11 = inlined_call_operand.vmem [shape: f32[32,2], index: 11, kind: input, shape index: {}]   ;;  %s7310_s12 = inlined_call_operand.vmem [shape: f32[1,2], index: 12, kind: input, shape index: {}]   ;;  %s7311_s13 = inlined_call_operand.vmem [shape: f32[2,32], index: 13, kind: input, shape index: {}]   ;;  %s7312_s14 = inlined_call_operand.vmem [shape: f32[1,32], index: 14, kind: input, shape index: {}]   ;;  %s7313_s15 = inlined_call_operand.vmem [shape: f32[4,128,32], index: 15, kind: output, shape index: {}]  }
   0x1 LB: > { %s4590_s19 = sadd.s32 4294967295, %s5191_s18   ;;  %p4594_p0 = scmp.ge.s32.totalorder %s5191_s18, 1  ;;  %s5191_s18 = sphi %s5284_s18, %s25_s18  }
   0x2   : > { %p439_p1 = scmp.lt.s32.totalorder %s5191_s18, 3 }
   0x4   : > { %p440_p2 = pnand %p4594_p0, %p439_p1 }
   0x6   : > { %443 = sbr.rel (%p440_p2) target bundleno = 1535 (0x5ff), region = 80 }
   0xd   : > { %s4595_s20 = sshll.u32 %s4590_s19, 1  ;;  %v5193_v0 = vmov 0   ;;  %v5116_v1 = vld [vmem:[%s7300_s2] sm:$0xff]   ;;  %v5119_v2 = vld [vmem:[%s7300_s2 + $0x8] sm:$0xff]   ;;  %vm725_vm0 = vsmask.f32 7424 }
   0xe   : > { %p490_p3 = scmp.lt.s32.totalorder %s4595_s20, 3  ;;  %1711 = vmatprep.subr.bf16.mxu0 %v5193_v0  ;;  %5102 = vset.pattern.permute.xlu0 %v5193_v0  ;;  %v5120_v3 = vld [vmem:[%s7300_s2 + $0x10] sm:$0xff]   ;;  %vm586_vm1 = vsmask.f32 4352  ;;  %s5194_s16 = smov 16   ;;  %vm675_vm2 = vcmask 130048  }
   0xf   : > { %5103 = vset.pattern.permute.xlu1 %v5193_v0  ;;  %1712 = vmatpush1.bf16.msra.mxu0 %v5116_v1  ;;  %s5195_s17 = smov 64   ;;  %v5127_v24 = vld [vmem:[%s7300_s2 + $0x18] sm:$0xff]   ;;  %s5196_s22 = smov 112   ;;  %v5128_v44 = vld [vmem:[%s7300_s2 + $0x20] sm:$0xff]   ;;  %v5130_v58 = vld [vmem:[%s7300_s2 + $0x28] sm:$0xff]   ;;  %vm716_vm3 = vcmask 261248  }
  0x10   : > { %s7399_s20 = smov (!%p490_p3, %s4595_s20), 3  ;;  %1713 = vmatprep.subr.bf16.mxu0 %v5193_v0  ;;  %s5198_s29 = smov 48   ;;  %vm818_vm4 = vcmask 392448   ;;  %vm860_vm5 = vcmask 523648   ;;  %vm894_vm6 = vcmask 654848   ;;  %vm935_vm7 = vcmask 786048  }
  0x11   : > { %s5082_s25 = smul.u32 96, %s7399_s20  ;;  %s5199_s30 = smov 80   ;;  %vm977_vm8 = vcmask 917248   ;;  %vm1011_vm9 = vcmask 1048448   ;;  %vm2184_vm10 = vcmask 261120   ;;  %vm2225_vm11 = vcmask 523520  }
  0x12   : > { %s5200_s23 = smov 96   ;;  %vm2321_vm12 = vcmask 785920   ;;  %vm2363_vm13 = vcmask 1048320   ;;  %vm5203_vm14 = vmmov 0   ;;  %vm4098_vm15 = vcmask 1041408   ;;  %s4806_s24 = sshll.u32 %s7399_s20, 7 }
  0x13   : > { %s5308_s28 = scalar_lea.vmem %s7298_s0, %s5082_s25  ;;  %1714 = vmatpush1.bf16.msra.mxu0 %v5119_v2  ;;  %s5197_s25 = smov 32  }
  0x14   : > { %v521_v4 = vld [vmem:[%s5308_s28 + $0x8] sm:$0xf]  ;;  %v522_v5 = vld [vmem:[%s5308_s28 + $0xc] sm:$0xf]  ;;  %v523_v6 = vld [vmem:[%s5308_s28 + $0x10] sm:$0xf]  ;;  %1715 = vmatprep.subr.bf16.mxu0 %v5193_v0 }
  0x15   : > { %v4601_v7 = vcombine.low %v522_v5, %v523_v6  ;;  %v4611_v8 = vcombine.low %v521_v4, %v522_v5  ;;  %v520_v9 = vld [vmem:[%s5308_s28 + $0x4] sm:$0xf]  ;;  %v524_v10 = vld [vmem:[%s5308_s28 + $0x14] sm:$0xf]  ;;  %v525_v11 = vld [vmem:[%s5308_s28 + $0x18] sm:$0xf] }
  0x16   : > { %v5320_v12 = vcombine.low %v520_v9, %v521_v4  ;;  %v526_v13 = vld [vmem:[%s5308_s28 + $0x1c] sm:$0xf]  ;;  %v4602_v14 = vcombine.low %v524_v10, %v525_v11  ;;  %v4612_v15 = vcombine.low %v523_v6, %v524_v10  ;;  %v527_v23 = vld [vmem:[%s5308_s28 + $0x20] sm:$0xf]  ;;  %v528_v29 = vld [vmem:[%s5308_s28 + $0x24] sm:$0xf] }
  0x17   : > { %v596_v16 = vshrl.u32 %v4601_v7, 16  ;;  %v599_v17 = vshll.u32 %v4601_v7, 16  ;;  %692 = vrot.lane.b32.xlu0 %v4611_v8, %s5194_s16  ;;  %v729_v18 = vshll.u32 %v4611_v8, 16  ;;  %v5324_v19 = vcombine.low %v525_v11, %v526_v13  ;;  %1716 = vmatpush1.bf16.msra.mxu0 %v5120_v3  ;;  %v529_v34 = vld [vmem:[%s5308_s28 + $0x28] sm:$0xf] }
  0x18   : > { %v588_v20 = vshrl.u32 %v5320_v12, 16  ;;  %870 = vrot.lane.b32.xlu1 %v4612_v15, %s5195_s17  ;;  %v727_v21 = vshrl.u32 %v4611_v8, 16  ;;  %v734_v22 = vshll.u32 %v4612_v15, 16  ;;  %v605_v28 = vshrl.u32 %v4602_v14, 16  ;;  %1717 = vmatprep.subr.bf16.mxu0 %v5193_v0  ;;  %v530_v43 = vld [vmem:[%s5308_s28 + $0x2c] sm:$0xf] }
  0x19   : > { %v731_v25 = vrot.slane %v729_v18, 1  ;;  %v598_v26 = vrot.slane %v596_v16, 3  ;;  %v601_v27 = vrot.slane %v599_v17, 4  ;;  %v591_v31 = vshll.u32 %v5320_v12, 16  ;;  %v531_v57 = vld [vmem:[%s5308_s28 + $0x30] sm:$0xf] }
  0x1a   : > { %v5334_v30 = vrot.slane %v588_v20, 3  ;;  %v736_v32 = vrot.slane %v734_v22, 1  ;;  %v608_v33 = vshll.u32 %v4602_v14, 16  ;;  %v607_v37 = vrot.slane %v605_v28, 3  ;;  %v532_v63 = vld [vmem:[%s5308_s28 + $0x34] sm:$0xf] }
  0x1b   : > { %987 = vrot.lane.b32.xlu0 %v5324_v19, %s5196_s22  ;;  %v732_v35 = vor.u32 %v731_v25, %v727_v21  ;;  %v5340_v36 = vor.u32 %v601_v27, %v598_v26  ;;  %v738_v38 = vshrl.u32 %v4612_v15, 16  ;;  %v742_v40 = vshll.u32 %v5324_v19, 16  ;;  %1718 = vmatpush1.bf16.msra.mxu0 %v5127_v24  ;;  %v533_v9 = vld [vmem:[%s5308_s28 + $0x38] sm:$0xf]  ;;  %v5131_v21 = vld [vmem:[%s7300_s2 + $0x30] sm:$0xff]  }
  0x1c   : > { %694 = vrot.lane.b32.xlu1 %v4612_v15, %s5194_s16  ;;  %v610_v39 = vrot.slane %v608_v33, 4  ;;  %v4603_v41 = vcombine.low %v526_v13, %v527_v23  ;;  %v5344_v42 = vcombine.low %v527_v23, %v528_v29  ;;  %v746_v47 = vshrl.u32 %v5324_v19, 16  ;;  %1719 = vmatprep.subr.bf16.mxu0 %v5193_v0  ;;  %v534_v15 = vld [vmem:[%s5308_s28 + $0x3c] sm:$0xf]  ;;  %v535_v26 = vld [vmem:[%s5308_s28 + $0x40] sm:$0xf] }
  0x1d   : > { %v737_v45 = vsel %vm725_vm0, %v732_v35, %v736_v32  ;;  %v740_v46 = vor.u32 %v738_v38, %v736_v32  ;;  %v4604_v48 = vcombine.low %v528_v29, %v529_v34  ;;  %v744_v50 = vrot.slane %v742_v40, 1  ;;  %v536_v27 = vld [vmem:[%s5308_s28 + $0x44] sm:$0xf] }
  0x1e   : > { %v611_v49 = vor.u32 %v610_v39, %v607_v37  ;;  %v614_v51 = vshrl.u32 %v4603_v41, 16  ;;  %v617_v52 = vshll.u32 %v4603_v41, 16  ;;  %v750_v53 = vshll.u32 %v5344_v42, 16 }
  0x1f   : > { %794 = vrot.lane.b32.xlu0 %v737_v45, %s5197_s25  ;;  %v5355_v54 = vcombine.low %v529_v34, %v530_v43  ;;  %v623_v55 = vshrl.u32 %v4604_v48, 16  ;;  %v626_v56 = vshll.u32 %v4604_v48, 16  ;;  %v745_v60 = vsel %vm725_vm0, %v740_v46, %v744_v50  ;;  %1720 = vmatpush1.bf16.msra.mxu0 %v5128_v44  ;;  %v5132_v34 = vld [vmem:[%s7300_s2 + $0x38] sm:$0xff]  }
  0x20   : > { %v612_v59 = vsel %vm586_vm1, %v5340_v36, %v611_v49  ;;  %v616_v61 = vrot.slane %v614_v51, 3  ;;  %v619_v62 = vrot.slane %v617_v52, 4  ;;  %v748_v1 = vor.u32 %v746_v47, %v744_v50  ;;  %1721 = vmatprep.subr.bf16.mxu0 %v5193_v0 }
  0x21   : > { %836 = vrot.lane.b32.xlu1 %v612_v59, %s5198_s29  ;;  %677 = vst.msk [vmem:[#allocation2 + $0x10] sm:$0xff] %vm675_vm2, %v612_v59  ;;  %v752_v2 = vrot.slane %v750_v53, 1  ;;  %v625_v3 = vrot.slane %v623_v55, 3  ;;  %v628_v4 = vrot.slane %v626_v56, 4  ;;  %v754_v6 = vshrl.u32 %v5344_v42, 16 }
  0x22   : > { %v620_v5 = vor.u32 %v619_v62, %v616_v61  ;;  %v758_v7 = vshll.u32 %v5355_v54, 16  ;;  %v4605_v8 = vcombine.low %v530_v43, %v531_v57  ;;  %v5375_v13 = vcombine.low %v531_v57, %v532_v63  ;;  %v5420_v55 = vld [vmem:[%s5308_s28 + $0x4c] sm:$0xf]  ;;  %v5133_v61 = vld [vmem:[%s7300_s2 + $0x40] sm:$0xff]  }
  0x23   : > { %911 = vrot.lane.b32.xlu0 %v745_v60, %s5199_s30  ;;  %v5373_v10 = vsel %vm725_vm0, %v748_v1, %v752_v2  ;;  %v629_v11 = vor.u32 %v628_v4, %v625_v3  ;;  %v762_v14 = vshrl.u32 %v5355_v54, 16  ;;  %v756_v17 = vor.u32 %v754_v6, %v752_v2  ;;  %1722 = vmatpush1.bf16.msra.mxu0 %v5130_v58  ;;  %v5441_v4 = vld [vmem:[%s5308_s28 + $0x50] sm:$0xf] }
  0x24   : > { %v621_v16 = vsel %vm586_vm1, %v611_v49, %v620_v5  ;;  %1036 = vst.msk [vmem:[#allocation2 + $0x8] sm:$0xff] %vm675_vm2, %v5373_v10  ;;  %v760_v18 = vrot.slane %v758_v7, 1  ;;  %v632_v20 = vshrl.u32 %v4605_v8, 16  ;;  %v635_v23 = vshll.u32 %v4605_v8, 16  ;;  %1723 = vmatprep.subr.bf16.mxu0 %v5193_v0  ;;  %v537_v49 = vld [vmem:[%s5308_s28 + $0x48] sm:$0xf] }
  0x25   : > { %953 = vrot.lane.b32.xlu1 %v621_v16, %s5200_s23  ;;  %678 = vst.msk [vmem:[#allocation2 + $0x20] sm:$0xff] %vm675_vm2, %v621_v16  ;;  %v5388_v22 = vsel %vm586_vm1, %v620_v5, %v629_v11  ;;  %v766_v24 = vshll.u32 %v5375_v13, 16  ;;  %v4606_v25 = vcombine.low %v532_v63, %v533_v9  ;;  %v5399_v33 = vcombine.low %v533_v9, %v534_v15  ;;  %v5118_v5 = vld [vmem:[%s5308_s28 + $0x58] ss:$0 sps:$4 sm:$0xff]  }
  0x26   : > { %679 = vst.msk [vmem:[#allocation2 + $0x30] sm:$0xff] %vm675_vm2, %v5388_v22  ;;  %v5397_v28 = vsel %vm725_vm0, %v756_v17, %v760_v18  ;;  %v634_v29 = vrot.slane %v632_v20, 3  ;;  %v764_v32 = vor.u32 %v762_v14, %v760_v18  ;;  %v637_v35 = vrot.slane %v635_v23, 4 }
  0x27   : > { %796 = vrot.lane.b32.xlu0 %v745_v60, %s5197_s25  ;;  %1037 = vst.msk [vmem:[#allocation2 + $0x18] sm:$0xff] %vm675_vm2, %v5397_v28  ;;  %v768_v37 = vrot.slane %v766_v24, 1  ;;  %v641_v38 = vshrl.u32 %v4606_v25, 16  ;;  %v644_v39 = vshll.u32 %v4606_v25, 16  ;;  %v770_v40 = vshrl.u32 %v5375_v13, 16  ;;  %1724 = vmatpush1.bf16.msra.mxu0 %v5131_v21 }
  0x28   : > { %v774_v41 = vshll.u32 %v5399_v33, 16  ;;  %v4607_v43 = vcombine.low %v534_v15, %v535_v26  ;;  %v5409_v44 = vcombine.low %v535_v26, %v536_v27  ;;  %v638_v45 = vor.u32 %v637_v35, %v634_v29  ;;  %1725 = vmatprep.subr.bf16.mxu0 %v5193_v0  ;;  %v5430_v60 = vld [vmem:[%s5308_s28 + $0x54] sm:$0xf] }
  0x29   : > { %838 = vrot.lane.b32.xlu1 %v621_v16, %s5198_s29  ;;  %v5413_v46 = vsel %vm725_vm0, %v764_v32, %v768_v37  ;;  %v643_v47 = vrot.slane %v641_v38, 3  ;;  %v646_v48 = vrot.slane %v644_v39, 4  ;;  %v772_v50 = vor.u32 %v770_v40, %v768_v37  ;;  %v5489_v37 = vld [vmem:[%s5308_s28 + $0x68] sm:$0xf]  ;;  %v4624_v38 = vld [vmem:[%s5308_s28 + $0x6c] sm:$0xf] }
  0x2a   : > { %1038 = vst.msk [vmem:[#allocation2 + $0x28] sm:$0xff] %vm675_vm2, %v5413_v46  ;;  %v776_v51 = vrot.slane %v774_v41, 1  ;;  %v650_v52 = vshrl.u32 %v4607_v43, 16  ;;  %v653_v53 = vshll.u32 %v4607_v43, 16  ;;  %v5425_v56 = vsel %vm586_vm1, %v629_v11, %v638_v45  ;;  %v4626_v39 = vld [vmem:[%s5308_s28 + $0x74] sm:$0xf] }
  0x2b   : > { %872 = vrot.lane.b32.xlu0 %v5324_v19, %s5195_s17  ;;  %v647_v57 = vor.u32 %v646_v48, %v643_v47  ;;  %v778_v58 = vshrl.u32 %v5399_v33, 16  ;;  %v782_v59 = vshll.u32 %v5409_v44, 16  ;;  %v1560_v62 = vld [vmem:[#allocation2 + $0x8] sm:$0xff]  ;;  %680 = vst.msk [vmem:[#allocation2 + $0x40] sm:$0xff] %vm675_vm2, %v5425_v56  ;;  %v4608_v3 = vcombine.low %v536_v27, %v537_v49  ;;  %1726 = vmatpush1.bf16.msra.mxu0 %v5132_v34  ;;  %v4625_v27 = vld [vmem:[%s5308_s28 + $0x70] sm:$0xf] }
  0x2c   : > { %v5438_v63 = vsel %vm725_vm0, %v772_v50, %v776_v51  ;;  %v652_v1 = vrot.slane %v650_v52, 3  ;;  %v655_v2 = vrot.slane %v653_v53, 4  ;;  %4675 = vmatprep.mubr.msk.bf16.mxu0 %vm675_vm2, %v1560_v62  ;;  %v5453_v9 = vcombine.low %v537_v49, %v5420_v55  ;;  %1727 = vmatprep.subr.bf16.mxu0 %v5193_v0  ;;  %v4627_v43 = vld [vmem:[%s5308_s28 + $0x78] sm:$0xf] }
  0x2d   : > { %913 = vrot.lane.b32.xlu1 %v5373_v10, %s5199_s30  ;;  %v5448_v6 = vsel %vm586_vm1, %v638_v45, %v647_v57  ;;  %1039 = vst.msk [vmem:[#allocation2 + $0x38] sm:$0xff] %vm675_vm2, %v5438_v63  ;;  %v780_v7 = vor.u32 %v778_v58, %v776_v51  ;;  %v784_v8 = vrot.slane %v782_v59, 1  ;;  %v659_v14 = vshrl.u32 %v4608_v3, 16  ;;  %v4628_v51 = vld [vmem:[%s5308_s28 + $0x7c] sm:$0xf] }
  0x2e   : > { %681 = vst.msk [vmem:[#allocation2 + $0x50] sm:$0xff] %vm675_vm2, %v5448_v6  ;;  %v656_v11 = vor.u32 %v655_v2, %v652_v1  ;;  %v662_v15 = vshll.u32 %v4608_v3, 16  ;;  %v786_v16 = vshrl.u32 %v5409_v44, 16  ;;  %v5461_v17 = vrot.slane %v591_v31, 4 }
  0x2f   : > { %955 = vrot.lane.b32.xlu0 %v5388_v22, %s5200_s23  ;;  %v5466_v18 = vsel %vm725_vm0, %v780_v7, %v784_v8  ;;  %v790_v20 = vshll.u32 %v5453_v9, 16  ;;  %v5471_v21 = vcombine.low %v5441_v4, %v5430_v60  ;;  %v661_v12 = vrot.slane %v659_v14, 3  ;;  %1728 = vmatpush1.bf16.msra.mxu0 %v5133_v61  ;;  %v4629_v7 = vld [vmem:[%s5308_s28 + $0x80] sm:$0xf] }
  0x30   : > { %v5474_v23 = vsel %vm586_vm1, %v647_v57, %v656_v11  ;;  %1040 = vst.msk [vmem:[#allocation2 + $0x48] sm:$0xff] %vm675_vm2, %v5466_v18  ;;  %v664_v31 = vrot.slane %v662_v15, 4  ;;  %v788_v24 = vor.u32 %v786_v16, %v784_v8  ;;  %v903_v26 = vshrl.u32 %v5453_v9, 16  ;;  %v4630_v15 = vld [vmem:[%s5308_s28 + $0x84] sm:$0xf] }
  0x31   : > { %989 = vrot.lane.b32.xlu1 %v5344_v42, %s5196_s22  ;;  %682 = vst.msk [vmem:[#allocation2 + $0x60] sm:$0xff] %vm675_vm2, %v5474_v23  ;;  %v792_v25 = vrot.slane %v790_v20, 1  ;;  %v907_v32 = vshll.u32 %v5471_v21, 16  ;;  %v1020_v34 = vshrl.u32 %v5471_v21, 16  ;;  %v1024_v35 = vshll.u32 %v5118_v5, 16 }
  0x32   : > { %v5484_v29 = vor.u32 %v664_v31, %v661_v12  ;;  %v5518_v52 = vcombine.low %v5489_v37, %v4624_v38  ;;  %v4646_v57 = vcombine.low %v4626_v39, %v4627_v43  ;;  %v5527_v61 = vcombine.low %v4627_v43, %v4628_v51  ;;  %v4632_v43 = vld [vmem:[%s5308_s28 + $0x8c] sm:$0xf] }
  0x33   : > { %696 = vrot.lane.b32.xlu0 %v5324_v19, %s5194_s16  ;;  %v5496_v40 = vsel %vm725_vm0, %v788_v24, %v792_v25  ;;  %v905_v41 = vor.u32 %v903_v26, %v792_v25  ;;  %v909_v47 = vrot.slane %v907_v32, 1  ;;  %v1026_v48 = vrot.slane %v1024_v35, 1 }
  0x34   : > { %v5501_v45 = vsel %vm586_vm1, %v656_v11, %v5484_v29  ;;  %1041 = vst.msk [vmem:[#allocation2 + $0x58] sm:$0xff] %vm675_vm2, %v5496_v40  ;;  %v4645_v19 = vcombine.low %v4624_v38, %v4625_v27  ;;  %v1250_v59 = vshll.u32 %v5518_v52, 16  ;;  %v1248_v62 = vshrl.u32 %v5518_v52, 16 }
  0x35   : > { %798 = vrot.lane.b32.xlu1 %v5373_v10, %s5197_s25  ;;  %683 = vst.msk [vmem:[#allocation2 + $0x70] sm:$0xff] %vm675_vm2, %v5501_v45  ;;  %v5510_v49 = vsel %vm725_vm0, %v905_v41, %v909_v47  ;;  %v1022_v50 = vor.u32 %v1020_v34, %v909_v47  ;;  %v5520_v10 = vcombine.low %v4625_v27, %v4626_v39  ;;  %v1129_v14 = vshrl.u32 %v4646_v57, 16  ;;  %v4631_v34 = vld [vmem:[%s5308_s28 + $0x88] sm:$0xf]  ;;  %v4633_v47 = vld [vmem:[%s5308_s28 + $0x90] sm:$0xf] }
  0x36   : > { %1042 = vst.msk [vmem:[#allocation2 + $0x68] sm:$0xff] %vm675_vm2, %v5510_v49  ;;  %v1120_v58 = vshrl.u32 %v4645_v19, 16  ;;  %v1252_v2 = vrot.slane %v1250_v59, 1  ;;  %v594_v3 = vor.u32 %v5461_v17, %v5334_v30  ;;  %v1132_v12 = vshll.u32 %v4646_v57, 16 }
  0x37   : > { %840 = vrot.lane.b32.xlu0 %v5388_v22, %s5198_s29  ;;  %v1027_v53 = vsel %vm725_vm0, %v1022_v50, %v1026_v48  ;;  %v1123_v22 = vshll.u32 %v4645_v19, 16  ;;  %v1255_v1 = vshll.u32 %v5520_v10, 16  ;;  %v1259_v31 = vshrl.u32 %v5520_v10, 16 }
  0x38   : > { %1043 = vst.msk [vmem:[#allocation2 + $0x78] sm:$0xff] %vm675_vm2, %v1027_v53  ;;  %v1122_v5 = vrot.slane %v1120_v58, 3  ;;  %v1253_v16 = vor.u32 %v1252_v2, %v1248_v62  ;;  %v603_v20 = vsel %vm586_vm1, %v594_v3, %v5340_v36  ;;  %v1131_v17 = vrot.slane %v1129_v14, 3 }
  0x39   : > { %874 = vrot.lane.b32.xlu1 %v5344_v42, %s5195_s17  ;;  %v1257_v8 = vrot.slane %v1255_v1, 1  ;;  %v1125_v11 = vrot.slane %v1123_v22, 4  ;;  %676 = vst.msk [vmem:[#allocation2] sm:$0xff] %vm675_vm2, %v603_v20  ;;  %v1263_v24 = vshll.u32 %v5527_v61, 16  ;;  %v4647_v25 = vcombine.low %v4628_v51, %v4629_v7  ;;  %v4634_v51 = vld [vmem:[%s5308_s28 + $0x94] sm:$0xf] }
  0x3a   : > { %v1134_v36 = vrot.slane %v1132_v12, 4  ;;  %v5551_v32 = vcombine.low %v4629_v7, %v4630_v15  ;;  %v1267_v57 = vshrl.u32 %v5527_v61, 16  ;;  %v4648_v58 = vcombine.low %v4630_v15, %v4631_v34 }
  0x3b   : > { %915 = vrot.lane.b32.xlu0 %v5397_v28, %s5199_s30  ;;  %v5543_v30 = vor.u32 %v1125_v11, %v1122_v5  ;;  %v5549_v26 = vsel %vm725_vm0, %v1253_v16, %v1257_v8  ;;  %v1261_v27 = vor.u32 %v1259_v31, %v1257_v8  ;;  %v1265_v35 = vrot.slane %v1263_v24, 1  ;;  %v4636_v16 = vld [vmem:[%s5308_s28 + $0x9c] sm:$0xf] }
  0x3c   : > { %v1138_v38 = vshrl.u32 %v4647_v25, 16  ;;  %v1141_v39 = vshll.u32 %v4647_v25, 16  ;;  %v1135_v41 = vor.u32 %v1134_v36, %v1131_v17  ;;  %v5572_v59 = vcombine.low %v4631_v34, %v4632_v43  ;;  %v4637_v17 = vld [vmem:[%s5308_s28 + $0xa0] sm:$0xf]  ;;  %v4638_v34 = vld [vmem:[%s5308_s28 + $0xa4] sm:$0xf] }
  0x3d   : > { %957 = vrot.lane.b32.xlu1 %v5425_v56, %s5200_s23  ;;  %v5559_v48 = vsel %vm725_vm0, %v1261_v27, %v1265_v35  ;;  %v1275_v62 = vshrl.u32 %v5551_v32, 16  ;;  %v4649_v1 = vcombine.low %v4632_v43, %v4633_v47  ;;  %v1269_v2 = vor.u32 %v1267_v57, %v1265_v35 }
  0x3e   : > { %v1140_v19 = vrot.slane %v1138_v38, 3  ;;  %v1143_v50 = vrot.slane %v1141_v39, 4  ;;  %v5566_v53 = vsel %vm586_vm1, %v5543_v30, %v1135_v41  ;;  %v1147_v5 = vshrl.u32 %v4648_v58, 16 }
  0x3f   : > { %991 = vrot.lane.b32.xlu0 %v5355_v54, %s5196_s22  ;;  %1200 = vst.msk [vmem:[#allocation2 + $0x90] sm:$0xff] %vm675_vm2, %v5566_v53  ;;  %v1150_v7 = vshll.u32 %v4648_v58, 16  ;;  %v1279_v11 = vshll.u32 %v5572_v59, 16  ;;  %v5582_v14 = vcombine.low %v4633_v47, %v4634_v51  ;;  %v1156_v15 = vshrl.u32 %v4649_v1, 16 }
  0x40   : > { %v1144_v22 = vor.u32 %v1143_v50, %v1140_v19  ;;  %v1149_v20 = vrot.slane %v1147_v5, 3  ;;  %v1159_v36 = vshll.u32 %v4649_v1, 16  ;;  %v1283_v27 = vshrl.u32 %v5572_v59, 16 }
  0x41   : > { %698 = vrot.lane.b32.xlu1 %v5344_v42, %s5194_s16  ;;  %v1271_v42 = vshll.u32 %v5551_v32, 16  ;;  %v1152_v12 = vrot.slane %v1150_v7, 4  ;;  %v1281_v24 = vrot.slane %v1279_v11, 1  ;;  %v1158_v25 = vrot.slane %v1156_v15, 3 }
  0x42   : > { %v5579_v8 = vsel %vm586_vm1, %v1135_v41, %v1144_v22  ;;  %v1287_v38 = vshll.u32 %v5582_v14, 16  ;;  %v1161_v47 = vrot.slane %v1159_v36, 4  ;;  %v1291_v50 = vshrl.u32 %v5582_v14, 16 }
  0x43   : > { %800 = vrot.lane.b32.xlu0 %v5397_v28, %s5197_s25  ;;  %v4635_v28 = vld [vmem:[%s5308_s28 + $0x98] sm:$0xf]  ;;  %v1273_v3 = vrot.slane %v1271_v42, 1  ;;  %1201 = vst.msk [vmem:[#allocation2 + $0xa0] sm:$0xff] %vm675_vm2, %v5579_v8  ;;  %v1153_v35 = vor.u32 %v1152_v12, %v1149_v20  ;;  %v1285_v19 = vor.u32 %v1283_v27, %v1281_v24  ;;  %v4639_v12 = vld [vmem:[%s5308_s28 + $0xa8] sm:$0xf] }
  0x44   : > { %v4650_v39 = vcombine.low %v4634_v51, %v4635_v28  ;;  %v5600_v41 = vcombine.low %v4635_v28, %v4636_v16  ;;  %v1289_v42 = vrot.slane %v1287_v38, 1  ;;  %v4651_v28 = vcombine.low %v4636_v16, %v4637_v17 }
  0x45   : > { %842 = vrot.lane.b32.xlu1 %v5425_v56, %s5198_s29  ;;  %v5590_v56 = vsel %vm725_vm0, %v1269_v2, %v1273_v3  ;;  %v1277_v31 = vor.u32 %v1275_v62, %v1273_v3  ;;  %v5609_v57 = vsel %vm586_vm1, %v1144_v22, %v1153_v35  ;;  %v1162_v62 = vor.u32 %v1161_v47, %v1158_v25 }
  0x46   : > { %1551 = vst.msk [vmem:[#allocation2 + $0x88] sm:$0xff] %vm675_vm2, %v5590_v56  ;;  %v1165_v51 = vshrl.u32 %v4650_v39, 16  ;;  %v1168_v58 = vshll.u32 %v4650_v39, 16  ;;  %1202 = vst.msk [vmem:[#allocation2 + $0xb0] sm:$0xff] %vm675_vm2, %v5609_v57  ;;  %v1295_v1 = vshll.u32 %v5600_v41, 16  ;;  %v5616_v2 = vcombine.low %v4637_v17, %v4638_v34 }
  0x47   : > { %876 = vrot.lane.b32.xlu0 %v5355_v54, %s5195_s17  ;;  %v5603_v43 = vsel %vm725_vm0, %v1277_v31, %v1281_v24  ;;  %v5621_v22 = vsel %vm725_vm0, %v1285_v19, %v1289_v42  ;;  %v1293_v7 = vor.u32 %v1291_v50, %v1289_v42  ;;  %v5624_v11 = vsel %vm586_vm1, %v1153_v35, %v1162_v62 }
  0x48   : > { %1552 = vst.msk [vmem:[#allocation2 + $0x98] sm:$0xff] %vm675_vm2, %v5603_v43  ;;  %v1167_v3 = vrot.slane %v1165_v51, 3  ;;  %v1170_v5 = vrot.slane %v1168_v58, 4  ;;  %1553 = vst.msk [vmem:[#allocation2 + $0xa8] sm:$0xff] %vm675_vm2, %v5621_v22  ;;  %v1297_v15 = vrot.slane %v1295_v1, 1  ;;  %v1174_v20 = vshrl.u32 %v4651_v28, 16 }
  0x49   : > { %917 = vrot.lane.b32.xlu1 %v5413_v46, %s5199_s30  ;;  %v1177_v16 = vshll.u32 %v4651_v28, 16  ;;  %1203 = vst.msk [vmem:[#allocation2 + $0xc0] sm:$0xff] %vm675_vm2, %v5624_v11  ;;  %v4652_v17 = vcombine.low %v4638_v34, %v4639_v12  ;;  %v1299_v27 = vshrl.u32 %v5600_v41, 16  ;;  %v4641_v28 = vld [vmem:[%s5308_s28 + $0xb0] sm:$0xf] }
  0x4a   : > { %v1171_v31 = vor.u32 %v1170_v5, %v1167_v3  ;;  %v5634_v24 = vsel %vm725_vm0, %v1293_v7, %v1297_v15  ;;  %v1176_v25 = vrot.slane %v1174_v20, 3 }
  0x4b   : > { %959 = vrot.lane.b32.xlu0 %v5448_v6, %s5200_s23  ;;  %v1179_v36 = vrot.slane %v1177_v16, 4  ;;  %1554 = vst.msk [vmem:[#allocation2 + $0xb8] sm:$0xff] %vm675_vm2, %v5634_v24  ;;  %v1183_v38 = vshrl.u32 %v4652_v17, 16  ;;  %v1186_v34 = vshll.u32 %v4652_v17, 16  ;;  %v1301_v47 = vor.u32 %v1299_v27, %v1297_v15 }
  0x4c   : > { %v5640_v35 = vsel %vm586_vm1, %v1162_v62, %v1171_v31  ;;  %v4640_v62 = vld [vmem:[%s5308_s28 + $0xac] sm:$0xf]  ;;  %v1307_v15 = vshrl.u32 %v5616_v2, 16 }
  0x4d   : > { %993 = vrot.lane.b32.xlu1 %v5375_v13, %s5196_s22  ;;  %1204 = vst.msk [vmem:[#allocation2 + $0xd0] sm:$0xff] %vm675_vm2, %v5640_v35  ;;  %v1180_v39 = vor.u32 %v1179_v36, %v1176_v25  ;;  %v1185_v19 = vrot.slane %v1183_v38, 3  ;;  %v1188_v50 = vrot.slane %v1186_v34, 4  ;;  %v5673_v1 = vcombine.low %v4639_v12, %v4640_v62 }
  0x4e   : > { %v4653_v3 = vcombine.low %v4640_v62, %v4641_v28 }
  0x4f   : > { %700 = vrot.lane.b32.xlu0 %v5355_v54, %s5194_s16  ;;  %v1303_v54 = vshll.u32 %v5616_v2, 16  ;;  %v5650_v42 = vsel %vm586_vm1, %v1171_v31, %v1180_v39  ;;  %v1189_v58 = vor.u32 %v1188_v50, %v1185_v19  ;;  %v1311_v20 = vshll.u32 %v5673_v1, 16 }
  0x50   : > { %1205 = vst.msk [vmem:[#allocation2 + $0xe0] sm:$0xff] %vm675_vm2, %v5650_v42  ;;  %v1348_v5 = vshrl.u32 %v4653_v3, 16  ;;  %v1351_v7 = vshll.u32 %v4653_v3, 16 }
  0x51   : > { %802 = vrot.lane.b32.xlu1 %v5413_v46, %s5197_s25  ;;  %v1305_v46 = vrot.slane %v1303_v54, 1  ;;  %v1313_v17 = vrot.slane %v1311_v20, 1  ;;  %v5139_v20 = vld [vmem:[%s5308_s28 + $0xb8] ss:$0 sps:$4 sm:$0xff]  }
  0x52   : > { %v1350_v16 = vrot.slane %v1348_v5, 3  ;;  %v1353_v31 = vrot.slane %v1351_v7, 4 }
  0x53   : > { %844 = vrot.lane.b32.xlu0 %v5448_v6, %s5198_s29  ;;  %v5657_v51 = vsel %vm725_vm0, %v1301_v47, %v1305_v46  ;;  %v5664_v6 = vsel %vm586_vm1, %v1180_v39, %v1189_v58  ;;  %v1309_v12 = vor.u32 %v1307_v15, %v1305_v46  ;;  %v1421_v46 = vshrl.u32 %v5673_v1, 16 }
  0x54   : > { %1555 = vst.msk [vmem:[#allocation2 + $0xc8] sm:$0xff] %vm675_vm2, %v5657_v51  ;;  %1206 = vst.msk [vmem:[#allocation2 + $0xf0] sm:$0xff] %vm675_vm2, %v5664_v6  ;;  %v1354_v25 = vor.u32 %v1353_v31, %v1350_v16  ;;  %v4610_v15 = vcombine.low %v5430_v60, %v5430_v60 }
  0x55   : > { %878 = vrot.lane.b32.xlu1 %v5375_v13, %s5195_s17  ;;  %v1423_v3 = vor.u32 %v1421_v46, %v1313_v17 }
  0x56   : > { %v5694_v36 = vsel %vm586_vm1, %v1189_v58, %v1354_v25 }
  0x57   : > { %919 = vrot.lane.b32.xlu0 %v5438_v63, %s5199_s30 }
  0x59   : > { %961 = vrot.lane.b32.xlu1 %v5474_v23, %s5200_s23 }
  0x5b   : > { %995 = vrot.lane.b32.xlu0 %v5399_v33, %s5196_s22 }
  0x5d   : > { %702 = vrot.lane.b32.xlu1 %v5375_v13, %s5194_s16  ;;  %v4609_v13 = vcombine.low %v5420_v55, %v5441_v4  ;;  %v4622_v55 = vld [vmem:[%s5308_s28 + $0x64] sm:$0xf]  ;;  %v4642_v4 = vld [vmem:[%s5308_s28 + $0xb4] sm:$0xf] }
  0x5e   : > { %v5704_v34 = vcombine.low %v4641_v28, %v4642_v4  ;;  %v4644_v39 = vcombine.low %v4622_v55, %v5489_v37  ;;  %v4654_v47 = vcombine.low %v4642_v4, %v4642_v4  ;;  %v948_v55 = vshll.u32 %v4610_v15, 16 }
  0x5f   : > { %804 = vrot.lane.b32.xlu0 %v5438_v63, %s5197_s25  ;;  %v5689_v63 = vsel %vm725_vm0, %v1309_v12, %v1313_v17  ;;  %v831_v27 = vshll.u32 %v4609_v13, 16  ;;  %v1539_v17 = vshll.u32 %v5139_v20, 16 }
  0x60   : > { %1556 = vst.msk [vmem:[#allocation2 + $0xd8] sm:$0xff] %vm675_vm2, %v5689_v63  ;;  %v1425_v19 = vshll.u32 %v5704_v34, 16  ;;  %v1462_v50 = vshrl.u32 %v4654_v47, 16  ;;  %v1465_v58 = vshll.u32 %v4654_v47, 16  ;;  %v1115_v5 = vshll.u32 %v4644_v39, 16 }
  0x61   : > { %846 = vrot.lane.b32.xlu1 %v5474_v23, %s5198_s29  ;;  %v828_v23 = vshrl.u32 %v4609_v13, 16  ;;  %v833_v38 = vrot.slane %v831_v27, 4  ;;  %v945_v27 = vshrl.u32 %v4610_v15, 16  ;;  %v1541_v4 = vrot.slane %v1539_v17, 1 }
  0x62   : > { %v1427_v28 = vrot.slane %v1425_v19, 1  ;;  %v1464_v37 = vrot.slane %v1462_v50, 3  ;;  %v1467_v7 = vrot.slane %v1465_v58, 4  ;;  %v1117_v13 = vrot.slane %v1115_v5, 4 }
  0x63   : > { %880 = vrot.lane.b32.xlu0 %v5399_v33, %s5195_s17  ;;  %v830_v54 = vrot.slane %v828_v23, 3 }
  0x64   : > { %v5719_v16 = vsel %vm725_vm0, %v1423_v3, %v1427_v28 }
  0x65   : > { %921 = vrot.lane.b32.xlu1 %v5466_v18, %s5199_s30  ;;  %v834_v62 = vor.u32 %v833_v38, %v830_v54  ;;  %1557 = vst.msk [vmem:[#allocation2 + $0xe8] sm:$0xff] %vm675_vm2, %v5719_v16  ;;  %v947_v38 = vrot.slane %v945_v27, 3 }
  0x67   : > { %963 = vrot.lane.b32.xlu0 %v5501_v45, %s5200_s23  ;;  %v835_v31 = vsel %vm586_vm1, %v5484_v29, %v834_v62 }
  0x69   : > { %997 = vrot.lane.b32.xlu1 %v5409_v44, %s5196_s22 }
  0x6b   : > { %704 = vrot.lane.b32.xlu0 %v5399_v33, %s5194_s16  ;;  %v1112_v33 = vshrl.u32 %v4644_v39, 16  ;;  %v950_v39 = vrot.slane %v948_v55, 4 }
  0x6d   : > { %806 = vrot.lane.b32.xlu1 %v5466_v18, %s5197_s25  ;;  %v1535_v18 = vshrl.u32 %v5704_v34, 16  ;;  %v1114_v60 = vrot.slane %v1112_v33, 3  ;;  %v951_v47 = vor.u32 %v950_v39, %v947_v38 }
  0x6f   : > { %848 = vrot.lane.b32.xlu0 %v5501_v45, %s5198_s29  ;;  %v1468_v45 = vor.u32 %v1467_v7, %v1464_v37  ;;  %v1537_v12 = vor.u32 %v1535_v18, %v1427_v28  ;;  %v1118_v29 = vor.u32 %v1117_v13, %v1114_v60  ;;  %v952_v46 = vsel %vm586_vm1, %v834_v62, %v951_v47 }
  0x71   : > { %882 = vrot.lane.b32.xlu1 %v5409_v44, %s5195_s17  ;;  %v5731_v23 = vsel %vm586_vm1, %v1354_v25, %v1468_v45  ;;  %v1542_v54 = vsel %vm725_vm0, %v1537_v12, %v1541_v4  ;;  %v1127_v25 = vsel %vm586_vm1, %v1118_v29, %v5543_v30 }
  0x72   : > { %1558 = vst.msk [vmem:[#allocation2 + $0xf8] sm:$0xff] %vm675_vm2, %v1542_v54  ;;  %1199 = vst.msk [vmem:[#allocation2 + $0x80] sm:$0xff] %vm675_vm2, %v1127_v25 }
  0x73   : > { %923 = vrot.lane.b32.xlu0 %v5496_v40, %s5199_s30 }
  0x75   : > { %965 = vrot.lane.b32.xlu1 %v835_v31, %s5200_s23 }
  0x77   : > { %999 = vrot.lane.b32.xlu0 %v5453_v9, %s5196_s22 }
  0x79   : > { %706 = vrot.lane.b32.xlu1 %v5409_v44, %s5194_s16 }
  0x7b   : > { %808 = vrot.lane.b32.xlu0 %v5496_v40, %s5197_s25 }
  0x7d   : > { %850 = vrot.lane.b32.xlu1 %v835_v31, %s5198_s29 }
  0x7f   : > { %884 = vrot.lane.b32.xlu0 %v5453_v9, %s5195_s17 }
  0x81   : > { %925 = vrot.lane.b32.xlu1 %v5510_v49, %s5199_s30 }
  0x83   : > { %967 = vrot.lane.b32.xlu0 %v952_v46, %s5200_s23 }
  0x85   : > { %1001 = vrot.lane.b32.xlu1 %v5471_v21, %s5196_s22 }
  0x87   : > { %1215 = vrot.lane.b32.xlu0 %v5518_v52, %s5194_s16 }
  0x89   : > { %1315 = vrot.lane.b32.xlu1 %v5549_v26, %s5197_s25  ;;  %v693_v44 = vpop.permute.xlu0 %692 }
  0x8a   : > { %717 = vst.msk [vmem:[#allocation2] sm:$0xff] %vm716_vm3, %v693_v44  ;;  %v871_v9 = vpop.permute.xlu1 %870 }
  0x8b   : > { %1356 = vrot.lane.b32.xlu0 %v5566_v53, %s5198_s29 }
  0x8d   : > { %1389 = vrot.lane.b32.xlu1 %v5520_v10, %s5195_s17  ;;  %v988_v40 = vpop.permute.xlu0 %987 }
  0x8e   : > { %v695_v49 = vpop.permute.xlu1 %694 }
  0x8f   : > { %718 = vst.msk [vmem:[#allocation2 + $0x10] sm:$0xff] %vm716_vm3, %v695_v49  ;;  %1429 = vrot.lane.b32.xlu0 %v5559_v48, %s5199_s30 }
  0x91   : > { %1470 = vrot.lane.b32.xlu1 %v5579_v8, %s5200_s23  ;;  %v795_v21 = vpop.permute.xlu0 %794 }
  0x92   : > { %819 = vst.msk [vmem:[#allocation2] sm:$0xff] %vm818_vm4, %v795_v21 }
  0x93   : > { %v837_v52 = vpop.permute.xlu1 %836  ;;  %1503 = vrot.lane.b32.xlu0 %v5527_v61, %s5196_s22 }
  0x94   : > { %861 = vst.msk [vmem:[#allocation2] sm:$0xff] %vm860_vm5, %v837_v52 }
  0x95   : > { %1217 = vrot.lane.b32.xlu1 %v5520_v10, %s5194_s16  ;;  %v912_v30 = vpop.permute.xlu0 %911  ;;  %895 = vst.msk [vmem:[#allocation2] sm:$0xff] %vm894_vm6, %v871_v9 }
  0x96   : > { %936 = vst.msk [vmem:[#allocation2] sm:$0xff] %vm935_vm7, %v912_v30 }
  0x97   : > { %v954_v26 = vpop.permute.xlu1 %953  ;;  %1317 = vrot.lane.b32.xlu0 %v5559_v48, %s5197_s25 }
  0x98   : > { %978 = vst.msk [vmem:[#allocation2] sm:$0xff] %vm977_vm8, %v954_v26 }
  0x99   : > { %1012 = vst.msk [vmem:[#allocation2] sm:$0xff] %vm1011_vm9, %v988_v40  ;;  %1358 = vrot.lane.b32.xlu1 %v5579_v8, %s5198_s29  ;;  %v797_v53 = vpop.permute.xlu0 %796  ;;  %v1562_v8 = vld [vmem:[#allocation2 + $0x18] sm:$0xff] }
  0x9a   : > { %820 = vst.msk [vmem:[#allocation2 + $0x10] sm:$0xff] %vm818_vm4, %v797_v53 }
  0x9b   : > { %v839_v10 = vpop.permute.xlu1 %838  ;;  %1391 = vrot.lane.b32.xlu0 %v5527_v61, %s5195_s17 }
  0x9c   : > { %862 = vst.msk [vmem:[#allocation2 + $0x10] sm:$0xff] %vm860_vm5, %v839_v10 }
  0x9d   : > { %1431 = vrot.lane.b32.xlu1 %v5590_v56, %s5199_s30  ;;  %v873_v48 = vpop.permute.xlu0 %872 }
  0x9e   : > { %896 = vst.msk [vmem:[#allocation2 + $0x10] sm:$0xff] %vm894_vm6, %v873_v48 }
  0x9f   : > { %v914_v19 = vpop.permute.xlu1 %913  ;;  %1472 = vrot.lane.b32.xlu0 %v5609_v57, %s5200_s23 }
  0xa0   : > { %937 = vst.msk [vmem:[#allocation2 + $0x10] sm:$0xff] %vm935_vm7, %v914_v19  ;;  %v1559_v50 = vld [vmem:[#allocation2] sm:$0xff] }
  0xa1   : > { %1505 = vrot.lane.b32.xlu1 %v5551_v32, %s5196_s22  ;;  %1744 = vmatmul.mubr.bf16.vlgmr.msra.gmra.mrb[0].mxu0 %v1559_v50  ;;  %v956_v58 = vpop.permute.xlu0 %955  ;;  %v509_v50 = vld [vmem:[%s7299_s1 + $0x28] sm:$0xff] }
  0xa2   : > { %979 = vst.msk [vmem:[#allocation2 + $0x10] sm:$0xff] %vm977_vm8, %v956_v58  ;;  %4676 = vmatprep.mubr.msk.bf16.mxu0 %vm675_vm2, %v1562_v8 }
  0xa3   : > { %v990_v62 = vpop.permute.xlu1 %989  ;;  %1219 = vrot.lane.b32.xlu0 %v5527_v61, %s5194_s16  ;;  %v1564_v61 = vld [vmem:[#allocation2 + $0x28] sm:$0xff] }
  0xa4   : > { %1013 = vst.msk [vmem:[#allocation2 + $0x10] sm:$0xff] %vm1011_vm9, %v990_v62  ;;  %v1576_v62 = vld [vmem:[#allocation2 + $0x88] sm:$0xff] }
  0xa5   : > { %1319 = vrot.lane.b32.xlu1 %v5590_v56, %s5197_s25  ;;  %v697_v3 = vpop.permute.xlu0 %696 }
  0xa6   : > { %719 = vst.msk [vmem:[#allocation2 + $0x20] sm:$0xff] %vm716_vm3, %v697_v3  ;;  %v508_v3 = vld [vmem:[%s7299_s1 + $0x20] sm:$0xff] }
  0xa7   : > { %v799_v28 = vpop.permute.xlu1 %798  ;;  %1360 = vrot.lane.b32.xlu0 %v5609_v57, %s5198_s29 }
  0xa8   : > { %821 = vst.msk [vmem:[#allocation2 + $0x20] sm:$0xff] %vm818_vm4, %v799_v28 }
  0xa9   : > { %1393 = vrot.lane.b32.xlu1 %v5551_v32, %s5195_s17  ;;  %v841_v33 = vpop.permute.xlu0 %840 }
  0xaa   : > { %863 = vst.msk [vmem:[#allocation2 + $0x20] sm:$0xff] %vm860_vm5, %v841_v33 }
  0xab   : > { %v875_v5 = vpop.permute.xlu1 %874  ;;  %1433 = vrot.lane.b32.xlu0 %v5603_v43, %s5199_s30  ;;  %v1561_v56 = vld [vmem:[#allocation2 + $0x10] sm:$0xff] }
  0xac   : > { %897 = vst.msk [vmem:[#allocation2 + $0x20] sm:$0xff] %vm894_vm6, %v875_v5  ;;  %1752 = vmatmul.mubr.bf16.gmra.mrb[4].mxu0 %v1561_v56  ;;  %v510_v56 = vld [vmem:[%s7299_s1 + $0x30] sm:$0xff] }
  0xad   : > { %1474 = vrot.lane.b32.xlu1 %v5624_v11, %s5200_s23  ;;  %v916_v57 = vpop.permute.xlu0 %915  ;;  %4677 = vmatprep.mubr.msk.bf16.mxu0 %vm675_vm2, %v1564_v61  ;;  %v511_v61 = vld [vmem:[%s7299_s1 + $0x38] sm:$0xff] }
  0xae   : > { %938 = vst.msk [vmem:[#allocation2 + $0x20] sm:$0xff] %vm935_vm7, %v916_v57 }
  0xaf   : > { %v958_v37 = vpop.permute.xlu1 %957  ;;  %1507 = vrot.lane.b32.xlu0 %v5572_v59, %s5196_s22 }
  0xb0   : > { %980 = vst.msk [vmem:[#allocation2 + $0x20] sm:$0xff] %vm977_vm8, %v958_v37  ;;  %v5960_v37 = vrot.slane %v5193_v0, 1 }
  0xb1   : > { %1221 = vrot.lane.b32.xlu1 %v5551_v32, %s5194_s16  ;;  %v992_v7 = vpop.permute.xlu0 %991  ;;  %v1566_v32 = vld [vmem:[#allocation2 + $0x38] sm:$0xff] }
  0xb2   : > { %1014 = vst.msk [vmem:[#allocation2 + $0x20] sm:$0xff] %vm1011_vm9, %v992_v7  ;;  %v513_v7 = vld [vmem:[%s7299_s1 + $0x48] sm:$0xff] }
  0xb3   : > { %v699_v15 = vpop.permute.xlu1 %698  ;;  %1321 = vrot.lane.b32.xlu0 %v5603_v43, %s5197_s25  ;;  %2498 = vst.msk [vmem:[#allocation3 + $0xb8] sm:$0xff] %vm2184_vm10, %v5960_v37  ;;  %2911 = vst.msk [vmem:[#allocation3 + $0x178] sm:$0xff] %vm2184_vm10, %v5960_v37 }
  0xb4   : > { %720 = vst.msk [vmem:[#allocation2 + $0x30] sm:$0xff] %vm716_vm3, %v699_v15 }
  0xb5   : > { %1362 = vrot.lane.b32.xlu1 %v5624_v11, %s5198_s29  ;;  %v801_v20 = vpop.permute.xlu0 %800 }
  0xb6   : > { %822 = vst.msk [vmem:[#allocation2 + $0x30] sm:$0xff] %vm818_vm4, %v801_v20  ;;  %v512_v20 = vld [vmem:[%s7299_s1 + $0x40] sm:$0xff] }
  0xb7   : > { %v843_v18 = vpop.permute.xlu1 %842  ;;  %1395 = vrot.lane.b32.xlu0 %v5572_v59, %s5195_s17 }
  0xb8   : > { %864 = vst.msk [vmem:[#allocation2 + $0x30] sm:$0xff] %vm860_vm5, %v843_v18 }
  0xb9   : > { %1435 = vrot.lane.b32.xlu1 %v5621_v22, %s5199_s30  ;;  %v877_v45 = vpop.permute.xlu0 %876  ;;  %v1563_v43 = vld [vmem:[#allocation2 + $0x20] sm:$0xff] }
  0xba   : > { %898 = vst.msk [vmem:[#allocation2 + $0x30] sm:$0xff] %vm894_vm6, %v877_v45  ;;  %1760 = vmatmul.mubr.bf16.gmra.mrb[8].mxu0 %v1563_v43  ;;  %v514_v43 = vld [vmem:[%s7299_s1 + $0x50] sm:$0xff] }
  0xbb   : > { %v918_v31 = vpop.permute.xlu1 %917  ;;  %1476 = vrot.lane.b32.xlu0 %v5640_v35, %s5200_s23  ;;  %4678 = vmatprep.mubr.msk.bf16.mxu0 %vm675_vm2, %v1566_v32  ;;  %v515_v32 = vld [vmem:[%s7299_s1 + $0x58] sm:$0xff] }
  0xbc   : > { %939 = vst.msk [vmem:[#allocation2 + $0x30] sm:$0xff] %vm935_vm7, %v918_v31 }
  0xbd   : > { %1509 = vrot.lane.b32.xlu1 %v5582_v14, %s5196_s22  ;;  %v960_v11 = vpop.permute.xlu0 %959 }
  0xbe   : > { %981 = vst.msk [vmem:[#allocation2 + $0x30] sm:$0xff] %vm977_vm8, %v960_v11  ;;  %v1578_v11 = vld [vmem:[#allocation2 + $0x98] sm:$0xff] }
  0xbf   : > { %v994_v12 = vpop.permute.xlu1 %993  ;;  %1223 = vrot.lane.b32.xlu0 %v5572_v59, %s5194_s16  ;;  %v1568_v59 = vld [vmem:[#allocation2 + $0x48] sm:$0xff] }
  0xc0   : > { %1015 = vst.msk [vmem:[#allocation2 + $0x30] sm:$0xff] %vm1011_vm9, %v994_v12  ;;  %v517_v12 = vld [vmem:[%s7299_s1 + $0x68] sm:$0xff] }
  0xc1   : > { %1323 = vrot.lane.b32.xlu1 %v5621_v22, %s5197_s25  ;;  %v701_v17 = vpop.permute.xlu0 %700 }
  0xc2   : > { %721 = vst.msk [vmem:[#allocation2 + $0x40] sm:$0xff] %vm716_vm3, %v701_v17 }
  0xc3   : > { %v803_v60 = vpop.permute.xlu1 %802  ;;  %1364 = vrot.lane.b32.xlu0 %v5640_v35, %s5198_s29 }
  0xc4   : > { %823 = vst.msk [vmem:[#allocation2 + $0x40] sm:$0xff] %vm818_vm4, %v803_v60 }
  0xc5   : > { %1397 = vrot.lane.b32.xlu1 %v5582_v14, %s5195_s17  ;;  %v845_v13 = vpop.permute.xlu0 %844 }
  0xc6   : > { %865 = vst.msk [vmem:[#allocation2 + $0x40] sm:$0xff] %vm860_vm5, %v845_v13  ;;  %v516_v13 = vld [vmem:[%s7299_s1 + $0x60] sm:$0xff] }
  0xc7   : > { %v879_v27 = vpop.permute.xlu1 %878  ;;  %1437 = vrot.lane.b32.xlu0 %v5634_v24, %s5199_s30  ;;  %v1565_v22 = vld [vmem:[#allocation2 + $0x30] sm:$0xff] }
  0xc8   : > { %899 = vst.msk [vmem:[#allocation2 + $0x40] sm:$0xff] %vm894_vm6, %v879_v27  ;;  %1768 = vmatmul.mubr.bf16.gmra.mrb[12].mxu0 %v1565_v22  ;;  %v519_v27 = vld [vmem:[%s7299_s1 + $0x78] sm:$0xff] }
  0xc9   : > { %1478 = vrot.lane.b32.xlu1 %v5650_v42, %s5200_s23  ;;  %v920_v35 = vpop.permute.xlu0 %919  ;;  %4679 = vmatprep.mubr.msk.bf16.mxu0 %vm675_vm2, %v1568_v59 }
  0xca   : > { %940 = vst.msk [vmem:[#allocation2 + $0x40] sm:$0xff] %vm935_vm7, %v920_v35  ;;  %v518_v35 = vld [vmem:[%s7299_s1 + $0x70] sm:$0xff] }
  0xcb   : > { %v962_v55 = vpop.permute.xlu1 %961  ;;  %1511 = vrot.lane.b32.xlu0 %v5600_v41, %s5196_s22 }
  0xcc   : > { %982 = vst.msk [vmem:[#allocation2 + $0x40] sm:$0xff] %vm977_vm8, %v962_v55 }
  0xcd   : > { %1225 = vrot.lane.b32.xlu1 %v5582_v14, %s5194_s16  ;;  %v996_v4 = vpop.permute.xlu0 %995  ;;  %v1570_v14 = vld [vmem:[#allocation2 + $0x58] sm:$0xff] }
  0xce   : > { %1016 = vst.msk [vmem:[#allocation2 + $0x40] sm:$0xff] %vm1011_vm9, %v996_v4 }
  0xcf   : > { %v703_v54 = vpop.permute.xlu1 %702  ;;  %1325 = vrot.lane.b32.xlu0 %v5634_v24, %s5197_s25 }
  0xd0   : > { %722 = vst.msk [vmem:[#allocation2 + $0x50] sm:$0xff] %vm716_vm3, %v703_v54 }
  0xd1   : > { %1366 = vrot.lane.b32.xlu1 %v5650_v42, %s5198_s29  ;;  %v805_v29 = vpop.permute.xlu0 %804 }
  0xd2   : > { %824 = vst.msk [vmem:[#allocation2 + $0x50] sm:$0xff] %vm818_vm4, %v805_v29  ;;  %v7314_v29 = vmov 0.0|0.0  }
  0xd3   : > { %v847_v38 = vpop.permute.xlu1 %846  ;;  %1399 = vrot.lane.b32.xlu0 %v5600_v41, %s5195_s17 }
  0xd4   : > { %866 = vst.msk [vmem:[#allocation2 + $0x50] sm:$0xff] %vm860_vm5, %v847_v38 }
  0xd5   : > { %1439 = vrot.lane.b32.xlu1 %v5657_v51, %s5199_s30  ;;  %v881_v39 = vpop.permute.xlu0 %880  ;;  %v1567_v24 = vld [vmem:[#allocation2 + $0x40] sm:$0xff] }
  0xd6   : > { %900 = vst.msk [vmem:[#allocation2 + $0x50] sm:$0xff] %vm894_vm6, %v881_v39  ;;  %1776 = vmatmul.mubr.bf16.gmra.mrb[16].mxu0 %v1567_v24 }
  0xd7   : > { %v922_v25 = vpop.permute.xlu1 %921  ;;  %1480 = vrot.lane.b32.xlu0 %v5664_v6, %s5200_s23  ;;  %4680 = vmatprep.mubr.msk.bf16.mxu0 %vm675_vm2, %v1570_v14  ;;  %v1580_v14 = vld [vmem:[#allocation2 + $0xa8] sm:$0xff] }
  0xd8   : > { %941 = vst.msk [vmem:[#allocation2 + $0x50] sm:$0xff] %vm935_vm7, %v922_v25 }
  0xd9   : > { %1513 = vrot.lane.b32.xlu1 %v5616_v2, %s5196_s22  ;;  %v964_v42 = vpop.permute.xlu0 %963 }
  0xda   : > { %983 = vst.msk [vmem:[#allocation2 + $0x50] sm:$0xff] %vm977_vm8, %v964_v42 }
  0xdb   : > { %v998_v47 = vpop.permute.xlu1 %997  ;;  %1227 = vrot.lane.b32.xlu0 %v5600_v41, %s5194_s16  ;;  %v1572_v41 = vld [vmem:[#allocation2 + $0x68] sm:$0xff] }
  0xdc   : > { %1017 = vst.msk [vmem:[#allocation2 + $0x50] sm:$0xff] %vm1011_vm9, %v998_v47 }
  0xdd   : > { %1327 = vrot.lane.b32.xlu1 %v5657_v51, %s5197_s25  ;;  %v705_v46 = vpop.permute.xlu0 %704 }
  0xde   : > { %723 = vst.msk [vmem:[#allocation2 + $0x60] sm:$0xff] %vm716_vm3, %v705_v46 }
  0xdf   : > { %v807_v44 = vpop.permute.xlu1 %806  ;;  %1368 = vrot.lane.b32.xlu0 %v5664_v6, %s5198_s29 }
  0xe0   : > { %825 = vst.msk [vmem:[#allocation2 + $0x60] sm:$0xff] %vm818_vm4, %v807_v44 }
  0xe1   : > { %1401 = vrot.lane.b32.xlu1 %v5616_v2, %s5195_s17  ;;  %v849_v9 = vpop.permute.xlu0 %848 }
  0xe2   : > { %867 = vst.msk [vmem:[#allocation2 + $0x60] sm:$0xff] %vm860_vm5, %v849_v9 }
  0xe3   : > { %v883_v40 = vpop.permute.xlu1 %882  ;;  %1441 = vrot.lane.b32.xlu0 %v5689_v63, %s5199_s30  ;;  %v1569_v51 = vld [vmem:[#allocation2 + $0x50] sm:$0xff] }
  0xe4   : > { %901 = vst.msk [vmem:[#allocation2 + $0x60] sm:$0xff] %vm894_vm6, %v883_v40  ;;  %1784 = vmatmul.mubr.bf16.gmra.mrb[20].mxu0 %v1569_v51 }
  0xe5   : > { %1482 = vrot.lane.b32.xlu1 %v5694_v36, %s5200_s23  ;;  %v924_v6 = vpop.permute.xlu0 %923  ;;  %4681 = vmatprep.mubr.msk.bf16.mxu0 %vm675_vm2, %v1572_v41  ;;  %v1582_v41 = vld [vmem:[#allocation2 + $0xb8] sm:$0xff] }
  0xe6   : > { %942 = vst.msk [vmem:[#allocation2 + $0x60] sm:$0xff] %vm935_vm7, %v924_v6 }
  0xe7   : > { %v966_v49 = vpop.permute.xlu1 %965  ;;  %1515 = vrot.lane.b32.xlu0 %v5673_v1, %s5196_s22 }
  0xe8   : > { %984 = vst.msk [vmem:[#allocation2 + $0x60] sm:$0xff] %vm977_vm8, %v966_v49 }
  0xe9   : > { %1229 = vrot.lane.b32.xlu1 %v5616_v2, %s5194_s16  ;;  %v1000_v21 = vpop.permute.xlu0 %999  ;;  %v1574_v2 = vld [vmem:[#allocation2 + $0x78] sm:$0xff] }
  0xea   : > { %1018 = vst.msk [vmem:[#allocation2 + $0x60] sm:$0xff] %vm1011_vm9, %v1000_v21 }
  0xeb   : > { %v707_v52 = vpop.permute.xlu1 %706  ;;  %1329 = vrot.lane.b32.xlu0 %v5689_v63, %s5197_s25 }
  0xec   : > { %724 = vst.msk [vmem:[#allocation2 + $0x70] sm:$0xff] %vm716_vm3, %v707_v52 }
  0xed   : > { %1370 = vrot.lane.b32.xlu1 %v5694_v36, %s5198_s29  ;;  %v809_v30 = vpop.permute.xlu0 %808 }
  0xee   : > { %826 = vst.msk [vmem:[#allocation2 + $0x70] sm:$0xff] %vm818_vm4, %v809_v30 }
  0xef   : > { %v851_v26 = vpop.permute.xlu1 %850  ;;  %1403 = vrot.lane.b32.xlu0 %v5673_v1, %s5195_s17  ;;  %v504_v1 = vld [vmem:[%s7299_s1] sm:$0xff] }
  0xf0   : > { %868 = vst.msk [vmem:[#allocation2 + $0x70] sm:$0xff] %vm860_vm5, %v851_v26 }
  0xf1   : > { %1443 = vrot.lane.b32.xlu1 %v5719_v16, %s5199_s30  ;;  %v885_v53 = vpop.permute.xlu0 %884  ;;  %v1571_v63 = vld [vmem:[#allocation2 + $0x60] sm:$0xff]  ;;  %v505_v16 = vld [vmem:[%s7299_s1 + $0x8] sm:$0xff] }
  0xf2   : > { %902 = vst.msk [vmem:[#allocation2 + $0x70] sm:$0xff] %vm894_vm6, %v885_v53  ;;  %1792 = vmatmul.mubr.bf16.gmra.mrb[24].mxu0 %v1571_v63 }
  0xf3   : > { %v926_v10 = vpop.permute.xlu1 %925  ;;  %1484 = vrot.lane.b32.xlu0 %v5731_v23, %s5200_s23  ;;  %4682 = vmatprep.mubr.msk.bf16.mxu0 %vm675_vm2, %v1574_v2  ;;  %v507_v23 = vld [vmem:[%s7299_s1 + $0x18] sm:$0xff]  ;;  %v1584_v2 = vld [vmem:[#allocation2 + $0xc8] sm:$0xff] }
  0xf4   : > { %943 = vst.msk [vmem:[#allocation2 + $0x70] sm:$0xff] %vm935_vm7, %v926_v10 }
  0xf5   : > { %1517 = vrot.lane.b32.xlu1 %v5704_v34, %s5196_s22  ;;  %v968_v36 = vpop.permute.xlu0 %967  ;;  %v506_v34 = vld [vmem:[%s7299_s1 + $0x10] sm:$0xff]  ;;  %s7160_s22 = scalar_lea.vmem %s7313_s15, %s4806_s24 }
  0xf6   : > { %985 = vst.msk [vmem:[#allocation2 + $0x70] sm:$0xff] %vm977_vm8, %v968_v36 }
  0xf7   : > { %v1002_v48 = vpop.permute.xlu1 %1001  ;;  %1984 = vperm.xlu0 %5102, %v504_v1  }
  0xf8   : > { %1019 = vst.msk [vmem:[#allocation2 + $0x70] sm:$0xff] %vm1011_vm9, %v1002_v48 }
  0xf9   : > { %v1216_v19 = vpop.permute.xlu0 %1215  ;;  %1989 = vperm.xlu1 %5103, %v505_v16  }
  0xfa   : > { %1239 = vst.msk [vmem:[#allocation2 + $0x80] sm:$0xff] %vm716_vm3, %v1216_v19  ;;  %v1586_v19 = vld [vmem:[#allocation2 + $0xd8] sm:$0xff] }
  0xfb   : > { %v1316_v8 = vpop.permute.xlu1 %1315  ;;  %1999 = vperm.xlu0 %5102, %v507_v23  }
  0xfc   : > { %1339 = vst.msk [vmem:[#allocation2 + $0x80] sm:$0xff] %vm818_vm4, %v1316_v8 }
  0xfd   : > { %v1357_v58 = vpop.permute.xlu0 %1356  ;;  %1994 = vperm.xlu1 %5103, %v506_v34  }
  0xfe   : > { %1380 = vst.msk [vmem:[#allocation2 + $0x80] sm:$0xff] %vm860_vm5, %v1357_v58 }
  0xff   : > { %v1390_v28 = vpop.permute.xlu1 %1389  ;;  %v1573_v33 = vld [vmem:[#allocation2 + $0x70] sm:$0xff]  ;;  %2009 = vperm.xlu0 %5102, %v509_v50  }
 0x100   : > { %1413 = vst.msk [vmem:[#allocation2 + $0x80] sm:$0xff] %vm894_vm6, %v1390_v28  ;;  %1800 = vmatmul.mubr.bf16.gmra.mrb[28].mxu0 %v1573_v33 }
 0x101   : > { %v1430_v5 = vpop.permute.xlu0 %1429  ;;  %4683 = vmatprep.mubr.msk.bf16.mxu0 %vm675_vm2, %v1576_v62  ;;  %2004 = vperm.xlu1 %5103, %v508_v3  }
 0x102   : > { %1453 = vst.msk [vmem:[#allocation2 + $0x80] sm:$0xff] %vm935_vm7, %v1430_v5 }
 0x103   : > { %v1471_v57 = vpop.permute.xlu1 %1470  ;;  %2019 = vperm.xlu0 %5102, %v511_v61   ;;  %v1588_v61 = vld [vmem:[#allocation2 + $0xe8] sm:$0xff] }
 0x104   : > { %1494 = vst.msk [vmem:[#allocation2 + $0x80] sm:$0xff] %vm977_vm8, %v1471_v57 }
 0x105   : > { %v1504_v15 = vpop.permute.xlu0 %1503  ;;  %2014 = vperm.xlu1 %5103, %v510_v56  }
 0x106   : > { %1527 = vst.msk [vmem:[#allocation2 + $0x80] sm:$0xff] %vm1011_vm9, %v1504_v15 }
 0x107   : > { %v1218_v18 = vpop.permute.xlu1 %1217  ;;  %2029 = vperm.xlu0 %5102, %v513_v7  }
 0x108   : > { %1240 = vst.msk [vmem:[#allocation2 + $0x90] sm:$0xff] %vm716_vm3, %v1218_v18 }
 0x109   : > { %v1318_v45 = vpop.permute.xlu0 %1317  ;;  %2024 = vperm.xlu1 %5103, %v512_v20  }
 0x10a   : > { %1340 = vst.msk [vmem:[#allocation2 + $0x90] sm:$0xff] %vm818_vm4, %v1318_v45  ;;  %v1590_v45 = vld [vmem:[#allocation2 + $0xf8] sm:$0xff] }
 0x10b   : > { %v1359_v31 = vpop.permute.xlu1 %1358  ;;  %2039 = vperm.xlu0 %5102, %v515_v32  }
 0x10c   : > { %1381 = vst.msk [vmem:[#allocation2 + $0x90] sm:$0xff] %vm860_vm5, %v1359_v31 }
 0x10d   : > { %v1392_v17 = vpop.permute.xlu0 %1391  ;;  %v1575_v60 = vld [vmem:[#allocation2 + $0x80] sm:$0xff]  ;;  %2034 = vperm.xlu1 %5103, %v514_v43  }
 0x10e   : > { %1414 = vst.msk [vmem:[#allocation2 + $0x90] sm:$0xff] %vm894_vm6, %v1392_v17  ;;  %1808 = vmatmul.mubr.bf16.gmra.mrb[32].mxu0 %v1575_v60 }
 0x10f   : > { %v1432_v59 = vpop.permute.xlu1 %1431  ;;  %4684 = vmatprep.mubr.msk.bf16.mxu0 %vm675_vm2, %v1578_v11  ;;  %2049 = vperm.xlu0 %5102, %v517_v12  }
 0x110   : > { %1454 = vst.msk [vmem:[#allocation2 + $0x90] sm:$0xff] %vm935_vm7, %v1432_v59 }
 0x111   : > { %v1473_v22 = vpop.permute.xlu0 %1472  ;;  %2044 = vperm.xlu1 %5103, %v516_v13   ;;  %v6055_v13 = vld [vmem:[%s7303_s5] ss:$0 sm:$0xff] }
 0x112   : > { %1495 = vst.msk [vmem:[#allocation2 + $0x90] sm:$0xff] %vm977_vm8, %v1473_v22 }
 0x113   : > { %v1506_v55 = vpop.permute.xlu1 %1505  ;;  %2059 = vperm.xlu0 %5102, %v519_v27   ;;  %v6060_v27 = vld [vmem:[%s7304_s6] ss:$0 sm:$0xff] }
 0x114   : > { %1528 = vst.msk [vmem:[#allocation2 + $0x90] sm:$0xff] %vm1011_vm9, %v1506_v55 }
 0x115   : > { %v1220_v4 = vpop.permute.xlu0 %1219  ;;  %2054 = vperm.xlu1 %5103, %v518_v35  }
 0x116   : > { %1241 = vst.msk [vmem:[#allocation2 + $0xa0] sm:$0xff] %vm716_vm3, %v1220_v4 }
 0x117   : > { %v1320_v54 = vpop.permute.xlu1 %1319  ;;  %2201 = vrot.lane.b32.xlu0 %v7314_v29, %s5197_s25 }
 0x118   : > { %1341 = vst.msk [vmem:[#allocation2 + $0xa0] sm:$0xff] %vm818_vm4, %v1320_v54 }
 0x119   : > { %v1361_v38 = vpop.permute.xlu0 %1360  ;;  %2464 = vrot.lane.b32.xlu1 %v7314_v29, %s5200_s23 }
 0x11a   : > { %1382 = vst.msk [vmem:[#allocation2 + $0xa0] sm:$0xff] %vm860_vm5, %v1361_v38 }
 0x11b   : > { %v1394_v39 = vpop.permute.xlu1 %1393  ;;  %v1577_v24 = vld [vmem:[#allocation2 + $0x90] sm:$0xff] }
 0x11c   : > { %1415 = vst.msk [vmem:[#allocation2 + $0xa0] sm:$0xff] %vm894_vm6, %v1394_v39  ;;  %1816 = vmatmul.mubr.bf16.gmra.mrb[36].mxu0 %v1577_v24 }
 0x11d   : > { %v1434_v25 = vpop.permute.xlu0 %1433  ;;  %4685 = vmatprep.mubr.msk.bf16.mxu0 %vm675_vm2, %v1580_v14 }
 0x11e   : > { %1455 = vst.msk [vmem:[#allocation2 + $0xa0] sm:$0xff] %vm935_vm7, %v1434_v25 }
 0x11f   : > { %v1475_v42 = vpop.permute.xlu1 %1474 }
 0x120   : > { %1496 = vst.msk [vmem:[#allocation2 + $0xa0] sm:$0xff] %vm977_vm8, %v1475_v42 }
 0x121   : > { %v1508_v47 = vpop.permute.xlu0 %1507 }
 0x122   : > { %1529 = vst.msk [vmem:[#allocation2 + $0xa0] sm:$0xff] %vm1011_vm9, %v1508_v47 }
 0x123   : > { %v1222_v46 = vpop.permute.xlu1 %1221 }
 0x124   : > { %1242 = vst.msk [vmem:[#allocation2 + $0xb0] sm:$0xff] %vm716_vm3, %v1222_v46 }
 0x125   : > { %v1322_v44 = vpop.permute.xlu0 %1321 }
 0x126   : > { %1342 = vst.msk [vmem:[#allocation2 + $0xb0] sm:$0xff] %vm818_vm4, %v1322_v44  ;;  %v5140_v44 = vld [vmem:[%s7301_s3 + $0x40] sm:$0xff]  }
 0x127   : > { %v1363_v9 = vpop.permute.xlu1 %1362  ;;  %4807 = vmatprep.subr.bf16.mxu1 %v5140_v44 }
 0x128   : > { %1383 = vst.msk [vmem:[#allocation2 + $0xb0] sm:$0xff] %vm860_vm5, %v1363_v9  ;;  %v7315_v9 = vmov 0.0  }
 0x129   : > { %v1396_v40 = vpop.permute.xlu0 %1395  ;;  %v1579_v51 = vld [vmem:[#allocation2 + $0xa0] sm:$0xff] }
 0x12a   : > { %1416 = vst.msk [vmem:[#allocation2 + $0xb0] sm:$0xff] %vm894_vm6, %v1396_v40  ;;  %1824 = vmatmul.mubr.bf16.gmra.mrb[40].mxu0 %v1579_v51  ;;  %v2099_v51 = vrot.slane %v5193_v0, 3 }
 0x12b   : > { %v1436_v6 = vpop.permute.xlu1 %1435  ;;  %4686 = vmatprep.mubr.msk.bf16.mxu0 %vm675_vm2, %v1582_v41 }
 0x12c   : > { %1456 = vst.msk [vmem:[#allocation2 + $0xb0] sm:$0xff] %vm935_vm7, %v1436_v6  ;;  %v2102_v6 = vrot.slane %v5193_v0, 4 }
 0x12d   : > { %v1477_v49 = vpop.permute.xlu0 %1476 }
 0x12e   : > { %1497 = vst.msk [vmem:[#allocation2 + $0xb0] sm:$0xff] %vm977_vm8, %v1477_v49  ;;  %v5141_v49 = vld [vmem:[%s7301_s3] sm:$0xff]  }
 0x12f   : > { %v1510_v21 = vpop.permute.xlu1 %1509  ;;  %4808 = vmatpush3.bf16.msra.mxu1 %v5141_v49 }
 0x130   : > { %1530 = vst.msk [vmem:[#allocation2 + $0xb0] sm:$0xff] %vm1011_vm9, %v1510_v21 }
 0x131   : > { %v1224_v52 = vpop.permute.xlu0 %1223 }
 0x132   : > { %1243 = vst.msk [vmem:[#allocation2 + $0xc0] sm:$0xff] %vm716_vm3, %v1224_v52 }
 0x133   : > { %v1324_v30 = vpop.permute.xlu1 %1323 }
 0x134   : > { %1343 = vst.msk [vmem:[#allocation2 + $0xc0] sm:$0xff] %vm818_vm4, %v1324_v30 }
 0x135   : > { %v1365_v26 = vpop.permute.xlu0 %1364 }
 0x136   : > { %1384 = vst.msk [vmem:[#allocation2 + $0xc0] sm:$0xff] %vm860_vm5, %v1365_v26 }
 0x137   : > { %v1398_v53 = vpop.permute.xlu1 %1397  ;;  %v1581_v63 = vld [vmem:[#allocation2 + $0xb0] sm:$0xff] }
 0x138   : > { %1417 = vst.msk [vmem:[#allocation2 + $0xc0] sm:$0xff] %vm894_vm6, %v1398_v53  ;;  %1832 = vmatmul.mubr.bf16.gmra.mrb[44].mxu0 %v1581_v63 }
 0x139   : > { %v1438_v10 = vpop.permute.xlu0 %1437  ;;  %4687 = vmatprep.mubr.msk.bf16.mxu0 %vm675_vm2, %v1584_v2 }
 0x13a   : > { %1457 = vst.msk [vmem:[#allocation2 + $0xc0] sm:$0xff] %vm935_vm7, %v1438_v10  ;;  %v5142_v10 = vld [vmem:[%s7301_s3 + $0x48] sm:$0xff]  }
 0x13b   : > { %v1479_v1 = vpop.permute.xlu1 %1478  ;;  %4809 = vmatprep.subr.bf16.mxu1 %v5142_v10 }
 0x13c   : > { %1498 = vst.msk [vmem:[#allocation2 + $0xc0] sm:$0xff] %vm977_vm8, %v1479_v1 }
 0x13d   : > { %v1512_v36 = vpop.permute.xlu0 %1511 }
 0x13e   : > { %1531 = vst.msk [vmem:[#allocation2 + $0xc0] sm:$0xff] %vm1011_vm9, %v1512_v36 }
 0x13f   : > { %v1226_v16 = vpop.permute.xlu1 %1225 }
 0x140   : > { %1244 = vst.msk [vmem:[#allocation2 + $0xd0] sm:$0xff] %vm716_vm3, %v1226_v16 }
 0x141   : > { %v1326_v48 = vpop.permute.xlu0 %1325 }
 0x142   : > { %1344 = vst.msk [vmem:[#allocation2 + $0xd0] sm:$0xff] %vm818_vm4, %v1326_v48  ;;  %v6091_v48 = vor.u32 %v2102_v6, %v2099_v51 }
 0x143   : > { %v1367_v23 = vpop.permute.xlu1 %1366 }
 0x144   : > { %1385 = vst.msk [vmem:[#allocation2 + $0xd0] sm:$0xff] %vm860_vm5, %v1367_v23  ;;  %v5143_v23 = vld [vmem:[%s7301_s3 + $0x8] sm:$0xff]  }
 0x145   : > { %v1400_v34 = vpop.permute.xlu0 %1399  ;;  %v1583_v8 = vld [vmem:[#allocation2 + $0xc0] sm:$0xff]  ;;  %4810 = vmatpush3.bf16.msra.mxu1 %v5143_v23 }
 0x146   : > { %1418 = vst.msk [vmem:[#allocation2 + $0xd0] sm:$0xff] %vm894_vm6, %v1400_v34  ;;  %1840 = vmatmul.mubr.bf16.gmra.mrb[48].mxu0 %v1583_v8 }
 0x147   : > { %v1440_v50 = vpop.permute.xlu1 %1439  ;;  %4688 = vmatprep.mubr.msk.bf16.mxu0 %vm675_vm2, %v1586_v19 }
 0x148   : > { %1458 = vst.msk [vmem:[#allocation2 + $0xd0] sm:$0xff] %vm935_vm7, %v1440_v50 }
 0x149   : > { %v1481_v58 = vpop.permute.xlu0 %1480 }
 0x14a   : > { %1499 = vst.msk [vmem:[#allocation2 + $0xd0] sm:$0xff] %vm977_vm8, %v1481_v58 }
 0x14b   : > { %v1514_v62 = vpop.permute.xlu1 %1513 }
 0x14c   : > { %1532 = vst.msk [vmem:[#allocation2 + $0xd0] sm:$0xff] %vm1011_vm9, %v1514_v62 }
 0x14d   : > { %v1228_v3 = vpop.permute.xlu0 %1227 }
 0x14e   : > { %1245 = vst.msk [vmem:[#allocation2 + $0xe0] sm:$0xff] %vm716_vm3, %v1228_v3 }
 0x14f   : > { %v1328_v28 = vpop.permute.xlu1 %1327 }
 0x150   : > { %1345 = vst.msk [vmem:[#allocation2 + $0xe0] sm:$0xff] %vm818_vm4, %v1328_v28 }
 0x151   : > { %v1369_v33 = vpop.permute.xlu0 %1368 }
 0x152   : > { %1386 = vst.msk [vmem:[#allocation2 + $0xe0] sm:$0xff] %vm860_vm5, %v1369_v33 }
 0x153   : > { %v1402_v5 = vpop.permute.xlu1 %1401  ;;  %v1585_v56 = vld [vmem:[#allocation2 + $0xd0] sm:$0xff] }
 0x154   : > { %1419 = vst.msk [vmem:[#allocation2 + $0xe0] sm:$0xff] %vm894_vm6, %v1402_v5  ;;  %1848 = vmatmul.mubr.bf16.gmra.mrb[52].mxu0 %v1585_v56 }
 0x155   : > { %v1442_v57 = vpop.permute.xlu0 %1441  ;;  %4689 = vmatprep.mubr.msk.bf16.mxu0 %vm675_vm2, %v1588_v61  ;;  %v5144_v61 = vld [vmem:[%s7301_s3 + $0x50] sm:$0xff]  }
 0x156   : > { %1459 = vst.msk [vmem:[#allocation2 + $0xe0] sm:$0xff] %vm935_vm7, %v1442_v57  ;;  %v5145_v57 = vld [vmem:[%s7301_s3 + $0x10] sm:$0xff]   ;;  %4811 = vmatprep.subr.bf16.mxu1 %v5144_v61 }
 0x157   : > { %v1483_v7 = vpop.permute.xlu1 %1482  ;;  %4812 = vmatpush3.bf16.msra.mxu1 %v5145_v57 }
 0x158   : > { %1500 = vst.msk [vmem:[#allocation2 + $0xe0] sm:$0xff] %vm977_vm8, %v1483_v7 }
 0x159   : > { %v1516_v15 = vpop.permute.xlu0 %1515 }
 0x15a   : > { %1533 = vst.msk [vmem:[#allocation2 + $0xe0] sm:$0xff] %vm1011_vm9, %v1516_v15 }
 0x15b   : > { %v1230_v20 = vpop.permute.xlu1 %1229 }
 0x15c   : > { %1246 = vst.msk [vmem:[#allocation2 + $0xf0] sm:$0xff] %vm716_vm3, %v1230_v20 }
 0x15d   : > { %v1330_v18 = vpop.permute.xlu0 %1329 }
 0x15e   : > { %1346 = vst.msk [vmem:[#allocation2 + $0xf0] sm:$0xff] %vm818_vm4, %v1330_v18 }
 0x15f   : > { %v1371_v32 = vpop.permute.xlu1 %1370 }
 0x160   : > { %1387 = vst.msk [vmem:[#allocation2 + $0xf0] sm:$0xff] %vm860_vm5, %v1371_v32 }
 0x161   : > { %v1404_v43 = vpop.permute.xlu0 %1403  ;;  %v1587_v31 = vld [vmem:[#allocation2 + $0xe0] sm:$0xff] }
 0x162   : > { %1420 = vst.msk [vmem:[#allocation2 + $0xf0] sm:$0xff] %vm894_vm6, %v1404_v43  ;;  %1856 = vmatmul.mubr.bf16.gmra.mrb[56].mxu0 %v1587_v31  ;;  %v5147_v43 = vld [vmem:[%s7301_s3 + $0x18] sm:$0xff]  }
 0x163   : > { %v1444_v11 = vpop.permute.xlu1 %1443  ;;  %4690 = vmatprep.mubr.msk.bf16.mxu0 %vm675_vm2, %v1590_v45  ;;  %v5146_v45 = vld [vmem:[%s7301_s3 + $0x58] sm:$0xff]  }
 0x164   : > { %1460 = vst.msk [vmem:[#allocation2 + $0xf0] sm:$0xff] %vm935_vm7, %v1444_v11  ;;  %4813 = vmatprep.subr.bf16.mxu1 %v5146_v45 }
 0x165   : > { %v1485_v12 = vpop.permute.xlu0 %1484  ;;  %4814 = vmatpush3.bf16.msra.mxu1 %v5147_v43 }
 0x166   : > { %1501 = vst.msk [vmem:[#allocation2 + $0xf0] sm:$0xff] %vm977_vm8, %v1485_v12 }
 0x167   : > { %v1518_v17 = vpop.permute.xlu1 %1517 }
 0x168   : > { %1534 = vst.msk [vmem:[#allocation2 + $0xf0] sm:$0xff] %vm1011_vm9, %v1518_v17 }
 0x16f   : > { %v1589_v60 = vld [vmem:[#allocation2 + $0xf0] sm:$0xff] }
 0x170   : > { %1864 = vmatmul.mubr.bf16.gmra.mrb[60].mxu0 %v1589_v60 }
 0x174   : > { %v1745_v59 = vpop.f32.mrb[0].mxu0 }
 0x175   : > { %v1879_v22 = vmul.f32 %v6055_v13, %v1745_v59  ;;  %v1747_v35 = vpop.f32.mrb[1].mxu0 }
 0x176   : > { %v1748_v55 = vpop.f32.mrb[2].mxu0  ;;  %v6063_v4 = vpop.permute.xlu0 %1984 }
 0x177   : > { %v1918_v54 = vadd.f32 %v6060_v27, %v1879_v22  ;;  %v1880_v38 = vmul.f32 %v6055_v13, %v1748_v55  ;;  %v1750_v14 = vpop.f32.mrb[3].mxu0  ;;  %v5148_v55 = vld [vmem:[%s7301_s3 + $0x60] sm:$0xff]  }
 0x178   : > { %v6068_v25 = vpop.permute.xlu1 %1989  ;;  %4815 = vmatprep.subr.bf16.mxu1 %v5148_v55 }
 0x179   : > { %v1950_v39 = vmax.f32 %v1918_v54, 0.0  ;;  %v1919_v24 = vadd.f32 %v6060_v27, %v1880_v38  ;;  %v5149_v38 = vld [vmem:[%s7301_s3 + $0x20] sm:$0xff]  }
 0x17a   : > { %v6070_v42 = vpop.permute.xlu0 %1999  ;;  %4816 = vmatpush3.bf16.msra.mxu1 %v5149_v38 }
 0x17b   : > { %v1951_v47 = vmax.f32 %v1919_v24, 0.0  ;;  %v2062_v46 = vmul.f32 %v6063_v4, %v1950_v39 }
 0x17c   : > { %v6100_v58 = vpop.permute.xlu1 %1994 }
 0x17d   : > { %v2079_v41 = vpack.c.bf16 %v2062_v46, %v7315_v9  ;;  %v2063_v40 = vmul.f32 %v6068_v25, %v1951_v47 }
 0x17e   : > { %v6083_v21 = vpop.permute.xlu0 %2009 }
 0x17f   : > { %v1753_v52 = vpop.f32.mrb[4].mxu0  ;;  %v2088_v30 = vpack.c.bf16 %v2063_v40, %v2062_v46  ;;  %v2105_v26 = vshrl.u32 %v2079_v41, 16  ;;  %v2108_v2 = vshll.u32 %v2079_v41, 16 }
 0x180   : > { %v1881_v53 = vmul.f32 %v6055_v13, %v1753_v52  ;;  %v1755_v63 = vpop.f32.mrb[5].mxu0 }
 0x181   : > { %2203 = vrot.lane.b32.xlu0 %v2088_v30, %s5197_s25  ;;  %v1756_v0 = vpop.f32.mrb[6].mxu0  ;;  %v2237_v1 = vshll.u32 %v2088_v30, 16  ;;  %v2107_v36 = vrot.slane %v2105_v26, 3  ;;  %v2110_v16 = vrot.slane %v2108_v2, 4  ;;  %2372 = vst.msk [vmem:[#allocation3 + $0x8] sm:$0xff] %vm2184_vm10, %v2088_v30  ;;  %v2241_v22 = vshrl.u32 %v2088_v30, 16  ;;  %v6154_v26 = vpop.permute.xlu1 %2004 }
 0x182   : > { %v1920_v19 = vadd.f32 %v6060_v27, %v1881_v53  ;;  %v1882_v34 = vmul.f32 %v6055_v13, %v1756_v0  ;;  %v1758_v8 = vpop.f32.mrb[7].mxu0  ;;  %v6098_v50 = vpop.permute.xlu0 %2019  ;;  %v5150_v30 = vld [vmem:[%s7301_s3 + $0x68] sm:$0xff]  }
 0x183   : > { %v2239_v62 = vrot.slane %v2237_v1, 1  ;;  %v2111_v3 = vor.u32 %v2110_v16, %v2107_v36  ;;  %v5151_v2 = vld [vmem:[%s7301_s3 + $0x28] sm:$0xff]   ;;  %4817 = vmatprep.subr.bf16.mxu1 %v5150_v30  ;;  %v5152_v36 = vld [vmem:[%s7301_s3 + $0x70] sm:$0xff]  }
 0x184   : > { %v1952_v28 = vmax.f32 %v1920_v19, 0.0  ;;  %v1921_v33 = vadd.f32 %v6060_v27, %v1882_v34  ;;  %4818 = vmatpush3.bf16.msra.mxu1 %v5151_v2  ;;  %v5153_v16 = vld [vmem:[%s7301_s3 + $0x30] sm:$0xff]  }
 0x185   : > { %v2240_v5 = vsel %vm725_vm0, %v5960_v37, %v2239_v62  ;;  %v2112_v56 = vsel %vm586_vm1, %v6091_v48, %v2111_v3  ;;  %v2243_v47 = vor.u32 %v2241_v22, %v2239_v62  ;;  %4819 = vmatprep.subr.bf16.mxu1 %v5152_v36 }
 0x186   : > { %v1953_v7 = vmax.f32 %v1921_v33, 0.0  ;;  %v2064_v15 = vmul.f32 %v6100_v58, %v1952_v28  ;;  %2297 = vrot.lane.b32.xlu0 %v2240_v5, %s5195_s17  ;;  %v6115_v20 = vpop.permute.xlu0 %2029  ;;  %2185 = vst.msk [vmem:[#allocation3] sm:$0xff] %vm2184_vm10, %v2112_v56  ;;  %v5154_v28 = vld [vmem:[%s7301_s3 + $0x78] sm:$0xff]  }
 0x187   : > { %v5155_v33 = vld [vmem:[%s7301_s3 + $0x38] sm:$0xff]  }
 0x188   : > { %v2080_v18 = vpack.c.bf16 %v2064_v15, %v2063_v40  ;;  %v2065_v32 = vmul.f32 %v6070_v42, %v1953_v7  ;;  %4820 = vmatpush3.bf16.msra.mxu1 %v5153_v16 }
 0x189   : > { %4821 = vmatprep.subr.bf16.mxu1 %v5154_v28 }
 0x18a   : > { %v6125_v31 = vpack.c.bf16 %v2065_v32, %v2064_v15  ;;  %v2114_v11 = vshrl.u32 %v2080_v18, 16  ;;  %v2117_v12 = vshll.u32 %v2080_v18, 16  ;;  %v6127_v17 = vpop.permute.xlu0 %2039 }
 0x18c   : > { %2205 = vrot.lane.b32.xlu0 %v6125_v31, %s5197_s25  ;;  %2450 = vrot.lane.b32.xlu1 %v6125_v31, %s5200_s23  ;;  %v2116_v60 = vrot.slane %v2114_v11, 3  ;;  %v2119_v59 = vrot.slane %v2117_v12, 4  ;;  %v2245_v35 = vshll.u32 %v6125_v31, 16  ;;  %2373 = vst.msk [vmem:[#allocation3 + $0x20] sm:$0xff] %vm2184_vm10, %v6125_v31  ;;  %v2249_v56 = vshrl.u32 %v6125_v31, 16 }
 0x18d   : > { %v1761_v54 = vpop.f32.mrb[8].mxu0  ;;  %4822 = vmatpush3.bf16.msra.mxu1 %v5155_v33 }
 0x18e   : > { %v1883_v14 = vmul.f32 %v6055_v13, %v1761_v54  ;;  %v1763_v39 = vpop.f32.mrb[9].mxu0  ;;  %v2120_v24 = vor.u32 %v2119_v59, %v2116_v60  ;;  %v2247_v46 = vrot.slane %v2245_v35, 1  ;;  %v6143_v44 = vpop.permute.xlu0 %2049 }
 0x18f   : > { %v1764_v41 = vpop.f32.mrb[10].mxu0  ;;  %v6196_v54 = vpop.permute.xlu1 %2014 }
 0x190   : > { %v1922_v40 = vadd.f32 %v6060_v27, %v1883_v14  ;;  %v1884_v51 = vmul.f32 %v6055_v13, %v1764_v41  ;;  %v2121_v6 = vsel %vm586_vm1, %v2111_v3, %v2120_v24  ;;  %v2248_v49 = vsel %vm725_vm0, %v2243_v47, %v2247_v46  ;;  %v1766_v52 = vpop.f32.mrb[11].mxu0 }
 0x191   : > { %2339 = vrot.lane.b32.xlu0 %v2121_v6, %s5200_s23  ;;  %2384 = vrot.lane.b32.xlu1 %v2248_v49, %s5197_s25  ;;  %2186 = vst.msk [vmem:[#allocation3 + $0x18] sm:$0xff] %vm2184_vm10, %v2121_v6  ;;  %v2251_v45 = vor.u32 %v2249_v56, %v2247_v46 }
 0x192   : > { %v1954_v53 = vmax.f32 %v1922_v40, 0.0  ;;  %v1923_v63 = vadd.f32 %v6060_v27, %v1884_v51  ;;  %v6161_v10 = vpop.permute.xlu0 %2059 }
 0x193   : > { %v6215_v28 = vpop.permute.xlu1 %2024 }
 0x194   : > { %v1955_v0 = vmax.f32 %v1923_v63, 0.0  ;;  %v2066_v1 = vmul.f32 %v6154_v26, %v1954_v53 }
 0x195   : > { %2299 = vrot.lane.b32.xlu0 %v2248_v49, %s5195_s17 }
 0x196   : > { %v2081_v23 = vpack.c.bf16 %v2066_v1, %v2065_v32  ;;  %v2067_v19 = vmul.f32 %v6083_v21, %v1955_v0  ;;  %v6172_v34 = vpop.permute.xlu0 %2201 }
 0x197   : > { %2226 = vst.msk [vmem:[#allocation3] sm:$0xff] %vm2225_vm11, %v6172_v34 }
 0x198   : > { %v2090_v8 = vpack.c.bf16 %v2067_v19, %v2066_v1  ;;  %v2123_v62 = vshrl.u32 %v2081_v23, 16  ;;  %v2126_v3 = vshll.u32 %v2081_v23, 16 }
 0x19a   : > { %2207 = vrot.lane.b32.xlu0 %v2090_v8, %s5197_s25  ;;  %2452 = vrot.lane.b32.xlu1 %v2090_v8, %s5200_s23  ;;  %v2125_v61 = vrot.slane %v2123_v62, 3  ;;  %v2128_v5 = vrot.slane %v2126_v3, 4  ;;  %v2253_v57 = vshll.u32 %v2090_v8, 16  ;;  %2374 = vst.msk [vmem:[#allocation3 + $0x38] sm:$0xff] %vm2184_vm10, %v2090_v8  ;;  %v2257_v6 = vshrl.u32 %v2090_v8, 16 }
 0x19b   : > { %v1769_v7 = vpop.f32.mrb[12].mxu0 }
 0x19c   : > { %v1885_v15 = vmul.f32 %v6055_v13, %v1769_v7  ;;  %v1771_v18 = vpop.f32.mrb[13].mxu0  ;;  %v2129_v32 = vor.u32 %v2128_v5, %v2125_v61  ;;  %v2255_v43 = vrot.slane %v2253_v57, 1 }
 0x19d   : > { %v1772_v11 = vpop.f32.mrb[14].mxu0 }
 0x19e   : > { %v1924_v12 = vadd.f32 %v6060_v27, %v1885_v15  ;;  %v1886_v60 = vmul.f32 %v6055_v13, %v1772_v11  ;;  %v1774_v59 = vpop.f32.mrb[15].mxu0  ;;  %v2130_v31 = vsel %vm586_vm1, %v2120_v24, %v2129_v32  ;;  %v2256_v22 = vsel %vm725_vm0, %v2251_v45, %v2255_v43 }
 0x19f   : > { %2341 = vrot.lane.b32.xlu0 %v2130_v31, %s5200_s23  ;;  %2417 = vrot.lane.b32.xlu1 %v2130_v31, %s5195_s17  ;;  %2491 = vst.msk [vmem:[#allocation3 + $0x10] sm:$0xff] %vm2184_vm10, %v2256_v22  ;;  %2187 = vst.msk [vmem:[#allocation3 + $0x30] sm:$0xff] %vm2184_vm10, %v2130_v31  ;;  %v2259_v63 = vor.u32 %v2257_v6, %v2255_v43 }
 0x1a0   : > { %v1956_v35 = vmax.f32 %v1924_v12, 0.0  ;;  %v1925_v55 = vadd.f32 %v6060_v27, %v1886_v60 }
 0x1a2   : > { %v2068_v38 = vmul.f32 %v6196_v54, %v1956_v35  ;;  %v1957_v14 = vmax.f32 %v1925_v55, 0.0 }
 0x1a3   : > { %2301 = vrot.lane.b32.xlu0 %v2256_v22, %s5195_s17  ;;  %2386 = vrot.lane.b32.xlu1 %v2256_v22, %s5197_s25 }
 0x1a4   : > { %v2082_v39 = vpack.c.bf16 %v2068_v38, %v2067_v19  ;;  %v2069_v24 = vmul.f32 %v6098_v50, %v1957_v14 }
 0x1a6   : > { %v2132_v47 = vshrl.u32 %v2082_v39, 16  ;;  %v2135_v46 = vshll.u32 %v2082_v39, 16  ;;  %v2091_v41 = vpack.c.bf16 %v2069_v24, %v2068_v38 }
 0x1a8   : > { %v2134_v40 = vrot.slane %v2132_v47, 3  ;;  %v2137_v51 = vrot.slane %v2135_v46, 4  ;;  %2375 = vst.msk [vmem:[#allocation3 + $0x50] sm:$0xff] %vm2184_vm10, %v2091_v41  ;;  %2209 = vrot.lane.b32.xlu0 %v2091_v41, %s5197_s25  ;;  %2454 = vrot.lane.b32.xlu1 %v2091_v41, %s5200_s23  ;;  %v2261_v49 = vshll.u32 %v2091_v41, 16  ;;  %v2265_v45 = vshrl.u32 %v2091_v41, 16  ;;  %v6234_v41 = vpop.permute.xlu1 %2034 }
 0x1a9   : > { %v1777_v52 = vpop.f32.mrb[16].mxu0 }
 0x1aa   : > { %v1887_v30 = vmul.f32 %v6055_v13, %v1777_v52  ;;  %v1779_v2 = vpop.f32.mrb[17].mxu0  ;;  %v2138_v53 = vor.u32 %v2137_v51, %v2134_v40  ;;  %v2263_v0 = vrot.slane %v2261_v49, 1 }
 0x1ab   : > { %v1780_v1 = vpop.f32.mrb[18].mxu0 }
 0x1ac   : > { %v1926_v36 = vadd.f32 %v6060_v27, %v1887_v30  ;;  %v1888_v16 = vmul.f32 %v6055_v13, %v1780_v1  ;;  %v2139_v23 = vsel %vm586_vm1, %v2129_v32, %v2138_v53  ;;  %v1782_v19 = vpop.f32.mrb[19].mxu0  ;;  %v2264_v62 = vsel %vm725_vm0, %v2259_v63, %v2263_v0 }
 0x1ad   : > { %2343 = vrot.lane.b32.xlu0 %v2139_v23, %s5200_s23  ;;  %2188 = vst.msk [vmem:[#allocation3 + $0x48] sm:$0xff] %vm2184_vm10, %v2139_v23  ;;  %2419 = vrot.lane.b32.xlu1 %v2139_v23, %s5195_s17  ;;  %2492 = vst.msk [vmem:[#allocation3 + $0x28] sm:$0xff] %vm2184_vm10, %v2264_v62  ;;  %v2267_v31 = vor.u32 %v2265_v45, %v2263_v0 }
 0x1ae   : > { %v1958_v8 = vmax.f32 %v1926_v36, 0.0  ;;  %v1927_v3 = vadd.f32 %v6060_v27, %v1888_v16 }
 0x1b0   : > { %v2070_v33 = vmul.f32 %v6215_v28, %v1958_v8  ;;  %v1959_v61 = vmax.f32 %v1927_v3, 0.0 }
 0x1b1   : > { %2303 = vrot.lane.b32.xlu0 %v2264_v62, %s5195_s17  ;;  %2388 = vrot.lane.b32.xlu1 %v2264_v62, %s5197_s25 }
 0x1b2   : > { %v2083_v5 = vpack.c.bf16 %v2070_v33, %v2069_v24  ;;  %v2071_v56 = vmul.f32 %v6115_v20, %v1959_v61 }
 0x1b4   : > { %v2141_v57 = vshrl.u32 %v2083_v5, 16  ;;  %v2144_v7 = vshll.u32 %v2083_v5, 16  ;;  %v2092_v15 = vpack.c.bf16 %v2071_v56, %v2070_v33 }
 0x1b6   : > { %v2143_v18 = vrot.slane %v2141_v57, 3  ;;  %v2146_v32 = vrot.slane %v2144_v7, 4  ;;  %2376 = vst.msk [vmem:[#allocation3 + $0x68] sm:$0xff] %vm2184_vm10, %v2092_v15  ;;  %2211 = vrot.lane.b32.xlu0 %v2092_v15, %s5197_s25  ;;  %2456 = vrot.lane.b32.xlu1 %v2092_v15, %s5200_s23  ;;  %v2269_v43 = vshll.u32 %v2092_v15, 16  ;;  %v2273_v0 = vshrl.u32 %v2092_v15, 16 }
 0x1b7   : > { %v1785_v11 = vpop.f32.mrb[20].mxu0 }
 0x1b8   : > { %v1889_v12 = vmul.f32 %v6055_v13, %v1785_v11  ;;  %v1787_v60 = vpop.f32.mrb[21].mxu0  ;;  %v2147_v59 = vor.u32 %v2146_v32, %v2143_v18  ;;  %v2271_v22 = vrot.slane %v2269_v43, 1  ;;  %v6253_v18 = vpop.permute.xlu1 %2044 }
 0x1b9   : > { %v1788_v35 = vpop.f32.mrb[22].mxu0 }
 0x1ba   : > { %v1928_v55 = vadd.f32 %v6060_v27, %v1889_v12  ;;  %v1890_v38 = vmul.f32 %v6055_v13, %v1788_v35  ;;  %v1790_v14 = vpop.f32.mrb[23].mxu0  ;;  %v2148_v39 = vsel %vm586_vm1, %v2138_v53, %v2147_v59  ;;  %v2272_v24 = vsel %vm725_vm0, %v2267_v31, %v2271_v22 }
 0x1bb   : > { %2345 = vrot.lane.b32.xlu0 %v2148_v39, %s5200_s23  ;;  %2189 = vst.msk [vmem:[#allocation3 + $0x60] sm:$0xff] %vm2184_vm10, %v2148_v39  ;;  %2421 = vrot.lane.b32.xlu1 %v2148_v39, %s5195_s17  ;;  %2493 = vst.msk [vmem:[#allocation3 + $0x40] sm:$0xff] %vm2184_vm10, %v2272_v24  ;;  %v2275_v62 = vor.u32 %v2273_v0, %v2271_v22 }
 0x1bc   : > { %v1960_v47 = vmax.f32 %v1928_v55, 0.0  ;;  %v1929_v46 = vadd.f32 %v6060_v27, %v1890_v38 }
 0x1be   : > { %v2072_v40 = vmul.f32 %v6234_v41, %v1960_v47  ;;  %v1961_v51 = vmax.f32 %v1929_v46, 0.0 }
 0x1bf   : > { %2305 = vrot.lane.b32.xlu0 %v2272_v24, %s5195_s17  ;;  %2390 = vrot.lane.b32.xlu1 %v2272_v24, %s5197_s25 }
 0x1c0   : > { %v2084_v6 = vpack.c.bf16 %v2072_v40, %v2071_v56  ;;  %v2073_v49 = vmul.f32 %v6127_v17, %v1961_v51 }
 0x1c2   : > { %v2150_v52 = vshrl.u32 %v2084_v6, 16  ;;  %v2153_v30 = vshll.u32 %v2084_v6, 16  ;;  %v2093_v2 = vpack.c.bf16 %v2073_v49, %v2072_v40 }
 0x1c4   : > { %v2152_v53 = vrot.slane %v2150_v52, 3  ;;  %v2155_v63 = vrot.slane %v2153_v30, 4  ;;  %2377 = vst.msk [vmem:[#allocation3 + $0x80] sm:$0xff] %vm2184_vm10, %v2093_v2  ;;  %2213 = vrot.lane.b32.xlu0 %v2093_v2, %s5197_s25  ;;  %2458 = vrot.lane.b32.xlu1 %v2093_v2, %s5200_s23  ;;  %v2277_v1 = vshll.u32 %v2093_v2, 16  ;;  %v2281_v35 = vshrl.u32 %v2093_v2, 16 }
 0x1c5   : > { %v1793_v36 = vpop.f32.mrb[24].mxu0 }
 0x1c6   : > { %v1891_v16 = vmul.f32 %v6055_v13, %v1793_v36  ;;  %v1795_v23 = vpop.f32.mrb[25].mxu0  ;;  %v2156_v19 = vor.u32 %v2155_v63, %v2152_v53  ;;  %v2279_v8 = vrot.slane %v2277_v1, 1  ;;  %v6272_v63 = vpop.permute.xlu1 %2054 }
 0x1c7   : > { %v1796_v3 = vpop.f32.mrb[26].mxu0 }
 0x1c8   : > { %v1930_v33 = vadd.f32 %v6060_v27, %v1891_v16  ;;  %v1892_v61 = vmul.f32 %v6055_v13, %v1796_v3  ;;  %v2157_v5 = vsel %vm586_vm1, %v2147_v59, %v2156_v19  ;;  %v1798_v56 = vpop.f32.mrb[27].mxu0  ;;  %v2280_v57 = vsel %vm725_vm0, %v2275_v62, %v2279_v8 }
 0x1c9   : > { %2347 = vrot.lane.b32.xlu0 %v2157_v5, %s5200_s23  ;;  %2190 = vst.msk [vmem:[#allocation3 + $0x78] sm:$0xff] %vm2184_vm10, %v2157_v5  ;;  %2423 = vrot.lane.b32.xlu1 %v2157_v5, %s5195_s17  ;;  %2494 = vst.msk [vmem:[#allocation3 + $0x58] sm:$0xff] %vm2184_vm10, %v2280_v57  ;;  %v2283_v47 = vor.u32 %v2281_v35, %v2279_v8 }
 0x1ca   : > { %v1962_v7 = vmax.f32 %v1930_v33, 0.0  ;;  %v1931_v15 = vadd.f32 %v6060_v27, %v1892_v61 }
 0x1cc   : > { %v2074_v32 = vmul.f32 %v6253_v18, %v1962_v7  ;;  %v1963_v45 = vmax.f32 %v1931_v15, 0.0 }
 0x1cd   : > { %2307 = vrot.lane.b32.xlu0 %v2280_v57, %s5195_s17  ;;  %2392 = vrot.lane.b32.xlu1 %v2280_v57, %s5197_s25 }
 0x1ce   : > { %v2085_v43 = vpack.c.bf16 %v2074_v32, %v2073_v49  ;;  %v2075_v11 = vmul.f32 %v6143_v44, %v1963_v45 }
 0x1d0   : > { %v2159_v12 = vshrl.u32 %v2085_v43, 16  ;;  %v2162_v60 = vshll.u32 %v2085_v43, 16  ;;  %v2094_v59 = vpack.c.bf16 %v2075_v11, %v2074_v32 }
 0x1d2   : > { %v2161_v31 = vrot.slane %v2159_v12, 3  ;;  %v2164_v22 = vrot.slane %v2162_v60, 4  ;;  %2378 = vst.msk [vmem:[#allocation3 + $0x98] sm:$0xff] %vm2184_vm10, %v2094_v59  ;;  %2215 = vrot.lane.b32.xlu0 %v2094_v59, %s5197_s25  ;;  %2460 = vrot.lane.b32.xlu1 %v2094_v59, %s5200_s23  ;;  %v2285_v55 = vshll.u32 %v2094_v59, 16  ;;  %v2289_v57 = vshrl.u32 %v2094_v59, 16 }
 0x1d3   : > { %v1801_v38 = vpop.f32.mrb[28].mxu0 }
 0x1d4   : > { %v1893_v14 = vmul.f32 %v6055_v13, %v1801_v38  ;;  %v1803_v39 = vpop.f32.mrb[29].mxu0  ;;  %v2165_v24 = vor.u32 %v2164_v22, %v2161_v31  ;;  %v2287_v46 = vrot.slane %v2285_v55, 1 }
 0x1d5   : > { %v1804_v40 = vpop.f32.mrb[30].mxu0 }
 0x1d6   : > { %v1932_v51 = vadd.f32 %v6060_v27, %v1893_v14  ;;  %v1894_v6 = vmul.f32 %v6055_v13, %v1804_v40  ;;  %v1806_v49 = vpop.f32.mrb[31].mxu0  ;;  %v2166_v52 = vsel %vm586_vm1, %v2156_v19, %v2165_v24  ;;  %v2288_v30 = vsel %vm725_vm0, %v2283_v47, %v2287_v46 }
 0x1d7   : > { %2349 = vrot.lane.b32.xlu0 %v2166_v52, %s5200_s23  ;;  %2191 = vst.msk [vmem:[#allocation3 + $0x90] sm:$0xff] %vm2184_vm10, %v2166_v52  ;;  %2425 = vrot.lane.b32.xlu1 %v2166_v52, %s5195_s17  ;;  %2495 = vst.msk [vmem:[#allocation3 + $0x70] sm:$0xff] %vm2184_vm10, %v2288_v30  ;;  %v2291_v60 = vor.u32 %v2289_v57, %v2287_v46 }
 0x1d8   : > { %v1964_v2 = vmax.f32 %v1932_v51, 0.0  ;;  %v1933_v53 = vadd.f32 %v6060_v27, %v1894_v6 }
 0x1da   : > { %v2076_v0 = vmul.f32 %v6272_v63, %v1964_v2  ;;  %v1965_v1 = vmax.f32 %v1933_v53, 0.0  ;;  %v6303_v2 = vld [vmem:[%s7301_s3 + $0x80] sm:$0xff]  }
 0x1db   : > { %2309 = vrot.lane.b32.xlu0 %v2288_v30, %s5195_s17  ;;  %2394 = vrot.lane.b32.xlu1 %v2288_v30, %s5197_s25 }
 0x1dc   : > { %v2086_v36 = vpack.c.bf16 %v2076_v0, %v2075_v11  ;;  %v2077_v16 = vmul.f32 %v6161_v10, %v1965_v1  ;;  %4968 = vmatprep.subr.bf16.mxu1 %v6303_v2 }
 0x1de   : > { %v2168_v23 = vshrl.u32 %v2086_v36, 16  ;;  %v2171_v19 = vshll.u32 %v2086_v36, 16  ;;  %v2087_v62 = vpack.c.bf16 %v7315_v9, %v2077_v16  ;;  %v2095_v8 = vpack.c.bf16 %v2077_v16, %v2076_v0 }
 0x1e0   : > { %v2170_v3 = vrot.slane %v2168_v23, 3  ;;  %v2173_v33 = vrot.slane %v2171_v19, 4  ;;  %v2331_v61 = vshrl.u32 %v2087_v62, 16  ;;  %v2334_v5 = vshll.u32 %v2087_v62, 16  ;;  %2379 = vst.msk [vmem:[#allocation3 + $0xb0] sm:$0xff] %vm2184_vm10, %v2095_v8  ;;  %2462 = vrot.lane.b32.xlu1 %v2095_v8, %s5200_s23 }
 0x1e1   : > { %v1809_v56 = vpop.f32.mrb[32].mxu0  ;;  %v2293_v7 = vshll.u32 %v2095_v8, 16  ;;  %v2380_v22 = vshrl.u32 %v2095_v8, 16 }
 0x1e2   : > { %v2333_v15 = vrot.slane %v2331_v61, 3  ;;  %v2336_v32 = vrot.slane %v2334_v5, 4  ;;  %v1895_v45 = vmul.f32 %v6055_v13, %v1809_v56  ;;  %v1811_v43 = vpop.f32.mrb[33].mxu0  ;;  %v2174_v11 = vor.u32 %v2173_v33, %v2170_v3 }
 0x1e3   : > { %v1812_v12 = vpop.f32.mrb[34].mxu0  ;;  %v2295_v31 = vrot.slane %v2293_v7, 1 }
 0x1e4   : > { %v1934_v35 = vadd.f32 %v6060_v27, %v1895_v45  ;;  %v1896_v55 = vmul.f32 %v6055_v13, %v1812_v12  ;;  %v2175_v38 = vsel %vm586_vm1, %v2165_v24, %v2174_v11  ;;  %v1814_v14 = vpop.f32.mrb[35].mxu0  ;;  %v2337_v39 = vor.u32 %v2336_v32, %v2333_v15 }
 0x1e5   : > { %2351 = vrot.lane.b32.xlu0 %v2175_v38, %s5200_s23  ;;  %2192 = vst.msk [vmem:[#allocation3 + $0xa8] sm:$0xff] %vm2184_vm10, %v2175_v38  ;;  %2427 = vrot.lane.b32.xlu1 %v2175_v38, %s5195_s17  ;;  %v2296_v59 = vsel %vm725_vm0, %v2291_v60, %v2295_v31  ;;  %v2382_v47 = vor.u32 %v2380_v22, %v2295_v31 }
 0x1e6   : > { %v1966_v46 = vmax.f32 %v1934_v35, 0.0  ;;  %v1935_v40 = vadd.f32 %v6060_v27, %v1896_v55  ;;  %2496 = vst.msk [vmem:[#allocation3 + $0x88] sm:$0xff] %vm2184_vm10, %v2296_v59  ;;  %v2338_v51 = vsel %vm586_vm1, %v2174_v11, %v2337_v39  ;;  %v2416_v32 = vsel %vm586_vm1, %v2337_v39, %v6091_v48 }
 0x1e7   : > { %v2383_v24 = vsel %vm725_vm0, %v2382_v47, %v5960_v37 }
 0x1e8   : > { %v2499_v6 = vmul.f32 %v6063_v4, %v1966_v46  ;;  %v1967_v49 = vmax.f32 %v1935_v40, 0.0  ;;  %2497 = vst.msk [vmem:[#allocation3 + $0xa0] sm:$0xff] %vm2184_vm10, %v2383_v24 }
 0x1e9   : > { %2311 = vrot.lane.b32.xlu0 %v2296_v59, %s5195_s17  ;;  %2396 = vrot.lane.b32.xlu1 %v2296_v59, %s5197_s25 }
 0x1ea   : > { %v2515_v52 = vpack.c.bf16 %v2499_v6, %v7315_v9  ;;  %v2500_v30 = vmul.f32 %v6068_v25, %v1967_v49 }
 0x1ec   : > { %v2533_v53 = vshrl.u32 %v2515_v52, 16  ;;  %v2536_v0 = vshll.u32 %v2515_v52, 16  ;;  %v2524_v1 = vpack.c.bf16 %v2500_v30, %v2499_v6 }
 0x1ed   : > { %2353 = vrot.lane.b32.xlu0 %v2338_v51, %s5200_s23  ;;  %2429 = vrot.lane.b32.xlu1 %v2338_v51, %s5195_s17 }
 0x1ee   : > { %v2535_v36 = vrot.slane %v2533_v53, 3  ;;  %v2538_v16 = vrot.slane %v2536_v0, 4  ;;  %2790 = vst.msk [vmem:[#allocation3 + $0xc8] sm:$0xff] %vm2184_vm10, %v2524_v1  ;;  %v2657_v45 = vshll.u32 %v2524_v1, 16  ;;  %v2661_v14 = vshrl.u32 %v2524_v1, 16 }
 0x1ef   : > { %v1817_v23 = vpop.f32.mrb[36].mxu0 }
 0x1f0   : > { %v2539_v19 = vor.u32 %v2538_v16, %v2535_v36  ;;  %v1897_v62 = vmul.f32 %v6055_v13, %v1817_v23  ;;  %v1819_v8 = vpop.f32.mrb[37].mxu0  ;;  %v2659_v22 = vrot.slane %v2657_v45, 1 }
 0x1f1   : > { %2398 = vrot.lane.b32.xlu1 %v2383_v24, %s5197_s25  ;;  %v1820_v3 = vpop.f32.mrb[38].mxu0 }
 0x1f2   : > { %v2540_v33 = vsel %vm586_vm1, %v6091_v48, %v2539_v19  ;;  %v1936_v61 = vadd.f32 %v6060_v27, %v1897_v62  ;;  %v1898_v5 = vmul.f32 %v6055_v13, %v1820_v3  ;;  %v1822_v56 = vpop.f32.mrb[39].mxu0  ;;  %v2660_v47 = vsel %vm725_vm0, %v5960_v37, %v2659_v22 }
 0x1f3   : > { %2612 = vst.msk [vmem:[#allocation3 + $0xc0] sm:$0xff] %vm2184_vm10, %v2540_v33  ;;  %v2204_v57 = vpop.permute.xlu0 %2203  ;;  %v2663_v49 = vor.u32 %v2661_v14, %v2659_v22 }
 0x1f4   : > { %2648 = vst.msk [vmem:[#allocation3 + $0xc0] sm:$0xff] %vm2225_vm11, %v6172_v34  ;;  %v1968_v7 = vmax.f32 %v1936_v61, 0.0  ;;  %v1937_v15 = vadd.f32 %v6060_v27, %v1898_v5  ;;  %2227 = vst.msk [vmem:[#allocation3 + $0x18] sm:$0xff] %vm2225_vm11, %v2204_v57  ;;  %v6325_v34 = vpop.permute.xlu1 %2464 }
 0x1f5   : > { %2431 = vrot.lane.b32.xlu1 %v2416_v32, %s5195_s17 }
 0x1f6   : > { %v2501_v43 = vmul.f32 %v6100_v58, %v1968_v7  ;;  %v1969_v11 = vmax.f32 %v1937_v15, 0.0 }
 0x1f8   : > { %v2516_v12 = vpack.c.bf16 %v2501_v43, %v2500_v30  ;;  %v2502_v60 = vmul.f32 %v6070_v42, %v1969_v11  ;;  %v2298_v31 = vpop.permute.xlu0 %2297 }
 0x1f9   : > { %2322 = vst.msk [vmem:[#allocation3] sm:$0xff] %vm2321_vm12, %v2298_v31  ;;  %2627 = vrot.lane.b32.xlu1 %v2524_v1, %s5197_s25 }
 0x1fa   : > { %v2542_v35 = vshrl.u32 %v2516_v12, 16  ;;  %v2545_v55 = vshll.u32 %v2516_v12, 16  ;;  %v2525_v38 = vpack.c.bf16 %v2502_v60, %v2501_v43 }
 0x1fc   : > { %v2544_v39 = vrot.slane %v2542_v35, 3  ;;  %v2547_v59 = vrot.slane %v2545_v55, 4  ;;  %2791 = vst.msk [vmem:[#allocation3 + $0xe0] sm:$0xff] %vm2184_vm10, %v2525_v38  ;;  %2868 = vrot.lane.b32.xlu0 %v2525_v38, %s5200_s23  ;;  %v2665_v46 = vshll.u32 %v2525_v38, 16  ;;  %v2669_v31 = vshrl.u32 %v2525_v38, 16 }
 0x1fd   : > { %2717 = vrot.lane.b32.xlu1 %v2660_v47, %s5195_s17  ;;  %v1825_v40 = vpop.f32.mrb[40].mxu0 }
 0x1fe   : > { %v2206_v51 = vpop.permute.xlu0 %2205  ;;  %v6334_v24 = vpop.permute.xlu1 %2450  ;;  %v1899_v6 = vmul.f32 %v6055_v13, %v1825_v40  ;;  %v2667_v52 = vrot.slane %v2665_v46, 1  ;;  %v2548_v30 = vor.u32 %v2547_v59, %v2544_v39 }
 0x1ff   : > { %2228 = vst.msk [vmem:[#allocation3 + $0x30] sm:$0xff] %vm2225_vm11, %v2206_v51  ;;  %v1827_v53 = vpop.f32.mrb[41].mxu0 }
 0x200   : > { %v1938_v0 = vadd.f32 %v6060_v27, %v1899_v6  ;;  %v1828_v1 = vpop.f32.mrb[42].mxu0  ;;  %v2668_v36 = vsel %vm725_vm0, %v2663_v49, %v2667_v52  ;;  %v2549_v16 = vsel %vm586_vm1, %v2539_v19, %v2548_v30  ;;  %v2671_v47 = vor.u32 %v2669_v31, %v2667_v52 }
 0x201   : > { %v1900_v23 = vmul.f32 %v6055_v13, %v1828_v1  ;;  %2629 = vrot.lane.b32.xlu1 %v2525_v38, %s5197_s25  ;;  %v1830_v62 = vpop.f32.mrb[43].mxu0  ;;  %2613 = vst.msk [vmem:[#allocation3 + $0xd8] sm:$0xff] %vm2184_vm10, %v2549_v16 }
 0x202   : > { %v1970_v8 = vmax.f32 %v1938_v0, 0.0 }
 0x203   : > { %v1939_v3 = vadd.f32 %v6060_v27, %v1900_v23  ;;  %v2340_v33 = vpop.permute.xlu0 %2339  ;;  %v2385_v61 = vpop.permute.xlu1 %2384 }
 0x204   : > { %v2503_v5 = vmul.f32 %v6154_v26, %v1970_v8  ;;  %2364 = vst.msk [vmem:[#allocation3] sm:$0xff] %vm2363_vm13, %v2340_v33 }
 0x205   : > { %2408 = vst.msk [vmem:[#allocation3 + $0x8] sm:$0xff] %vm2225_vm11, %v2385_v61  ;;  %v1971_v19 = vmax.f32 %v1939_v3, 0.0  ;;  %2802 = vrot.lane.b32.xlu1 %v2668_v36, %s5197_s25 }
 0x206   : > { %v2517_v56 = vpack.c.bf16 %v2503_v5, %v2502_v60 }
 0x207   : > { %v2504_v57 = vmul.f32 %v6083_v21, %v1971_v19  ;;  %v2300_v7 = vpop.permute.xlu0 %2299 }
 0x208   : > { %v2551_v15 = vshrl.u32 %v2517_v56, 16  ;;  %v2554_v32 = vshll.u32 %v2517_v56, 16  ;;  %2323 = vst.msk [vmem:[#allocation3 + $0x18] sm:$0xff] %vm2321_vm12, %v2300_v7 }
 0x209   : > { %v2526_v45 = vpack.c.bf16 %v2504_v57, %v2503_v5  ;;  %2758 = vrot.lane.b32.xlu1 %v2549_v16, %s5200_s23 }
 0x20a   : > { %v2553_v43 = vrot.slane %v2551_v15, 3  ;;  %v2556_v11 = vrot.slane %v2554_v32, 4 }
 0x20b   : > { %2792 = vst.msk [vmem:[#allocation3 + $0xf8] sm:$0xff] %vm2184_vm10, %v2526_v45  ;;  %2870 = vrot.lane.b32.xlu0 %v2526_v45, %s5200_s23  ;;  %v1833_v12 = vpop.f32.mrb[44].mxu0  ;;  %v2673_v22 = vshll.u32 %v2526_v45, 16 }
 0x20c   : > { %v1901_v60 = vmul.f32 %v6055_v13, %v1833_v12  ;;  %v1835_v35 = vpop.f32.mrb[45].mxu0  ;;  %v2208_v55 = vpop.permute.xlu0 %2207  ;;  %v2557_v14 = vor.u32 %v2556_v11, %v2553_v43 }
 0x20d   : > { %2229 = vst.msk [vmem:[#allocation3 + $0x48] sm:$0xff] %vm2225_vm11, %v2208_v55  ;;  %v6356_v39 = vpop.permute.xlu1 %2452  ;;  %2719 = vrot.lane.b32.xlu1 %v2668_v36, %s5195_s17  ;;  %v1836_v59 = vpop.f32.mrb[46].mxu0  ;;  %v2675_v46 = vrot.slane %v2673_v22, 1 }
 0x20e   : > { %v1940_v40 = vadd.f32 %v6060_v27, %v1901_v60  ;;  %v1902_v51 = vmul.f32 %v6055_v13, %v1836_v59  ;;  %v1838_v38 = vpop.f32.mrb[47].mxu0  ;;  %v2558_v6 = vsel %vm586_vm1, %v2548_v30, %v2557_v14 }
 0x20f   : > { %2835 = vrot.lane.b32.xlu0 %v2558_v6, %s5195_s17  ;;  %2614 = vst.msk [vmem:[#allocation3 + $0xf0] sm:$0xff] %vm2184_vm10, %v2558_v6  ;;  %v2676_v49 = vsel %vm725_vm0, %v2671_v47, %v2675_v46 }
 0x210   : > { %v1972_v53 = vmax.f32 %v1940_v40, 0.0  ;;  %v1941_v0 = vadd.f32 %v6060_v27, %v1902_v51  ;;  %2904 = vst.msk [vmem:[#allocation3 + $0xd0] sm:$0xff] %vm2184_vm10, %v2676_v49 }
 0x211   : > { %2631 = vrot.lane.b32.xlu1 %v2526_v45, %s5197_s25  ;;  %v2342_v52 = vpop.permute.xlu0 %2341  ;;  %v2418_v1 = vpop.permute.xlu1 %2417 }
 0x212   : > { %v2505_v36 = vmul.f32 %v6196_v54, %v1972_v53  ;;  %v1973_v16 = vmax.f32 %v1941_v0, 0.0  ;;  %2365 = vst.msk [vmem:[#allocation3 + $0x18] sm:$0xff] %vm2363_vm13, %v2342_v52 }
 0x213   : > { %2441 = vst.msk [vmem:[#allocation3 + $0x8] sm:$0xff] %vm2321_vm12, %v2418_v1  ;;  %2804 = vrot.lane.b32.xlu0 %v2676_v49, %s5197_s25 }
 0x214   : > { %2474 = vst.msk [vmem:[#allocation3 + $0x8] sm:$0xff] %vm2363_vm13, %v6334_v24  ;;  %v2518_v30 = vpack.c.bf16 %v2505_v36, %v2504_v57  ;;  %v2506_v23 = vmul.f32 %v6098_v50, %v1973_v16  ;;  %v2677_v24 = vshrl.u32 %v2526_v45, 16  ;;  %v2912_v45 = vld [vmem:[#allocation3] sm:$0xff] }
 0x215   : > { %2760 = vrot.lane.b32.xlu1 %v2558_v6, %s5200_s23  ;;  %v2302_v62 = vpop.permute.xlu0 %2301  ;;  %v2387_v8 = vpop.permute.xlu1 %2386 }
 0x216   : > { %v2560_v3 = vshrl.u32 %v2518_v30, 16  ;;  %v2563_v33 = vshll.u32 %v2518_v30, 16  ;;  %v6376_v61 = vpack.c.bf16 %v2506_v23, %v2505_v36  ;;  %2324 = vst.msk [vmem:[#allocation3 + $0x30] sm:$0xff] %vm2321_vm12, %v2302_v62  ;;  %v2679_v12 = vor.u32 %v2677_v24, %v2675_v46  ;;  %v6426_v62 = vld [vmem:[%s7303_s5] ss:$0 sm:$0xff]  ;;  %v5157_v24 = vld [vmem:[%s7301_s3 + $0x88] sm:$0xff]  }
 0x217   : > { %2409 = vst.msk [vmem:[#allocation3 + $0x20] sm:$0xff] %vm2225_vm11, %v2387_v8 }
 0x218   : > { %v2562_v5 = vrot.slane %v2560_v3, 3  ;;  %v2565_v19 = vrot.slane %v2563_v33, 4  ;;  %2793 = vst.msk [vmem:[#allocation3 + $0x110] sm:$0xff] %vm2184_vm10, %v6376_v61  ;;  %2872 = vrot.lane.b32.xlu0 %v6376_v61, %s5200_s23  ;;  %v2681_v56 = vshll.u32 %v6376_v61, 16  ;;  %v2685_v30 = vshrl.u32 %v6376_v61, 16 }
 0x219   : > { %2721 = vrot.lane.b32.xlu1 %v2676_v49, %s5195_s17  ;;  %v1841_v57 = vpop.f32.mrb[48].mxu0 }
 0x21a   : > { %v2210_v7 = vpop.permute.xlu0 %2209  ;;  %v6386_v15 = vpop.permute.xlu1 %2454  ;;  %v1903_v32 = vmul.f32 %v6055_v13, %v1841_v57  ;;  %v6389_v11 = vor.u32 %v2565_v19, %v2562_v5  ;;  %v2683_v31 = vrot.slane %v2681_v56, 1  ;;  %v2915_v57 = vld [vmem:[#allocation3 + $0x18] sm:$0xff] }
 0x21b   : > { %v2913_v43 = vld [vmem:[#allocation3 + $0x8] sm:$0xff]  ;;  %2230 = vst.msk [vmem:[#allocation3 + $0x60] sm:$0xff] %vm2225_vm11, %v2210_v7  ;;  %v1843_v22 = vpop.f32.mrb[49].mxu0 }
 0x21c   : > { %3184 = vmatprep.mubr.bf16.mxu1 %v2913_v43  ;;  %v1942_v60 = vadd.f32 %v6060_v27, %v1903_v32  ;;  %v1844_v35 = vpop.f32.mrb[50].mxu0  ;;  %v2567_v55 = vsel %vm586_vm1, %v2557_v14, %v6389_v11  ;;  %v2684_v59 = vsel %vm725_vm0, %v2679_v12, %v2683_v31  ;;  %v2687_v7 = vor.u32 %v2685_v30, %v2683_v31  ;;  %v6442_v43 = vld [vmem:[%s7304_s6] ss:$0 sm:$0xff] }
 0x21d   : > { %3185 = vmatmul.mubr.bf16.vlgmr.msra.gmra.mrb[0].mxu1 %v2912_v45  ;;  %v1904_v47 = vmul.f32 %v6055_v13, %v1844_v35  ;;  %2633 = vrot.lane.b32.xlu1 %v6376_v61, %s5197_s25  ;;  %2615 = vst.msk [vmem:[#allocation3 + $0x108] sm:$0xff] %vm2184_vm10, %v2567_v55  ;;  %v1846_v46 = vpop.f32.mrb[51].mxu0  ;;  %2905 = vst.msk [vmem:[#allocation3 + $0xe8] sm:$0xff] %vm2184_vm10, %v2684_v59 }
 0x21e   : > { %2837 = vrot.lane.b32.xlu0 %v2567_v55, %s5195_s17  ;;  %v1974_v40 = vmax.f32 %v1942_v60, 0.0  ;;  %4969 = vmatpush3.bf16.msra.mxu1 %v6303_v2 }
 0x21f   : > { %v1943_v51 = vadd.f32 %v6060_v27, %v1904_v47  ;;  %v2344_v14 = vpop.permute.xlu0 %2343  ;;  %v2420_v38 = vpop.permute.xlu1 %2419  ;;  %4970 = vmatprep.subr.bf16.mxu1 %v5157_v24 }
 0x220   : > { %v2507_v6 = vmul.f32 %v6215_v28, %v1974_v40  ;;  %2366 = vst.msk [vmem:[#allocation3 + $0x30] sm:$0xff] %vm2363_vm13, %v2344_v14 }
 0x221   : > { %2442 = vst.msk [vmem:[#allocation3 + $0x20] sm:$0xff] %vm2321_vm12, %v2420_v38  ;;  %v1975_v13 = vmax.f32 %v1943_v51, 0.0  ;;  %2762 = vrot.lane.b32.xlu1 %v2567_v55, %s5200_s23 }
 0x222   : > { %2475 = vst.msk [vmem:[#allocation3 + $0x20] sm:$0xff] %vm2363_vm13, %v6356_v39  ;;  %2806 = vrot.lane.b32.xlu0 %v2684_v59, %s5197_s25  ;;  %v2519_v49 = vpack.c.bf16 %v2507_v6, %v2506_v23  ;;  %4971 = vmatpush3.bf16.msra.mxu1 %v5157_v24 }
 0x223   : > { %v2508_v2 = vmul.f32 %v6115_v20, %v1975_v13  ;;  %v2304_v27 = vpop.permute.xlu0 %2303  ;;  %v2389_v53 = vpop.permute.xlu1 %2388  ;;  %5070 = vmatprep.subr.bf16.mxu1 %v7314_v29 }
 0x224   : > { %v2569_v0 = vshrl.u32 %v2519_v49, 16  ;;  %v2572_v52 = vshll.u32 %v2519_v49, 16  ;;  %2325 = vst.msk [vmem:[#allocation3 + $0x48] sm:$0xff] %vm2321_vm12, %v2304_v27 }
 0x225   : > { %2410 = vst.msk [vmem:[#allocation3 + $0x38] sm:$0xff] %vm2225_vm11, %v2389_v53  ;;  %v6414_v1 = vpack.c.bf16 %v2508_v2, %v2507_v6  ;;  %2723 = vrot.lane.b32.xlu1 %v2684_v59, %s5195_s17 }
 0x226   : > { %v2571_v39 = vrot.slane %v2569_v0, 3  ;;  %v2574_v36 = vrot.slane %v2572_v52, 4 }
 0x227   : > { %2794 = vst.msk [vmem:[#allocation3 + $0x128] sm:$0xff] %vm2184_vm10, %v6414_v1  ;;  %2874 = vrot.lane.b32.xlu0 %v6414_v1, %s5200_s23  ;;  %v1849_v16 = vpop.f32.mrb[52].mxu0  ;;  %v2689_v23 = vshll.u32 %v6414_v1, 16 }
 0x228   : > { %v1905_v8 = vmul.f32 %v6426_v62, %v1849_v16  ;;  %v1851_v3 = vpop.f32.mrb[53].mxu0  ;;  %v2212_v5 = vpop.permute.xlu0 %2211  ;;  %v6429_v19 = vor.u32 %v2574_v36, %v2571_v39 }
 0x229   : > { %v2916_v33 = vld [vmem:[#allocation3 + $0x20] sm:$0xff]  ;;  %2231 = vst.msk [vmem:[#allocation3 + $0x78] sm:$0xff] %vm2225_vm11, %v2212_v5  ;;  %v6435_v61 = vpop.permute.xlu1 %2456  ;;  %2635 = vrot.lane.b32.xlu1 %v6414_v1, %s5197_s25  ;;  %v1852_v56 = vpop.f32.mrb[54].mxu0  ;;  %v2691_v32 = vrot.slane %v2689_v23, 1 }
 0x22a   : > { %3192 = vmatprep.mubr.bf16.mxu1 %v2916_v33  ;;  %v1944_v12 = vadd.f32 %v6442_v43, %v1905_v8  ;;  %v1906_v22 = vmul.f32 %v6426_v62, %v1852_v56  ;;  %v1854_v45 = vpop.f32.mrb[55].mxu0  ;;  %v2576_v60 = vsel %vm586_vm1, %v6389_v11, %v6429_v19 }
 0x22b   : > { %3193 = vmatmul.mubr.bf16.gmra.mrb[4].mxu1 %v2915_v57  ;;  %2839 = vrot.lane.b32.xlu0 %v2576_v60, %s5195_s17  ;;  %2616 = vst.msk [vmem:[#allocation3 + $0x120] sm:$0xff] %vm2184_vm10, %v2576_v60  ;;  %v2692_v31 = vsel %vm725_vm0, %v2687_v7, %v2691_v32 }
 0x22c   : > { %v1976_v35 = vmax.f32 %v1944_v12, 0.0  ;;  %v1945_v55 = vadd.f32 %v6442_v43, %v1906_v22  ;;  %2906 = vst.msk [vmem:[#allocation3 + $0x100] sm:$0xff] %vm2184_vm10, %v2692_v31 }
 0x22d   : > { %2764 = vrot.lane.b32.xlu1 %v2576_v60, %s5200_s23  ;;  %v2346_v59 = vpop.permute.xlu0 %2345  ;;  %v2422_v47 = vpop.permute.xlu1 %2421 }
 0x22e   : > { %v2509_v11 = vmul.f32 %v6234_v41, %v1976_v35  ;;  %v1977_v46 = vmax.f32 %v1945_v55, 0.0  ;;  %2367 = vst.msk [vmem:[#allocation3 + $0x48] sm:$0xff] %vm2363_vm13, %v2346_v59 }
 0x22f   : > { %2443 = vst.msk [vmem:[#allocation3 + $0x38] sm:$0xff] %vm2321_vm12, %v2422_v47  ;;  %2808 = vrot.lane.b32.xlu0 %v2692_v31, %s5197_s25 }
 0x230   : > { %2476 = vst.msk [vmem:[#allocation3 + $0x38] sm:$0xff] %vm2363_vm13, %v6386_v15  ;;  %v2520_v40 = vpack.c.bf16 %v2509_v11, %v2508_v2  ;;  %v2510_v51 = vmul.f32 %v6127_v17, %v1977_v46  ;;  %v2693_v15 = vshrl.u32 %v6414_v1, 16  ;;  %v2918_v1 = vld [vmem:[#allocation3 + $0x30] sm:$0xff] }
 0x231   : > { %2725 = vrot.lane.b32.xlu1 %v2692_v31, %s5195_s17  ;;  %v2306_v14 = vpop.permute.xlu0 %2305  ;;  %v2391_v38 = vpop.permute.xlu1 %2390 }
 0x232   : > { %v2578_v6 = vshrl.u32 %v2520_v40, 16  ;;  %v2581_v13 = vshll.u32 %v2520_v40, 16  ;;  %v6464_v49 = vpack.c.bf16 %v2510_v51, %v2509_v11  ;;  %2326 = vst.msk [vmem:[#allocation3 + $0x60] sm:$0xff] %vm2321_vm12, %v2306_v14  ;;  %v2695_v23 = vor.u32 %v2693_v15, %v2691_v32 }
 0x233   : > { %2411 = vst.msk [vmem:[#allocation3 + $0x50] sm:$0xff] %vm2225_vm11, %v2391_v38 }
 0x234   : > { %v2580_v27 = vrot.slane %v2578_v6, 3  ;;  %v2583_v53 = vrot.slane %v2581_v13, 4  ;;  %2795 = vst.msk [vmem:[#allocation3 + $0x140] sm:$0xff] %vm2184_vm10, %v6464_v49  ;;  %2876 = vrot.lane.b32.xlu0 %v6464_v49, %s5200_s23  ;;  %v2697_v2 = vshll.u32 %v6464_v49, 16 }
 0x235   : > { %2637 = vrot.lane.b32.xlu1 %v6464_v49, %s5197_s25  ;;  %v1857_v0 = vpop.f32.mrb[56].mxu0 }
 0x236   : > { %v2214_v52 = vpop.permute.xlu0 %2213  ;;  %v6476_v39 = vpop.permute.xlu1 %2458  ;;  %v1907_v36 = vmul.f32 %v6426_v62, %v1857_v0  ;;  %v2584_v30 = vor.u32 %v2583_v53, %v2580_v27  ;;  %v2699_v8 = vrot.slane %v2697_v2, 1 }
 0x237   : > { %v2919_v16 = vld [vmem:[#allocation3 + $0x38] sm:$0xff]  ;;  %2232 = vst.msk [vmem:[#allocation3 + $0x90] sm:$0xff] %vm2225_vm11, %v2214_v52  ;;  %v1859_v3 = vpop.f32.mrb[57].mxu0  ;;  %v2921_v52 = vld [vmem:[#allocation3 + $0x48] sm:$0xff] }
 0x238   : > { %3200 = vmatprep.mubr.bf16.mxu1 %v2919_v16  ;;  %v1946_v33 = vadd.f32 %v6442_v43, %v1907_v36  ;;  %v1860_v5 = vpop.f32.mrb[58].mxu0  ;;  %v2585_v24 = vsel %vm586_vm1, %v6429_v19, %v2584_v30  ;;  %v2700_v56 = vsel %vm725_vm0, %v2695_v23, %v2699_v8 }
 0x239   : > { %3201 = vmatmul.mubr.bf16.gmra.mrb[8].mxu1 %v2918_v1  ;;  %v1908_v57 = vmul.f32 %v6426_v62, %v1860_v5  ;;  %2766 = vrot.lane.b32.xlu1 %v2585_v24, %s5200_s23  ;;  %2617 = vst.msk [vmem:[#allocation3 + $0x138] sm:$0xff] %vm2184_vm10, %v2585_v24  ;;  %v1862_v7 = vpop.f32.mrb[59].mxu0  ;;  %2907 = vst.msk [vmem:[#allocation3 + $0x118] sm:$0xff] %vm2184_vm10, %v2700_v56 }
 0x23a   : > { %2841 = vrot.lane.b32.xlu0 %v2585_v24, %s5195_s17  ;;  %v1978_v32 = vmax.f32 %v1946_v33, 0.0 }
 0x23b   : > { %v1947_v12 = vadd.f32 %v6442_v43, %v1908_v57  ;;  %v2348_v22 = vpop.permute.xlu0 %2347  ;;  %v2424_v45 = vpop.permute.xlu1 %2423 }
 0x23c   : > { %v2511_v19 = vmul.f32 %v6253_v18, %v1978_v32  ;;  %2368 = vst.msk [vmem:[#allocation3 + $0x60] sm:$0xff] %vm2363_vm13, %v2348_v22 }
 0x23d   : > { %2444 = vst.msk [vmem:[#allocation3 + $0x50] sm:$0xff] %vm2321_vm12, %v2424_v45  ;;  %v1979_v60 = vmax.f32 %v1947_v12, 0.0  ;;  %2727 = vrot.lane.b32.xlu1 %v2700_v56, %s5195_s17 }
 0x23e   : > { %2477 = vst.msk [vmem:[#allocation3 + $0x50] sm:$0xff] %vm2363_vm13, %v6435_v61  ;;  %2810 = vrot.lane.b32.xlu0 %v2700_v56, %s5197_s25  ;;  %v2521_v31 = vpack.c.bf16 %v2511_v19, %v2510_v51  ;;  %v2701_v51 = vshrl.u32 %v6464_v49, 16 }
 0x23f   : > { %v2512_v35 = vmul.f32 %v6143_v44, %v1979_v60  ;;  %v2308_v55 = vpop.permute.xlu0 %2307  ;;  %v2393_v59 = vpop.permute.xlu1 %2392 }
 0x240   : > { %v2587_v47 = vshrl.u32 %v2521_v31, 16  ;;  %v2590_v11 = vshll.u32 %v2521_v31, 16  ;;  %2327 = vst.msk [vmem:[#allocation3 + $0x78] sm:$0xff] %vm2321_vm12, %v2308_v55  ;;  %v2703_v36 = vor.u32 %v2701_v51, %v2699_v8 }
 0x241   : > { %2412 = vst.msk [vmem:[#allocation3 + $0x68] sm:$0xff] %vm2225_vm11, %v2393_v59  ;;  %v6500_v46 = vpack.c.bf16 %v2512_v35, %v2511_v19 }
 0x242   : > { %v2589_v40 = vrot.slane %v2587_v47, 3  ;;  %v2592_v14 = vrot.slane %v2590_v11, 4 }
 0x243   : > { %2796 = vst.msk [vmem:[#allocation3 + $0x158] sm:$0xff] %vm2184_vm10, %v6500_v46  ;;  %2878 = vrot.lane.b32.xlu0 %v6500_v46, %s5200_s23  ;;  %v1865_v61 = vpop.f32.mrb[60].mxu0  ;;  %v2705_v38 = vshll.u32 %v6500_v46, 16  ;;  %v2924_v51 = vld [vmem:[#allocation3 + $0x60] sm:$0xff] }
 0x244   : > { %v1909_v6 = vmul.f32 %v6426_v62, %v1865_v61  ;;  %v1867_v13 = vpop.f32.mrb[61].mxu0  ;;  %v2216_v53 = vpop.permute.xlu0 %2215  ;;  %v2593_v15 = vor.u32 %v2592_v14, %v2589_v40 }
 0x245   : > { %v2922_v27 = vld [vmem:[#allocation3 + $0x50] sm:$0xff]  ;;  %2233 = vst.msk [vmem:[#allocation3 + $0xa8] sm:$0xff] %vm2225_vm11, %v2216_v53  ;;  %v6510_v2 = vpop.permute.xlu1 %2460  ;;  %v1868_v0 = vpop.f32.mrb[62].mxu0  ;;  %v2707_v16 = vrot.slane %v2705_v38, 1 }
 0x246   : > { %3208 = vmatprep.mubr.bf16.mxu1 %v2922_v27  ;;  %v1948_v23 = vadd.f32 %v6442_v43, %v1909_v6  ;;  %v1910_v49 = vmul.f32 %v6426_v62, %v1868_v0  ;;  %v1870_v3 = vpop.f32.mrb[63].mxu0  ;;  %v2594_v1 = vsel %vm586_vm1, %v2584_v30, %v2593_v15 }
 0x247   : > { %3209 = vmatmul.mubr.bf16.gmra.mrb[12].mxu1 %v2921_v52  ;;  %2768 = vrot.lane.b32.xlu1 %v2594_v1, %s5200_s23  ;;  %2618 = vst.msk [vmem:[#allocation3 + $0x150] sm:$0xff] %vm2184_vm10, %v2594_v1  ;;  %v2708_v33 = vsel %vm725_vm0, %v2703_v36, %v2707_v16 }
 0x248   : > { %2843 = vrot.lane.b32.xlu0 %v2594_v1, %s5195_s17  ;;  %v1980_v5 = vmax.f32 %v1948_v23, 0.0  ;;  %v1949_v8 = vadd.f32 %v6442_v43, %v1910_v49  ;;  %2908 = vst.msk [vmem:[#allocation3 + $0x130] sm:$0xff] %vm2184_vm10, %v2708_v33 }
 0x249   : > { %v2350_v24 = vpop.permute.xlu0 %2349  ;;  %v2426_v56 = vpop.permute.xlu1 %2425 }
 0x24a   : > { %v2513_v62 = vmul.f32 %v6272_v63, %v1980_v5  ;;  %v1981_v57 = vmax.f32 %v1949_v8, 0.0  ;;  %2369 = vst.msk [vmem:[#allocation3 + $0x78] sm:$0xff] %vm2363_vm13, %v2350_v24 }
 0x24b   : > { %2445 = vst.msk [vmem:[#allocation3 + $0x68] sm:$0xff] %vm2321_vm12, %v2426_v56  ;;  %2729 = vrot.lane.b32.xlu1 %v2708_v33, %s5195_s17 }
 0x24c   : > { %2478 = vst.msk [vmem:[#allocation3 + $0x68] sm:$0xff] %vm2363_vm13, %v6476_v39  ;;  %2812 = vrot.lane.b32.xlu0 %v2708_v33, %s5197_s25  ;;  %v2522_v30 = vpack.c.bf16 %v2513_v62, %v2512_v35  ;;  %v2514_v43 = vmul.f32 %v6161_v10, %v1981_v57  ;;  %v2709_v35 = vshrl.u32 %v6500_v46, 16 }
 0x24d   : > { %v2310_v7 = vpop.permute.xlu0 %2309  ;;  %v2395_v32 = vpop.permute.xlu1 %2394 }
 0x24e   : > { %v2596_v12 = vshrl.u32 %v2522_v30, 16  ;;  %v2599_v22 = vshll.u32 %v2522_v30, 16  ;;  %v2523_v45 = vpack.c.bf16 %v7315_v9, %v2514_v43  ;;  %v2531_v19 = vpack.c.bf16 %v2514_v43, %v2513_v62  ;;  %2328 = vst.msk [vmem:[#allocation3 + $0x90] sm:$0xff] %vm2321_vm12, %v2310_v7 }
 0x24f   : > { %2413 = vst.msk [vmem:[#allocation3 + $0x80] sm:$0xff] %vm2225_vm11, %v2395_v32  ;;  %v2711_v38 = vor.u32 %v2709_v35, %v2707_v16 }
 0x250   : > { %v2598_v60 = vrot.slane %v2596_v12, 3  ;;  %v2601_v39 = vrot.slane %v2599_v22, 4  ;;  %v2750_v31 = vshrl.u32 %v2523_v45, 16  ;;  %v2753_v55 = vshll.u32 %v2523_v45, 16  ;;  %2797 = vst.msk [vmem:[#allocation3 + $0x170] sm:$0xff] %vm2184_vm10, %v2531_v19  ;;  %2880 = vrot.lane.b32.xlu0 %v2531_v19, %s5200_s23 }
 0x251   : > { %v2713_v59 = vshll.u32 %v2531_v19, 16  ;;  %v2798_v13 = vshrl.u32 %v2531_v19, 16 }
 0x252   : > { %v2752_v47 = vrot.slane %v2750_v31, 3  ;;  %v2755_v11 = vrot.slane %v2753_v55, 4  ;;  %v2463_v40 = vpop.permute.xlu1 %2462  ;;  %v2602_v61 = vor.u32 %v2601_v39, %v2598_v60 }
 0x253   : > { %v2925_v14 = vld [vmem:[#allocation3 + $0x68] sm:$0xff]  ;;  %v2715_v6 = vrot.slane %v2713_v59, 1 }
 0x254   : > { %3216 = vmatprep.mubr.bf16.mxu1 %v2925_v14  ;;  %v2603_v27 = vsel %vm586_vm1, %v2593_v15, %v2602_v61  ;;  %v2756_v53 = vor.u32 %v2755_v11, %v2752_v47 }
 0x255   : > { %3217 = vmatmul.mubr.bf16.gmra.mrb[16].mxu1 %v2924_v51  ;;  %2770 = vrot.lane.b32.xlu1 %v2603_v27, %s5200_s23  ;;  %2619 = vst.msk [vmem:[#allocation3 + $0x168] sm:$0xff] %vm2184_vm10, %v2603_v27  ;;  %v2716_v0 = vsel %vm725_vm0, %v2711_v38, %v2715_v6  ;;  %v2800_v52 = vor.u32 %v2798_v13, %v2715_v6 }
 0x256   : > { %2845 = vrot.lane.b32.xlu0 %v2603_v27, %s5195_s17  ;;  %2909 = vst.msk [vmem:[#allocation3 + $0x148] sm:$0xff] %vm2184_vm10, %v2716_v0  ;;  %v2757_v36 = vsel %vm586_vm1, %v2602_v61, %v2756_v53  ;;  %v2834_v5 = vsel %vm586_vm1, %v2756_v53, %v6091_v48 }
 0x257   : > { %v2352_v16 = vpop.permute.xlu0 %2351  ;;  %v2428_v23 = vpop.permute.xlu1 %2427  ;;  %v2801_v49 = vsel %vm725_vm0, %v2800_v52, %v5960_v37  ;;  %vm4094_vm0 = vcmask 15360  }
 0x258   : > { %2370 = vst.msk [vmem:[#allocation3 + $0x90] sm:$0xff] %vm2363_vm13, %v2352_v16 }
 0x259   : > { %2446 = vst.msk [vmem:[#allocation3 + $0x80] sm:$0xff] %vm2321_vm12, %v2428_v23  ;;  %2639 = vrot.lane.b32.xlu1 %v6500_v46, %s5197_s25  ;;  %v2927_v46 = vld [vmem:[#allocation3 + $0x78] sm:$0xff] }
 0x25a   : > { %2910 = vst.msk [vmem:[#allocation3 + $0x160] sm:$0xff] %vm2184_vm10, %v2801_v49  ;;  %2814 = vrot.lane.b32.xlu0 %v2716_v0, %s5197_s25 }
 0x25b   : > { %2479 = vst.msk [vmem:[#allocation3 + $0x80] sm:$0xff] %vm2363_vm13, %v6510_v2  ;;  %v2312_v15 = vpop.permute.xlu0 %2311  ;;  %v2397_v3 = vpop.permute.xlu1 %2396 }
 0x25c   : > { %2329 = vst.msk [vmem:[#allocation3 + $0xa8] sm:$0xff] %vm2321_vm12, %v2312_v15 }
 0x25d   : > { %2414 = vst.msk [vmem:[#allocation3 + $0x98] sm:$0xff] %vm2225_vm11, %v2397_v3  ;;  %2731 = vrot.lane.b32.xlu1 %v2716_v0, %s5195_s17 }
 0x25e   : > { %2847 = vrot.lane.b32.xlu0 %v2757_v36, %s5195_s17 }
 0x25f   : > { %v2354_v37 = vpop.permute.xlu0 %2353  ;;  %v2430_v1 = vpop.permute.xlu1 %2429  ;;  %v2930_v56 = vld [vmem:[#allocation3 + $0x90] sm:$0xff] }
 0x260   : > { %2371 = vst.msk [vmem:[#allocation3 + $0xa8] sm:$0xff] %vm2363_vm13, %v2354_v37 }
 0x261   : > { %2447 = vst.msk [vmem:[#allocation3 + $0x98] sm:$0xff] %vm2321_vm12, %v2430_v1 }
 0x262   : > { %v2928_v2 = vld [vmem:[#allocation3 + $0x80] sm:$0xff]  ;;  %2480 = vst.msk [vmem:[#allocation3 + $0x98] sm:$0xff] %vm2363_vm13, %v2463_v40  ;;  %2816 = vrot.lane.b32.xlu0 %v2801_v49, %s5197_s25 }
 0x263   : > { %3224 = vmatprep.mubr.bf16.mxu1 %v2928_v2  ;;  %v2399_v33 = vpop.permute.xlu1 %2398 }
 0x264   : > { %3225 = vmatmul.mubr.bf16.gmra.mrb[20].mxu1 %v2927_v46  ;;  %2415 = vst.msk [vmem:[#allocation3 + $0xb0] sm:$0xff] %vm2225_vm11, %v2399_v33 }
 0x266   : > { %2849 = vrot.lane.b32.xlu0 %v2834_v5, %s5195_s17 }
 0x267   : > { %v2432_v8 = vpop.permute.xlu1 %2431  ;;  %v2933_v30 = vld [vmem:[#allocation3 + $0xa8] sm:$0xff] }
 0x268   : > { %2448 = vst.msk [vmem:[#allocation3 + $0xb0] sm:$0xff] %vm2321_vm12, %v2432_v8 }
 0x269   : > { %v2931_v24 = vld [vmem:[#allocation3 + $0x98] sm:$0xff]  ;;  %2481 = vst.msk [vmem:[#allocation3 + $0xb0] sm:$0xff] %vm2363_vm13, %v6325_v34 }
 0x26a   : > { %3232 = vmatprep.mubr.bf16.mxu1 %v2931_v24  ;;  %2772 = vrot.lane.b32.xlu0 %v2757_v36, %s5200_s23 }
 0x26b   : > { %v2628_v62 = vpop.permute.xlu1 %2627 }
 0x26c   : > { %3233 = vmatmul.mubr.bf16.gmra.mrb[24].mxu1 %v2930_v56  ;;  %2649 = vst.msk [vmem:[#allocation3 + $0xd8] sm:$0xff] %vm2225_vm11, %v2628_v62 }
 0x26e   : > { %v2869_v32 = vpop.permute.xlu0 %2868 }
 0x26f   : > { %v2718_v57 = vpop.permute.xlu1 %2717 }
 0x270   : > { %2741 = vst.msk [vmem:[#allocation3 + $0xc0] sm:$0xff] %vm2321_vm12, %v2718_v57  ;;  %v2934_v48 = vld [vmem:[#allocation3 + $0xb0] sm:$0xff] }
 0x271   : > { %3240 = vmatprep.mubr.bf16.mxu1 %v2934_v48 }
 0x273   : > { %v2630_v43 = vpop.permute.xlu1 %2629 }
 0x274   : > { %3241 = vmatmul.mubr.bf16.gmra.mrb[28].mxu1 %v2933_v30  ;;  %2650 = vst.msk [vmem:[#allocation3 + $0xf0] sm:$0xff] %vm2225_vm11, %v2630_v43 }
 0x277   : > { %v2803_v7 = vpop.permute.xlu1 %2802 }
 0x278   : > { %2826 = vst.msk [vmem:[#allocation3 + $0xc8] sm:$0xff] %vm2225_vm11, %v2803_v7 }
 0x27b   : > { %v2759_v12 = vpop.permute.xlu1 %2758 }
 0x27c   : > { %2782 = vst.msk [vmem:[#allocation3 + $0xc0] sm:$0xff] %vm2363_vm13, %v2759_v12 }
 0x27d   : > { %v2871_v22 = vpop.permute.xlu0 %2870 }
 0x27f   : > { %v2720_v45 = vpop.permute.xlu1 %2719 }
 0x280   : > { %2742 = vst.msk [vmem:[#allocation3 + $0xd8] sm:$0xff] %vm2321_vm12, %v2720_v45 }
 0x281   : > { %v2836_v19 = vpop.permute.xlu0 %2835 }
 0x282   : > { %2859 = vst.msk [vmem:[#allocation3 + $0xc8] sm:$0xff] %vm2321_vm12, %v2836_v19 }
 0x283   : > { %2889 = vst.msk [vmem:[#allocation3 + $0xc8] sm:$0xff] %vm2363_vm13, %v2869_v32  ;;  %v2632_v60 = vpop.permute.xlu1 %2631  ;;  %v2936_v47 = vld [vmem:[#allocation3 + $0xc0] sm:$0xff] }
 0x284   : > { %2651 = vst.msk [vmem:[#allocation3 + $0x108] sm:$0xff] %vm2225_vm11, %v2632_v60 }
 0x285   : > { %v2805_v39 = vpop.permute.xlu0 %2804 }
 0x286   : > { %2827 = vst.msk [vmem:[#allocation3 + $0xe0] sm:$0xff] %vm2225_vm11, %v2805_v39 }
 0x287   : > { %v2761_v31 = vpop.permute.xlu1 %2760 }
 0x288   : > { %2783 = vst.msk [vmem:[#allocation3 + $0xd8] sm:$0xff] %vm2363_vm13, %v2761_v31 }
 0x28a   : > { %v2873_v55 = vpop.permute.xlu0 %2872  ;;  %v2937_v35 = vld [vmem:[#allocation3 + $0xc8] sm:$0xff] }
 0x28b   : > { %v2722_v59 = vpop.permute.xlu1 %2721  ;;  %3248 = vmatprep.mubr.bf16.mxu1 %v2937_v35 }
 0x28c   : > { %2743 = vst.msk [vmem:[#allocation3 + $0xf0] sm:$0xff] %vm2321_vm12, %v2722_v59  ;;  %3249 = vmatmul.mubr.bf16.gmra.mrb[32].mxu1 %v2936_v47 }
 0x28f   : > { %v2634_v11 = vpop.permute.xlu1 %2633  ;;  %v2939_v13 = vld [vmem:[#allocation3 + $0xd8] sm:$0xff] }
 0x290   : > { %v2838_v40 = vpop.permute.xlu0 %2837  ;;  %2652 = vst.msk [vmem:[#allocation3 + $0x120] sm:$0xff] %vm2225_vm11, %v2634_v11 }
 0x291   : > { %2860 = vst.msk [vmem:[#allocation3 + $0xe0] sm:$0xff] %vm2321_vm12, %v2838_v40  ;;  %v2914_v40 = vld [vmem:[#allocation3 + $0x10] sm:$0xff] }
 0x292   : > { %2890 = vst.msk [vmem:[#allocation3 + $0xe0] sm:$0xff] %vm2363_vm13, %v2871_v22 }
 0x293   : > { %v2763_v14 = vpop.permute.xlu1 %2762 }
 0x294   : > { %v2807_v61 = vpop.permute.xlu0 %2806  ;;  %2784 = vst.msk [vmem:[#allocation3 + $0xf0] sm:$0xff] %vm2363_vm13, %v2763_v14  ;;  %v2917_v14 = vld [vmem:[#allocation3 + $0x28] sm:$0xff] }
 0x295   : > { %2828 = vst.msk [vmem:[#allocation3 + $0xf8] sm:$0xff] %vm2225_vm11, %v2807_v61  ;;  %v2920_v61 = vld [vmem:[#allocation3 + $0x40] sm:$0xff] }
 0x297   : > { %v2724_v51 = vpop.permute.xlu1 %2723 }
 0x298   : > { %2744 = vst.msk [vmem:[#allocation3 + $0x108] sm:$0xff] %vm2321_vm12, %v2724_v51 }
 0x299   : > { %v2940_v38 = vld [vmem:[#allocation3 + $0xe0] sm:$0xff]  ;;  %v2875_v6 = vpop.permute.xlu0 %2874 }
 0x29a   : > { %3256 = vmatprep.mubr.bf16.mxu1 %v2940_v38 }
 0x29b   : > { %3257 = vmatmul.mubr.bf16.gmra.mrb[36].mxu1 %v2939_v13  ;;  %v2636_v27 = vpop.permute.xlu1 %2635  ;;  %v2942_v15 = vld [vmem:[#allocation3 + $0xf0] sm:$0xff] }
 0x29c   : > { %2653 = vst.msk [vmem:[#allocation3 + $0x138] sm:$0xff] %vm2225_vm11, %v2636_v27 }
 0x29d   : > { %v2840_v53 = vpop.permute.xlu0 %2839 }
 0x29e   : > { %2861 = vst.msk [vmem:[#allocation3 + $0xf8] sm:$0xff] %vm2321_vm12, %v2840_v53  ;;  %v2923_v53 = vld [vmem:[#allocation3 + $0x58] sm:$0xff] }
 0x29f   : > { %2891 = vst.msk [vmem:[#allocation3 + $0xf8] sm:$0xff] %vm2363_vm13, %v2873_v55  ;;  %v2765_v0 = vpop.permute.xlu1 %2764 }
 0x2a0   : > { %2785 = vst.msk [vmem:[#allocation3 + $0x108] sm:$0xff] %vm2363_vm13, %v2765_v0  ;;  %v2926_v0 = vld [vmem:[#allocation3 + $0x70] sm:$0xff] }
 0x2a1   : > { %v2809_v52 = vpop.permute.xlu0 %2808 }
 0x2a2   : > { %2829 = vst.msk [vmem:[#allocation3 + $0x110] sm:$0xff] %vm2225_vm11, %v2809_v52  ;;  %v2929_v52 = vld [vmem:[#allocation3 + $0x88] sm:$0xff] }
 0x2a3   : > { %v2726_v36 = vpop.permute.xlu1 %2725 }
 0x2a4   : > { %2745 = vst.msk [vmem:[#allocation3 + $0x120] sm:$0xff] %vm2321_vm12, %v2726_v36  ;;  %v2932_v36 = vld [vmem:[#allocation3 + $0xa0] sm:$0xff] }
 0x2a6   : > { %v2877_v16 = vpop.permute.xlu0 %2876  ;;  %v2943_v23 = vld [vmem:[#allocation3 + $0xf8] sm:$0xff] }
 0x2a7   : > { %v2638_v49 = vpop.permute.xlu1 %2637  ;;  %3264 = vmatprep.mubr.bf16.mxu1 %v2943_v23  ;;  %v2945_v5 = vld [vmem:[#allocation3 + $0x108] sm:$0xff] }
 0x2a8   : > { %2654 = vst.msk [vmem:[#allocation3 + $0x150] sm:$0xff] %vm2225_vm11, %v2638_v49  ;;  %3265 = vmatmul.mubr.bf16.gmra.mrb[40].mxu1 %v2942_v15 }
 0x2ab   : > { %v2767_v3 = vpop.permute.xlu1 %2766 }
 0x2ac   : > { %v2842_v37 = vpop.permute.xlu0 %2841  ;;  %2786 = vst.msk [vmem:[#allocation3 + $0x120] sm:$0xff] %vm2363_vm13, %v2767_v3 }
 0x2ad   : > { %2862 = vst.msk [vmem:[#allocation3 + $0x110] sm:$0xff] %vm2321_vm12, %v2842_v37 }
 0x2ae   : > { %2892 = vst.msk [vmem:[#allocation3 + $0x110] sm:$0xff] %vm2363_vm13, %v2875_v6 }
 0x2af   : > { %v2728_v1 = vpop.permute.xlu1 %2727 }
 0x2b0   : > { %v2811_v2 = vpop.permute.xlu0 %2810  ;;  %2746 = vst.msk [vmem:[#allocation3 + $0x138] sm:$0xff] %vm2321_vm12, %v2728_v1  ;;  %v2935_v1 = vld [vmem:[#allocation3 + $0xb8] sm:$0xff] }
 0x2b1   : > { %2830 = vst.msk [vmem:[#allocation3 + $0x128] sm:$0xff] %vm2225_vm11, %v2811_v2  ;;  %v2938_v2 = vld [vmem:[#allocation3 + $0xd0] sm:$0xff] }
 0x2b3   : > { %v2948_v30 = vld [vmem:[#allocation3 + $0x120] sm:$0xff] }
 0x2b5   : > { %v2946_v46 = vld [vmem:[#allocation3 + $0x110] sm:$0xff]  ;;  %v2879_v33 = vpop.permute.xlu0 %2878 }
 0x2b6   : > { %3272 = vmatprep.mubr.bf16.mxu1 %v2946_v46 }
 0x2b7   : > { %3273 = vmatmul.mubr.bf16.gmra.mrb[44].mxu1 %v2945_v5 }
 0x2b9   : > { %v2769_v8 = vpop.permute.xlu1 %2768 }
 0x2ba   : > { %v2844_v24 = vpop.permute.xlu0 %2843  ;;  %2787 = vst.msk [vmem:[#allocation3 + $0x138] sm:$0xff] %vm2363_vm13, %v2769_v8  ;;  %v2944_v8 = vld [vmem:[#allocation3 + $0x100] sm:$0xff] }
 0x2bb   : > { %2863 = vst.msk [vmem:[#allocation3 + $0x128] sm:$0xff] %vm2321_vm12, %v2844_v24 }
 0x2bc   : > { %2893 = vst.msk [vmem:[#allocation3 + $0x128] sm:$0xff] %vm2363_vm13, %v2877_v16 }
 0x2bd   : > { %v2730_v56 = vpop.permute.xlu1 %2729 }
 0x2be   : > { %v2813_v62 = vpop.permute.xlu0 %2812  ;;  %2747 = vst.msk [vmem:[#allocation3 + $0x150] sm:$0xff] %vm2321_vm12, %v2730_v56 }
 0x2bf   : > { %2831 = vst.msk [vmem:[#allocation3 + $0x140] sm:$0xff] %vm2225_vm11, %v2813_v62 }
 0x2c1   : > { %v2951_v60 = vld [vmem:[#allocation3 + $0x138] sm:$0xff] }
 0x2c2   : > { %v2881_v57 = vpop.permute.xlu0 %2880 }
 0x2c3   : > { %v2949_v48 = vld [vmem:[#allocation3 + $0x128] sm:$0xff] }
 0x2c4   : > { %3280 = vmatprep.mubr.bf16.mxu1 %v2949_v48  ;;  %v2947_v48 = vld [vmem:[#allocation3 + $0x118] sm:$0xff] }
 0x2c5   : > { %3281 = vmatmul.mubr.bf16.gmra.mrb[48].mxu1 %v2948_v30  ;;  %v2950_v30 = vld [vmem:[#allocation3 + $0x130] sm:$0xff] }
 0x2c7   : > { %v2771_v43 = vpop.permute.xlu1 %2770 }
 0x2c8   : > { %v2846_v7 = vpop.permute.xlu0 %2845  ;;  %2788 = vst.msk [vmem:[#allocation3 + $0x150] sm:$0xff] %vm2363_vm13, %v2771_v43 }
 0x2c9   : > { %2864 = vst.msk [vmem:[#allocation3 + $0x140] sm:$0xff] %vm2321_vm12, %v2846_v7 }
 0x2ca   : > { %2894 = vst.msk [vmem:[#allocation3 + $0x140] sm:$0xff] %vm2363_vm13, %v2879_v33  ;;  %v2941_v33 = vld [vmem:[#allocation3 + $0xe8] sm:$0xff] }
 0x2cb   : > { %v2640_v32 = vpop.permute.xlu1 %2639 }
 0x2cc   : > { %v2815_v12 = vpop.permute.xlu0 %2814  ;;  %2655 = vst.msk [vmem:[#allocation3 + $0x168] sm:$0xff] %vm2225_vm11, %v2640_v32 }
 0x2cd   : > { %2832 = vst.msk [vmem:[#allocation3 + $0x158] sm:$0xff] %vm2225_vm11, %v2815_v12 }
 0x2cf   : > { %v2732_v22 = vpop.permute.xlu1 %2731  ;;  %v2954_v35 = vld [vmem:[#allocation3 + $0x150] sm:$0xff] }
 0x2d0   : > { %v2848_v45 = vpop.permute.xlu0 %2847  ;;  %2748 = vst.msk [vmem:[#allocation3 + $0x168] sm:$0xff] %vm2321_vm12, %v2732_v22  ;;  %v2953_v22 = vld [vmem:[#allocation3 + $0x148] sm:$0xff] }
 0x2d1   : > { %2865 = vst.msk [vmem:[#allocation3 + $0x158] sm:$0xff] %vm2321_vm12, %v2848_v45  ;;  %v2952_v19 = vld [vmem:[#allocation3 + $0x140] sm:$0xff] }
 0x2d2   : > { %2895 = vst.msk [vmem:[#allocation3 + $0x158] sm:$0xff] %vm2363_vm13, %v2881_v57  ;;  %3288 = vmatprep.mubr.bf16.mxu1 %v2952_v19  ;;  %v2956_v19 = vld [vmem:[#allocation3 + $0x160] sm:$0xff] }
 0x2d3   : > { %3289 = vmatmul.mubr.bf16.gmra.mrb[52].mxu1 %v2951_v60 }
 0x2d4   : > { %v2817_v39 = vpop.permute.xlu0 %2816 }
 0x2d5   : > { %2833 = vst.msk [vmem:[#allocation3 + $0x170] sm:$0xff] %vm2225_vm11, %v2817_v39  ;;  %v2959_v39 = vld [vmem:[#allocation3 + $0x178] sm:$0xff] }
 0x2d8   : > { %v2850_v31 = vpop.permute.xlu0 %2849 }
 0x2d9   : > { %2866 = vst.msk [vmem:[#allocation3 + $0x170] sm:$0xff] %vm2321_vm12, %v2850_v31  ;;  %v2955_v55 = vld [vmem:[#allocation3 + $0x158] sm:$0xff] }
 0x2da   : > { %2896 = vst.msk [vmem:[#allocation3 + $0x170] sm:$0xff] %vm2363_vm13, %v6325_v34  ;;  %3296 = vmatprep.mubr.bf16.mxu1 %v2955_v55 }
 0x2db   : > { %3297 = vmatmul.mubr.bf16.gmra.mrb[56].mxu1 %v2954_v35 }
 0x2dc   : > { %v2773_v59 = vpop.permute.xlu0 %2772 }
 0x2dd   : > { %2789 = vst.msk [vmem:[#allocation3 + $0x168] sm:$0xff] %vm2363_vm13, %v2773_v59 }
 0x2e1   : > { %v2958_v47 = vld [vmem:[#allocation3 + $0x170] sm:$0xff] }
 0x2e2   : > { %3304 = vmatprep.mubr.bf16.mxu1 %v2958_v47 }
 0x2e4   : > { %v2957_v11 = vld [vmem:[#allocation3 + $0x168] sm:$0xff] }
 0x2e5   : > { %3305 = vmatmul.mubr.bf16.gmra.mrb[60].mxu1 %v2957_v11 }
 0x2e6   : > { %4972 = vmatprep.mubr.msk.bf16.mxu1 %vm2184_vm10, %v2914_v40 }
 0x2ed   : > { %4973 = vmatmul.mubr.msk.bf16.vlgmr.msra.gmra.mrb[64].mxu1 %vm2184_vm10, %v2917_v14 }
 0x2ee   : > { %4976 = vmatprep.mubr.msk.bf16.mxu1 %vm2184_vm10, %v2920_v61 }
 0x2f0   : > { %v4823_v34 = vpop.f32.mrb[0].mxu1 }
 0x2f1   : > { %v4824_v51 = vpop.f32.mrb[1].mxu1 }
 0x2f2   : > { %v6619_v38 = vadd.f32 %v4824_v51, %v4823_v34  ;;  %v4826_v6 = vpop.f32.mrb[2].mxu1 }
 0x2f3   : > { %v4827_v13 = vpop.f32.mrb[3].mxu1 }
 0x2f4   : > { %v6621_v27 = vadd.f32 %v4827_v13, %v4826_v6 }
 0x2f5   : > { %4977 = vmatmul.mubr.msk.bf16.gmra.mrb[68].mxu1 %vm2184_vm10, %v2923_v53 }
 0x2f6   : > { %4980 = vmatprep.mubr.msk.bf16.mxu1 %vm2184_vm10, %v2926_v0 }
 0x2fd   : > { %4981 = vmatmul.mubr.msk.bf16.gmra.mrb[72].mxu1 %vm2184_vm10, %v2929_v52 }
 0x2fe   : > { %v4829_v16 = vpop.f32.mrb[4].mxu1  ;;  %4984 = vmatprep.mubr.msk.bf16.mxu1 %vm2184_vm10, %v2932_v36 }
 0x2ff   : > { %v4830_v23 = vpop.f32.mrb[5].mxu1 }
 0x300   : > { %v6627_v49 = vadd.f32 %v4830_v23, %v4829_v16  ;;  %v4832_v15 = vpop.f32.mrb[6].mxu1 }
 0x301   : > { %v4833_v3 = vpop.f32.mrb[7].mxu1 }
 0x302   : > { %v6629_v37 = vadd.f32 %v4833_v3, %v4832_v15 }
 0x305   : > { %4985 = vmatmul.mubr.msk.bf16.gmra.mrb[76].mxu1 %vm2184_vm10, %v2935_v1 }
 0x306   : > { %4988 = vmatprep.mubr.msk.bf16.mxu1 %vm2184_vm10, %v2938_v2 }
 0x30c   : > { %v4835_v46 = vpop.f32.mrb[8].mxu1 }
 0x30d   : > { %4989 = vmatmul.mubr.msk.bf16.gmra.mrb[80].mxu1 %vm2184_vm10, %v2941_v33  ;;  %v4836_v5 = vpop.f32.mrb[9].mxu1  ;;  %v4013_v33 = vld [vmem:[%s7309_s11] sm:$0xff] }
 0x30e   : > { %v6634_v24 = vadd.f32 %v4836_v5, %v4835_v46  ;;  %4992 = vmatprep.mubr.msk.bf16.mxu1 %vm2184_vm10, %v2944_v8  ;;  %v4838_v56 = vpop.f32.mrb[10].mxu1  ;;  %v4014_v5 = vld [vmem:[%s7309_s11 + $0x8] sm:$0xff] }
 0x30f   : > { %v4839_v62 = vpop.f32.mrb[11].mxu1  ;;  %v6670_v8 = vpack.c.bf16 %v4014_v5, %v4013_v33 }
 0x310   : > { %v6637_v57 = vadd.f32 %v4839_v62, %v4838_v56 }
 0x311   : > { %5072 = vmatpush3.bf16.msra.mxu1 %v6670_v8 }
 0x312   : > { %5073 = vmatprep.subr.bf16.mxu1 %v7314_v29 }
 0x315   : > { %4993 = vmatmul.mubr.msk.bf16.gmra.mrb[84].mxu1 %vm2184_vm10, %v2947_v48 }
 0x316   : > { %4996 = vmatprep.mubr.msk.bf16.mxu1 %vm2184_vm10, %v2950_v30 }
 0x31a   : > { %v4841_v43 = vpop.f32.mrb[12].mxu1 }
 0x31b   : > { %v4842_v7 = vpop.f32.mrb[13].mxu1 }
 0x31c   : > { %v6641_v32 = vadd.f32 %v4842_v7, %v4841_v43  ;;  %v4844_v12 = vpop.f32.mrb[14].mxu1 }
 0x31d   : > { %v4845_v45 = vpop.f32.mrb[15].mxu1  ;;  %4997 = vmatmul.mubr.msk.bf16.gmra.mrb[88].mxu1 %vm2184_vm10, %v2953_v22 }
 0x31e   : > { %v6644_v60 = vadd.f32 %v4845_v45, %v4844_v12  ;;  %5000 = vmatprep.mubr.msk.bf16.mxu1 %vm2184_vm10, %v2956_v19 }
 0x325   : > { %5001 = vmatmul.mubr.msk.bf16.gmra.mrb[92].mxu1 %vm2184_vm10, %v2959_v39 }
 0x326   : > { %5046 = vmatprep.mubr.msk.f32.mxu1 %vm5203_vm14, %v7315_v9 }
 0x328   : > { %v4847_v31 = vpop.f32.mrb[16].mxu1 }
 0x329   : > { %v4848_v55 = vpop.f32.mrb[17].mxu1 }
 0x32a   : > { %v6648_v35 = vadd.f32 %v4848_v55, %v4847_v31  ;;  %v4850_v59 = vpop.f32.mrb[18].mxu1  ;;  %v4015_v55 = vld [vmem:[%s7309_s11 + $0x10] sm:$0xff] }
 0x32b   : > { %v4851_v47 = vpop.f32.mrb[19].mxu1 }
 0x32c   : > { %v6650_v11 = vadd.f32 %v4851_v47, %v4850_v59  ;;  %v4016_v59 = vld [vmem:[%s7309_s11 + $0x18] sm:$0xff] }
 0x32d   : > { %v6688_v47 = vpack.c.bf16 %v4016_v59, %v4015_v55  ;;  %v4092_v55 = vld [vmem:[%s7311_s13] sm:$0x3]  ;;  %v5162_v59 = vld [vmem:[%s5308_s28 + $0x28] sm:$0xff]  }
 0x32f   : > { %7340 = vst [vmem:[#allocation4_spill] sm:$0xff] %v6688_v47  ;;  %5075 = vmatpush3.bf16.msra.mxu1 %v6688_v47  ;;  %v5173_v47 = vld [vmem:[%s5308_s28 + $0xa0] sm:$0xff]  }
 0x330   : > { %5076 = vmatprep.subr.bf16.mxu1 %v7314_v29 }
 0x337   : > { %v4853_v40 = vpop.f32.mrb[20].mxu1 }
 0x338   : > { %v4854_v14 = vpop.f32.mrb[21].mxu1 }
 0x339   : > { %v6652_v61 = vadd.f32 %v4854_v14, %v4853_v40  ;;  %v4856_v34 = vpop.f32.mrb[22].mxu1 }
 0x33a   : > { %v4857_v51 = vpop.f32.mrb[23].mxu1 }
 0x33b   : > { %v6654_v6 = vadd.f32 %v4857_v51, %v4856_v34 }
 0x33f   : > { %v4859_v13 = vpop.f32.mrb[24].mxu1 }
 0x340   : > { %v4860_v53 = vpop.f32.mrb[25].mxu1 }
 0x341   : > { %v6656_v0 = vadd.f32 %v4860_v53, %v4859_v13  ;;  %v4862_v52 = vpop.f32.mrb[26].mxu1 }
 0x342   : > { %v4863_v36 = vpop.f32.mrb[27].mxu1 }
 0x343   : > { %v6658_v16 = vadd.f32 %v4863_v36, %v4862_v52 }
 0x347   : > { %v4865_v23 = vpop.f32.mrb[28].mxu1 }
 0x348   : > { %v4866_v15 = vpop.f32.mrb[29].mxu1 }
 0x349   : > { %v6660_v3 = vadd.f32 %v4866_v15, %v4865_v23  ;;  %v4868_v1 = vpop.f32.mrb[30].mxu1 }
 0x34a   : > { %v4869_v2 = vpop.f32.mrb[31].mxu1 }
 0x34b   : > { %v6662_v46 = vadd.f32 %v4869_v2, %v4868_v1 }
 0x35f   : > { %v4871_v56 = vpop.f32.mrb[32].mxu1 }
 0x360   : > { %v4872_v62 = vpop.f32.mrb[33].mxu1 }
 0x361   : > { %v6674_v48 = vadd.f32 %v4872_v62, %v4871_v56  ;;  %v4874_v30 = vpop.f32.mrb[34].mxu1  ;;  %v5158_v56 = vld [vmem:[%s7302_s4] sm:$0xff]   ;;  %v5159_v62 = vld [vmem:[%s5308_s28 + $0x10] sm:$0xff]  }
 0x362   : > { %v4875_v43 = vpop.f32.mrb[35].mxu1  ;;  %5004 = vmatprep.subr.bf16.mxu0 %v5158_v56  ;;  %5006 = vmatprep.mubr.msk.bf16.mxu0 %vm675_vm2, %v5159_v62 }
 0x363   : > { %v6676_v7 = vadd.f32 %v4875_v43, %v4874_v30  ;;  %5005 = vmatpush3.bf16.msra.mxu0 %v5158_v56 }
 0x364   : > { %5049 = vmatprep.subr.mxu0 %v7315_v9 }
 0x36e   : > { %v4877_v12 = vpop.f32.mrb[36].mxu1 }
 0x36f   : > { %v4878_v22 = vpop.f32.mrb[37].mxu1 }
 0x370   : > { %v6678_v45 = vadd.f32 %v4878_v22, %v4877_v12  ;;  %v4880_v19 = vpop.f32.mrb[38].mxu1  ;;  %v5160_v22 = vld [vmem:[%s5308_s28 + $0x18] sm:$0xff]  }
 0x371   : > { %v4881_v39 = vpop.f32.mrb[39].mxu1  ;;  %5007 = vmatmul.mubr.msk.bf16.vlgmr.msra.gmra.mrb[64].mxu0 %vm675_vm2, %v5160_v22 }
 0x372   : > { %v6680_v31 = vadd.f32 %v4881_v39, %v4880_v19  ;;  %v5161_v39 = vld [vmem:[%s5308_s28 + $0x20] sm:$0xff]   ;;  %5050 = vmatpush3.msk.msra.mxu0 %vm4098_vm15, %v4092_v55  ;;  %v5167_v55 = vld [vmem:[%s5308_s28 + $0x70] sm:$0xff]  }
 0x373   : > { %5010 = vmatprep.mubr.msk.bf16.mxu0 %vm675_vm2, %v5161_v39  ;;  %5065 = vmatprep.subr.mxu0 %v7315_v9  ;;  %v5166_v39 = vld [vmem:[%s5308_s28 + $0x48] sm:$0xff]  }
 0x379   : > { %5011 = vmatmul.mubr.msk.bf16.gmra.mrb[68].mxu0 %vm675_vm2, %v5162_v59 }
 0x37b   : > { %v4883_v40 = vpop.f32.mrb[40].mxu1 }
 0x37c   : > { %v4884_v14 = vpop.f32.mrb[41].mxu1 }
 0x37d   : > { %v6694_v34 = vadd.f32 %v4884_v14, %v4883_v40  ;;  %v4886_v51 = vpop.f32.mrb[42].mxu1  ;;  %v5163_v40 = vld [vmem:[%s5308_s28 + $0x30] sm:$0xff]  }
 0x37e   : > { %v4887_v13 = vpop.f32.mrb[43].mxu1  ;;  %5014 = vmatprep.mubr.msk.bf16.mxu0 %vm675_vm2, %v5163_v40 }
 0x37f   : > { %v6696_v53 = vadd.f32 %v4887_v13, %v4886_v51 }
 0x38a   : > { %v4889_v52 = vpop.f32.mrb[44].mxu1 }
 0x38b   : > { %v4890_v36 = vpop.f32.mrb[45].mxu1 }
 0x38c   : > { %v6698_v23 = vadd.f32 %v4890_v36, %v4889_v52  ;;  %v4892_v15 = vpop.f32.mrb[46].mxu1 }
 0x38d   : > { %v4893_v1 = vpop.f32.mrb[47].mxu1 }
 0x38e   : > { %v6700_v2 = vadd.f32 %v4893_v1, %v4892_v15  ;;  %v5164_v1 = vld [vmem:[%s5308_s28 + $0x38] sm:$0xff]  }
 0x38f   : > { %5015 = vmatmul.mubr.msk.bf16.gmra.mrb[72].mxu0 %vm675_vm2, %v5164_v1 }
 0x398   : > { %v4895_v33 = vpop.f32.mrb[48].mxu1 }
 0x399   : > { %v4896_v5 = vpop.f32.mrb[49].mxu1 }
 0x39a   : > { %v6706_v30 = vadd.f32 %v4896_v5, %v4895_v33  ;;  %v4898_v43 = vpop.f32.mrb[50].mxu1  ;;  %v5165_v33 = vld [vmem:[%s5308_s28 + $0x40] sm:$0xff]  }
 0x39b   : > { %v4899_v12 = vpop.f32.mrb[51].mxu1  ;;  %5018 = vmatprep.mubr.msk.bf16.mxu0 %vm675_vm2, %v5165_v33  ;;  %v5169_v33 = vld [vmem:[%s5308_s28 + $0x80] sm:$0xff]  }
 0x39c   : > { %v6710_v19 = vadd.f32 %v4899_v12, %v4898_v43  ;;  %5019 = vmatmul.mubr.msk.bf16.gmra.mrb[76].mxu0 %vm675_vm2, %v5166_v39 }
 0x39d   : > { %5022 = vmatprep.mubr.msk.bf16.mxu0 %vm675_vm2, %v5167_v55 }
 0x3a6   : > { %v4901_v14 = vpop.f32.mrb[52].mxu1 }
 0x3a7   : > { %v4902_v51 = vpop.f32.mrb[53].mxu1 }
 0x3a8   : > { %v6724_v13 = vadd.f32 %v4902_v51, %v4901_v14  ;;  %v4904_v52 = vpop.f32.mrb[54].mxu1 }
 0x3a9   : > { %v4905_v36 = vpop.f32.mrb[55].mxu1 }
 0x3aa   : > { %v6727_v15 = vadd.f32 %v4905_v36, %v4904_v52  ;;  %v5168_v36 = vld [vmem:[%s5308_s28 + $0x78] sm:$0xff]  }
 0x3ab   : > { %5023 = vmatmul.mubr.msk.bf16.gmra.mrb[80].mxu0 %vm675_vm2, %v5168_v36  ;;  %v5170_v36 = vld [vmem:[%s5308_s28 + $0x88] sm:$0xff]  }
 0x3ac   : > { %5026 = vmatprep.mubr.msk.bf16.mxu0 %vm675_vm2, %v5169_v33 }
 0x3ae   : > { %v4907_v5 = vpop.f32.mrb[56].mxu1 }
 0x3af   : > { %v4908_v56 = vpop.f32.mrb[57].mxu1 }
 0x3b0   : > { %v6732_v62 = vadd.f32 %v4908_v56, %v4907_v5  ;;  %v4910_v43 = vpop.f32.mrb[58].mxu1  ;;  %v6751_v56 = vld [vmem:[%s7305_s7] ss:$0 sm:$0xff] }
 0x3b1   : > { %v4911_v12 = vpop.f32.mrb[59].mxu1 }
 0x3b2   : > { %v6735_v22 = vadd.f32 %v4911_v12, %v4910_v43 }
 0x3b3   : > { %5027 = vmatmul.mubr.msk.bf16.gmra.mrb[84].mxu0 %vm675_vm2, %v5170_v36 }
 0x3b8   : > { %v4913_v59 = vpop.f32.mrb[60].mxu1 }
 0x3b9   : > { %v4914_v40 = vpop.f32.mrb[61].mxu1 }
 0x3ba   : > { %v6741_v14 = vadd.f32 %v4914_v40, %v4913_v59  ;;  %v4916_v51 = vpop.f32.mrb[62].mxu1  ;;  %v6760_v40 = vld [vmem:[%s7306_s8] ss:$0 sm:$0xff] }
 0x3bb   : > { %v4917_v52 = vpop.f32.mrb[63].mxu1 }
 0x3bc   : > { %v6744_v1 = vadd.f32 %v4917_v52, %v4916_v51 }
 0x3c0   : > { %v4974_v5 = vpop.f32.mrb[64].mxu1 }
 0x3c1   : > { %v3356_v43 = vadd.f32 %v4974_v5, %v6627_v49  ;;  %v3347_v12 = vpop.f32.mrb[65].mxu1  ;;  %v5171_v49 = vld [vmem:[%s5308_s28 + $0x90] sm:$0xff]  }
 0x3c2   : > { %v3348_v39 = vadd.f32 %v6619_v38, %v3347_v12  ;;  %v4975_v55 = vpop.f32.mrb[66].mxu1  ;;  %5030 = vmatprep.mubr.msk.bf16.mxu0 %vm675_vm2, %v5171_v49 }
 0x3c3   : > { %v3483_v59 = vmul.f32 %v6751_v56, %v3356_v43  ;;  %v3359_v51 = vadd.f32 %v4975_v55, %v6629_v37  ;;  %v3350_v52 = vpop.f32.mrb[67].mxu1 }
 0x3c4   : > { %v3481_v29 = vmul.f32 %v6751_v56, %v3348_v39  ;;  %v3351_v33 = vadd.f32 %v6621_v27, %v3350_v52 }
 0x3c5   : > { %v3484_v5 = vmul.f32 %v6751_v56, %v3359_v51  ;;  %v6769_v38 = vadd.f32 %v6760_v40, %v3483_v59 }
 0x3c6   : > { %v6772_v43 = vadd.f32 %v6760_v40, %v3481_v29  ;;  %v3482_v12 = vmul.f32 %v6751_v56, %v3351_v33 }
 0x3c7   : > { %7341 = vst [vmem:[#allocation5_spill] sm:$0xff] %v6769_v38  ;;  %v6776_v9 = vadd.f32 %v6760_v40, %v3484_v5  ;;  %v3961_v59 = vmul.f32 %v6769_v38, %v6100_v58 }
 0x3c8   : > { %7342 = vst [vmem:[#allocation6_spill] sm:$0xff] %v6772_v43  ;;  %v3959_v27 = vmul.f32 %v6772_v43, %v6063_v4  ;;  %v6782_v37 = vadd.f32 %v6760_v40, %v3482_v12  ;;  %v4978_v39 = vpop.f32.mrb[68].mxu1  ;;  %v5172_v43 = vld [vmem:[%s5308_s28 + $0x98] sm:$0xff]  }
 0x3c9   : > { %7343 = vst [vmem:[#allocation7_spill] sm:$0xff] %v6776_v9  ;;  %v3372_v29 = vadd.f32 %v4978_v39, %v6641_v32  ;;  %v3363_v55 = vpop.f32.mrb[69].mxu1  ;;  %v3962_v33 = vmul.f32 %v6776_v9, %v6070_v42  ;;  %v3978_v9 = vsel %vm2184_vm10, %v3961_v59, 0.0  ;;  %5031 = vmatmul.mubr.msk.bf16.gmra.mrb[88].mxu0 %vm675_vm2, %v5172_v43 }
 0x3ca   : > { %7344 = vst [vmem:[#allocation8_spill] sm:$0xff] %v6782_v37  ;;  %v3960_v51 = vmul.f32 %v6782_v37, %v6068_v25  ;;  %v3364_v52 = vadd.f32 %v6634_v24, %v3363_v55  ;;  %v4979_v36 = vpop.f32.mrb[70].mxu1  ;;  %v3975_v32 = vsel %vm2184_vm10, %v3959_v27, 0.0  ;;  %5034 = vmatprep.mubr.msk.bf16.mxu0 %vm675_vm2, %v5173_v47 }
 0x3cb   : > { %v3487_v5 = vmul.f32 %v6751_v56, %v3372_v29  ;;  %v3375_v49 = vadd.f32 %v4979_v36, %v6644_v60  ;;  %v3366_v12 = vpop.f32.mrb[71].mxu1 }
 0x3cc   : > { %v3976_v39 = vsel %vm2184_vm10, %v3960_v51, 0.0  ;;  %v3485_v38 = vmul.f32 %v6751_v56, %v3364_v52  ;;  %v3367_v37 = vadd.f32 %v6637_v57, %v3366_v12  ;;  %v3980_v51 = vsel %vm2184_vm10, %v3962_v33, 0.0 }
 0x3cd   : > { %v3977_v24 = vadd.f32 %v3976_v39, %v3975_v32  ;;  %v3488_v55 = vmul.f32 %v6751_v56, %v3375_v49  ;;  %v6804_v29 = vadd.f32 %v6760_v40, %v3487_v5 }
 0x3ce   : > { %v6807_v60 = vadd.f32 %v6760_v40, %v3485_v38  ;;  %v3486_v27 = vmul.f32 %v6751_v56, %v3367_v37 }
 0x3cf   : > { %v3979_v36 = vadd.f32 %v3978_v9, %v3977_v24  ;;  %v6815_v52 = vadd.f32 %v6760_v40, %v3488_v55  ;;  %v3965_v43 = vmul.f32 %v6804_v29, %v6196_v54 }
 0x3d0   : > { %v3963_v57 = vmul.f32 %v6807_v60, %v6154_v26  ;;  %v6818_v59 = vadd.f32 %v6760_v40, %v3486_v27  ;;  %v4982_v5 = vpop.f32.mrb[72].mxu1  ;;  %v5174_v27 = vld [vmem:[%s5308_s28 + $0xa8] sm:$0xff]  }
 0x3d1   : > { %v3981_v38 = vadd.f32 %v3980_v51, %v3979_v36  ;;  %v3388_v9 = vadd.f32 %v4982_v5, %v6652_v61  ;;  %v3379_v37 = vpop.f32.mrb[73].mxu1  ;;  %v3966_v61 = vmul.f32 %v6815_v52, %v6098_v50  ;;  %5035 = vmatmul.mubr.msk.bf16.gmra.mrb[92].mxu0 %vm675_vm2, %v5174_v27 }
 0x3d2   : > { %v3982_v33 = vsel %vm2184_vm10, %v3963_v57, 0.0  ;;  %v3964_v49 = vmul.f32 %v6818_v59, %v6083_v21  ;;  %v3380_v12 = vadd.f32 %v6648_v35, %v3379_v37  ;;  %v4983_v32 = vpop.f32.mrb[74].mxu1 }
 0x3d3   : > { %v3983_v39 = vadd.f32 %v3982_v33, %v3981_v38  ;;  %v3491_v24 = vmul.f32 %v6751_v56, %v3388_v9  ;;  %v3391_v47 = vadd.f32 %v4983_v32, %v6654_v6  ;;  %v3382_v55 = vpop.f32.mrb[75].mxu1  ;;  %v3986_v38 = vsel %vm2184_vm10, %v3965_v43, 0.0 }
 0x3d4   : > { %v3984_v36 = vsel %vm2184_vm10, %v3964_v49, 0.0  ;;  %v3489_v51 = vmul.f32 %v6751_v56, %v3380_v12  ;;  %v3383_v57 = vadd.f32 %v6650_v11, %v3382_v55  ;;  %v3988_v49 = vsel %vm2184_vm10, %v3966_v61, 0.0 }
 0x3d5   : > { %v3985_v5 = vadd.f32 %v3984_v36, %v3983_v39  ;;  %v3492_v35 = vmul.f32 %v6751_v56, %v3391_v47  ;;  %v6839_v9 = vadd.f32 %v6760_v40, %v3491_v24  ;;  %v7346_v39 = vmov 0.0  }
 0x3d6   : > { %v6842_v6 = vadd.f32 %v6760_v40, %v3489_v51  ;;  %v3490_v37 = vmul.f32 %v6751_v56, %v3383_v57  ;;  %5051 = vmatprep.mubr.msk.f32.mxu0 %vm5203_vm14, %v7346_v39 }
 0x3d7   : > { %7345 = vst [vmem:[#allocation9_spill] sm:$0xff] %v6839_v9  ;;  %v3987_v33 = vadd.f32 %v3986_v38, %v3985_v5  ;;  %v6850_v12 = vadd.f32 %v6760_v40, %v3492_v35  ;;  %v3969_v27 = vmul.f32 %v6839_v9, %v6234_v41 }
 0x3d8   : > { %v3967_v11 = vmul.f32 %v6842_v6, %v6215_v28  ;;  %v6853_v43 = vadd.f32 %v6760_v40, %v3490_v37  ;;  %v4986_v32 = vpop.f32.mrb[76].mxu1 }
 0x3d9   : > { %v3989_v24 = vadd.f32 %v3988_v49, %v3987_v33  ;;  %v3404_v47 = vadd.f32 %v4986_v32, %v6660_v3  ;;  %v3395_v55 = vpop.f32.mrb[77].mxu1  ;;  %v3970_v3 = vmul.f32 %v6850_v12, %v6127_v17 }
 0x3da   : > { %v3990_v61 = vsel %vm2184_vm10, %v3967_v11, 0.0  ;;  %v3968_v36 = vmul.f32 %v6853_v43, %v6115_v20  ;;  %v3396_v51 = vadd.f32 %v6656_v0, %v3395_v55  ;;  %v4987_v57 = vpop.f32.mrb[78].mxu1  ;;  %v3994_v0 = vsel %vm2184_vm10, %v3969_v27, 0.0 }
 0x3db   : > { %v3991_v5 = vadd.f32 %v3990_v61, %v3989_v24  ;;  %v3495_v35 = vmul.f32 %v6751_v56, %v3404_v47  ;;  %v3407_v38 = vadd.f32 %v4987_v57, %v6662_v46  ;;  %v3398_v37 = vpop.f32.mrb[79].mxu1  ;;  %v3996_v61 = vsel %vm2184_vm10, %v3970_v3, 0.0 }
 0x3dc   : > { %v3992_v33 = vsel %vm2184_vm10, %v3968_v36, 0.0  ;;  %v3493_v49 = vmul.f32 %v6751_v56, %v3396_v51  ;;  %v3399_v11 = vadd.f32 %v6658_v16, %v3398_v37 }
 0x3dd   : > { %v3993_v32 = vadd.f32 %v3992_v33, %v3991_v5  ;;  %v3496_v9 = vmul.f32 %v6751_v56, %v3407_v38  ;;  %v6874_v24 = vadd.f32 %v6760_v40, %v3495_v35 }
 0x3de   : > { %v6877_v46 = vadd.f32 %v6760_v40, %v3493_v49  ;;  %v3494_v47 = vmul.f32 %v6751_v56, %v3399_v11 }
 0x3df   : > { %v3995_v55 = vadd.f32 %v3994_v0, %v3993_v32  ;;  %v6884_v16 = vadd.f32 %v6760_v40, %v3496_v9  ;;  %v3973_v38 = vmul.f32 %v6874_v24, %v6272_v63 }
 0x3e0   : > { %v3971_v36 = vmul.f32 %v6877_v46, %v6253_v18  ;;  %v6887_v51 = vadd.f32 %v6760_v40, %v3494_v47  ;;  %v4990_v27 = vpop.f32.mrb[80].mxu1 }
 0x3e1   : > { %v3997_v57 = vadd.f32 %v3996_v61, %v3995_v55  ;;  %v3420_v5 = vadd.f32 %v4990_v27, %v6678_v45  ;;  %v3411_v35 = vpop.f32.mrb[81].mxu1  ;;  %v3974_v45 = vmul.f32 %v6884_v16, %v6161_v10 }
 0x3e2   : > { %v3998_v37 = vsel %vm2184_vm10, %v3971_v36, 0.0  ;;  %v3972_v3 = vmul.f32 %v6887_v51, %v6143_v44  ;;  %v3412_v33 = vadd.f32 %v6674_v48, %v3411_v35  ;;  %v4991_v9 = vpop.f32.mrb[82].mxu1  ;;  %v4002_v48 = vsel %vm2184_vm10, %v3973_v38, 0.0 }
 0x3e3   : > { %v3999_v49 = vadd.f32 %v3998_v37, %v3997_v57  ;;  %v3499_v11 = vmul.f32 %v6751_v56, %v3420_v5  ;;  %v3423_v32 = vadd.f32 %v4991_v9, %v6680_v31  ;;  %v3414_v0 = vpop.f32.mrb[83].mxu1 }
 0x3e4   : > { %v4000_v47 = vsel %vm2184_vm10, %v3972_v3, 0.0  ;;  %v3497_v55 = vmul.f32 %v6751_v56, %v3412_v33  ;;  %v3415_v61 = vadd.f32 %v6676_v7, %v3414_v0  ;;  %v4004_v3 = vsel %vm2184_vm10, %v3974_v45, 0.0 }
 0x3e5   : > { %v4001_v36 = vadd.f32 %v4000_v47, %v3999_v49  ;;  %v3500_v27 = vmul.f32 %v6751_v56, %v3423_v32  ;;  %v6906_v57 = vadd.f32 %v6760_v40, %v3499_v11 }
 0x3e6   : > { %v6909_v31 = vadd.f32 %v6760_v40, %v3497_v55  ;;  %v3498_v5 = vmul.f32 %v6751_v56, %v3415_v61 }
 0x3e7   : > { %7347 = vst [vmem:[#allocation10_spill] sm:$0xff] %v6906_v57  ;;  %v4003_v35 = vadd.f32 %v4002_v48, %v4001_v36  ;;  %v6913_v37 = vadd.f32 %v6760_v40, %v3500_v27  ;;  %v4248_v32 = vmul.f32 %v6906_v57, %v6100_v58 }
 0x3e8   : > { %7348 = vst [vmem:[#allocation11_spill] sm:$0xff] %v6909_v31  ;;  %v4246_v7 = vmul.f32 %v6909_v31, %v6063_v4  ;;  %v6919_v33 = vadd.f32 %v6760_v40, %v3498_v5  ;;  %v4994_v38 = vpop.f32.mrb[84].mxu1 }
 0x3e9   : > { %7349 = vst [vmem:[#allocation12_spill] sm:$0xff] %v6913_v37  ;;  %v4005_v9 = vadd.f32 %v4004_v3, %v4003_v35  ;;  %v3436_v49 = vadd.f32 %v4994_v38, %v6698_v23  ;;  %v3427_v11 = vpop.f32.mrb[85].mxu1  ;;  %v4249_v4 = vmul.f32 %v6913_v37, %v6070_v42  ;;  %v4265_v3 = vsel %vm2184_vm10, %v4248_v32, 0.0 }
 0x3ea   : > { %7350 = vst [vmem:[#allocation13_spill] sm:$0xff] %v6919_v33  ;;  %v4247_v0 = vmul.f32 %v6919_v33, %v6068_v25  ;;  %v3428_v47 = vadd.f32 %v6694_v34, %v3427_v11  ;;  %v4995_v45 = vpop.f32.mrb[86].mxu1  ;;  %v4262_v23 = vsel %vm2184_vm10, %v4246_v7, 0.0 }
 0x3eb   : > { %v4006_v55 = vrot.slane %v4005_v9, 4  ;;  %v3503_v61 = vmul.f32 %v6751_v56, %v3436_v49  ;;  %v3439_v36 = vadd.f32 %v4995_v45, %v6700_v2  ;;  %v3430_v27 = vpop.f32.mrb[87].mxu1 }
 0x3ec   : > { %v4263_v48 = vsel %vm2184_vm10, %v4247_v0, 0.0  ;;  %v3501_v58 = vmul.f32 %v6751_v56, %v3428_v47  ;;  %v3431_v25 = vadd.f32 %v6696_v53, %v3430_v27  ;;  %v4267_v53 = vsel %vm2184_vm10, %v4249_v4, 0.0 }
 0x3ed   : > { %v4007_v5 = vadd.f32 %v4006_v55, %v4005_v9  ;;  %v4264_v34 = vadd.f32 %v4263_v48, %v4262_v23  ;;  %v6936_v35 = vadd.f32 %v6760_v40, %v3503_v61  ;;  %v3504_v42 = vmul.f32 %v6751_v56, %v3439_v36 }
 0x3ee   : > { %v6941_v2 = vadd.f32 %v6760_v40, %v3501_v58  ;;  %v3502_v7 = vmul.f32 %v6751_v56, %v3431_v25 }
 0x3ef   : > { %7351 = vst [vmem:[#allocation14_spill] sm:$0xff] %v6936_v35  ;;  %v4008_v38 = vrot.slane %v4007_v5, 2  ;;  %v4266_v49 = vadd.f32 %v4265_v3, %v4264_v34  ;;  %v6945_v11 = vadd.f32 %v6760_v40, %v3504_v42  ;;  %v4252_v45 = vmul.f32 %v6936_v35, %v6196_v54 }
 0x3f0   : > { %7352 = vst [vmem:[#allocation15_spill] sm:$0xff] %v6941_v2  ;;  %v4250_v9 = vmul.f32 %v6941_v2, %v6154_v26  ;;  %v6951_v0 = vadd.f32 %v6760_v40, %v3502_v7  ;;  %v4998_v47 = vpop.f32.mrb[88].mxu1 }
 0x3f1   : > { %7353 = vst [vmem:[#allocation16_spill] sm:$0xff] %v6945_v11  ;;  %v4009_v32 = vadd.f32 %v4008_v38, %v4007_v5  ;;  %v4268_v55 = vadd.f32 %v4267_v53, %v4266_v49  ;;  %v3443_v61 = vpop.f32.mrb[89].mxu1  ;;  %v3452_v4 = vadd.f32 %v4998_v47, %v6724_v13  ;;  %v4253_v25 = vmul.f32 %v6945_v11, %v6098_v50 }
 0x3f2   : > { %7354 = vst [vmem:[#allocation17_spill] sm:$0xff] %v6951_v0  ;;  %v4269_v36 = vsel %vm2184_vm10, %v4250_v9, 0.0  ;;  %v4251_v27 = vmul.f32 %v6951_v0, %v6083_v21  ;;  %v3444_v23 = vadd.f32 %v6706_v30, %v3443_v61  ;;  %v4999_v26 = vpop.f32.mrb[90].mxu1  ;;  %v4273_v38 = vsel %vm2184_vm10, %v4252_v45, 0.0 }
 0x3f3   : > { %v4010_v48 = vrot.slane %v4009_v32, 1  ;;  %v4270_v58 = vadd.f32 %v4269_v36, %v4268_v55  ;;  %v3455_v5 = vadd.f32 %v4999_v26, %v6727_v15  ;;  %v3446_v54 = vpop.f32.mrb[91].mxu1  ;;  %v3507_v42 = vmul.f32 %v6751_v56, %v3452_v4 }
 0x3f4   : > { %v4271_v34 = vsel %vm2184_vm10, %v4251_v27, 0.0  ;;  %v3505_v3 = vmul.f32 %v6751_v56, %v3444_v23  ;;  %v3447_v21 = vadd.f32 %v6710_v19, %v3446_v54  ;;  %v4275_v47 = vsel %vm2184_vm10, %v4253_v25, 0.0 }
 0x3f5   : > { %v4272_v13 = vadd.f32 %v4271_v34, %v4270_v58  ;;  %v3508_v30 = vmul.f32 %v6751_v56, %v3455_v5  ;;  %v4011_v7 = vadd.f32 %v4010_v48, %v4009_v32  ;;  %v6970_v49 = vadd.f32 %v6760_v40, %v3507_v42 }
 0x3f6   : > { %v6973_v50 = vadd.f32 %v6760_v40, %v3505_v3  ;;  %v3506_v15 = vmul.f32 %v6751_v56, %v3447_v21 }
 0x3f7   : > { %7355 = vst [vmem:[#allocation18_spill] sm:$0xff] %v6970_v49  ;;  %v4274_v53 = vadd.f32 %v4273_v38, %v4272_v13  ;;  %v4012_v9 = vmul.f32 0.015625, %v4011_v7  ;;  %v6980_v55 = vadd.f32 %v6760_v40, %v3508_v30  ;;  %v4256_v4 = vmul.f32 %v6970_v49, %v6234_v41 }
 0x3f8   : > { %7356 = vst [vmem:[#allocation19_spill] sm:$0xff] %v6973_v50  ;;  %v4254_v19 = vmul.f32 %v6973_v50, %v6215_v28  ;;  %v6983_v32 = vadd.f32 %v6760_v40, %v3506_v15  ;;  %v5002_v45 = vpop.f32.mrb[92].mxu1  ;;  %v7359_v41 = vmov 0.0|0.0  }
 0x3f9   : > { %7357 = vst [vmem:[#allocation20_spill] sm:$0xff] %v6980_v55  ;;  %v4276_v61 = vadd.f32 %v4275_v47, %v4274_v53  ;;  %v3468_v36 = vadd.f32 %v5002_v45, %v6741_v14  ;;  %v3459_v27 = vpop.f32.mrb[93].mxu1  ;;  %5047 = vmatmul.mubr.msk.f32.vlgmr.msra.gmra.mrb[96].mxu1 %vm2184_vm10, %v4012_v9  ;;  %v4257_v54 = vmul.f32 %v6980_v55, %v6127_v17  ;;  %v4281_v3 = vsel %vm2184_vm10, %v4256_v4, 0.0  ;;  %v7362_v17 = vld [vmem:[#allocation4_spill] sm:$0xff] }
 0x3fa   : > { %7358 = vst [vmem:[#allocation21_spill] sm:$0xff] %v6983_v32  ;;  %v4277_v23 = vsel %vm2184_vm10, %v4254_v19, 0.0  ;;  %v4255_v28 = vmul.f32 %v6983_v32, %v6115_v20  ;;  %v3460_v26 = vadd.f32 %v6732_v62, %v3459_v27  ;;  %v5003_v48 = vpop.f32.mrb[94].mxu1  ;;  %5078 = vmatpush3.bf16.msra.mxu1 %v6670_v8  ;;  %5062 = vmatprep.mubr.msk.f32.mxu1 %vm5203_vm14, %v7346_v39 }
 0x3fb   : > { %v4278_v14 = vadd.f32 %v4277_v23, %v4276_v61  ;;  %v3511_v58 = vmul.f32 %v6751_v56, %v3468_v36  ;;  %v3471_v25 = vadd.f32 %v5003_v48, %v6744_v1  ;;  %v3462_v5 = vpop.f32.mrb[95].mxu1  ;;  %5079 = vmatprep.subr.bf16.mxu1 %v7359_v41  ;;  %v4283_v7 = vsel %vm2184_vm10, %v4257_v54, 0.0 }
 0x3fc   : > { %v4279_v20 = vsel %vm2184_vm10, %v4255_v28, 0.0  ;;  %v3509_v62 = vmul.f32 %v6751_v56, %v3460_v26  ;;  %v3463_v8 = vadd.f32 %v6735_v22, %v3462_v5 }
 0x3fd   : > { %v4280_v34 = vadd.f32 %v4279_v20, %v4278_v14  ;;  %v3512_v42 = vmul.f32 %v6751_v56, %v3471_v25  ;;  %v7007_v21 = vadd.f32 %v6760_v40, %v3511_v58 }
 0x3fe   : > { %v7010_v1 = vadd.f32 %v6760_v40, %v3509_v62  ;;  %v3510_v13 = vmul.f32 %v6751_v56, %v3463_v8  ;;  %5081 = vmatpush3.bf16.msra.mxu1 %v7362_v17 }
 0x3ff   : > { %7360 = vst [vmem:[#allocation22_spill] sm:$0xff] %v7007_v21  ;;  %v4282_v30 = vadd.f32 %v4281_v3, %v4280_v34  ;;  %v7018_v38 = vadd.f32 %v6760_v40, %v3512_v42  ;;  %v4260_v9 = vmul.f32 %v7007_v21, %v6272_v63  ;;  %v4379_v21 = vld [vmem:[%s7311_s13] sm:$0x3] }
 0x400   : > { %7361 = vst [vmem:[#allocation23_spill] sm:$0xff] %v7010_v1  ;;  %v4258_v22 = vmul.f32 %v7010_v1, %v6253_v18  ;;  %v7021_v15 = vadd.f32 %v6760_v40, %v3510_v13 }
 0x401   : > { %7363 = vst [vmem:[#allocation4_spill] sm:$0xff] %v7018_v38  ;;  %v4284_v53 = vadd.f32 %v4283_v7, %v4282_v30  ;;  %v4261_v45 = vmul.f32 %v7018_v38, %v6161_v10  ;;  %v4289_v36 = vsel %vm2184_vm10, %v4260_v9, 0.0 }
 0x402   : > { %7364 = vst [vmem:[#allocation24_spill] sm:$0xff] %v7021_v15  ;;  %v4285_v56 = vsel %vm2184_vm10, %v4258_v22, 0.0  ;;  %v4259_v47 = vmul.f32 %v7021_v15, %v6143_v44  ;;  %v4304_v15 = vld [vmem:[%s7310_s12] sm:$0x1] }
 0x403   : > { %v4286_v19 = vadd.f32 %v4285_v56, %v4284_v53  ;;  %v4291_v27 = vsel %vm2184_vm10, %v4261_v45, 0.0 }
 0x404   : > { %v4287_v18 = vsel %vm2184_vm10, %v4259_v47, 0.0 }
 0x405   : > { %v4288_v61 = vadd.f32 %v4287_v18, %v4286_v19 }
 0x407   : > { %v4290_v40 = vadd.f32 %v4289_v36, %v4288_v61 }
 0x409   : > { %v4292_v4 = vadd.f32 %v4291_v27, %v4290_v40 }
 0x40b   : > { %v4293_v23 = vrot.slane %v4292_v4, 4 }
 0x40d   : > { %v4294_v63 = vadd.f32 %v4293_v23, %v4292_v4 }
 0x40f   : > { %v4295_v28 = vrot.slane %v4294_v63, 2 }
 0x411   : > { %v4296_v26 = vadd.f32 %v4295_v28, %v4294_v63 }
 0x413   : > { %v4297_v48 = vrot.slane %v4296_v26, 1 }
 0x415   : > { %v4298_v14 = vadd.f32 %v4297_v48, %v4296_v26  ;;  %v4017_v26 = vld [vmem:[%s7310_s12] sm:$0x1] }
 0x417   : > { %v4299_v44 = vmul.f32 0.015625, %v4298_v14 }
 0x419   : > { %5063 = vmatmul.mubr.msk.f32.vlgmr.msra.gmra.mrb[98].mxu1 %vm2184_vm10, %v4299_v44 }
 0x444   : > { %v5008_v58 = vpop.f32.mrb[64].mxu0 }
 0x445   : > { %v3754_v10 = vpop.f32.mrb[65].mxu0 }
 0x446   : > { %v5009_v25 = vpop.f32.mrb[66].mxu0 }
 0x447   : > { %v3757_v5 = vpop.f32.mrb[67].mxu0 }
 0x44c   : > { %v5012_v41 = vpop.f32.mrb[68].mxu0 }
 0x44d   : > { %v3770_v54 = vpop.f32.mrb[69].mxu0 }
 0x44e   : > { %v5013_v20 = vpop.f32.mrb[70].mxu0 }
 0x44f   : > { %v3773_v62 = vpop.f32.mrb[71].mxu0 }
 0x462   : > { %v5016_v8 = vpop.f32.mrb[72].mxu0 }
 0x463   : > { %v3786_v34 = vpop.f32.mrb[73].mxu0 }
 0x464   : > { %v5017_v42 = vpop.f32.mrb[74].mxu0 }
 0x465   : > { %v3789_v3 = vpop.f32.mrb[75].mxu0 }
 0x46f   : > { %v7034_v13 = vpop.f32.mrb[76].mxu0 }
 0x470   : > { %v7036_v17 = vpop.f32.mrb[77].mxu0 }
 0x471   : > { %v7038_v30 = vpop.f32.mrb[78].mxu0 }
 0x472   : > { %v7040_v7 = vpop.f32.mrb[79].mxu0 }
 0x47e   : > { %v7042_v22 = vpop.f32.mrb[80].mxu0 }
 0x47f   : > { %v7044_v53 = vpop.f32.mrb[81].mxu0 }
 0x480   : > { %v7046_v9 = vpop.f32.mrb[82].mxu0 }
 0x481   : > { %v7048_v56 = vpop.f32.mrb[83].mxu0 }
 0x486   : > { %v7050_v47 = vpop.f32.mrb[84].mxu0 }
 0x487   : > { %v7052_v19 = vpop.f32.mrb[85].mxu0 }
 0x488   : > { %v7054_v45 = vpop.f32.mrb[86].mxu0 }
 0x489   : > { %v7056_v18 = vpop.f32.mrb[87].mxu0 }
 0x49c   : > { %v7058_v61 = vpop.f32.mrb[88].mxu0 }
 0x49d   : > { %v7060_v36 = vpop.f32.mrb[89].mxu0 }
 0x49e   : > { %v7062_v40 = vpop.f32.mrb[90].mxu0 }
 0x49f   : > { %v7064_v27 = vpop.f32.mrb[91].mxu0 }
 0x4a4   : > { %v7066_v4 = vpop.f32.mrb[92].mxu0 }
 0x4a5   : > { %7365 = vst [vmem:[#allocation25_spill] sm:$0xff] %v7066_v4  ;;  %v7068_v23 = vpop.f32.mrb[93].mxu0 }
 0x4a6   : > { %7366 = vst [vmem:[#allocation26_spill] sm:$0xff] %v7068_v23  ;;  %v7070_v63 = vpop.f32.mrb[94].mxu0 }
 0x4a7   : > { %7367 = vst [vmem:[#allocation27_spill] sm:$0xff] %v7070_v63  ;;  %v7072_v28 = vpop.f32.mrb[95].mxu0 }
 0x4a8   : > { %7368 = vst [vmem:[#allocation28_spill] sm:$0xff] %v7072_v28 }
 0x4cc   : > { %v4087_v48 = vpop.f32.mrb[96].mxu1 }
 0x4cd   : > { %v4088_v14 = vadd.f32 %v4087_v48, %v4017_v26  ;;  %v5048_v44 = vpop.f32.mrb[97].mxu1 }
 0x4cf   : > { %v4091_v38 = vmax.f32 %v4088_v14, 0.0  ;;  %v4093_v14 = vld [vmem:[%s7312_s14] sm:$0x1] }
 0x4d1   : > { %5052 = vmatmul.mubr.msk.f32.vlgmr.msra.gmra.mrb[96].mxu0 %vm4094_vm0, %v4091_v38 }
 0x4d2   : > { %5066 = vmatpush3.msk.msra.mxu0 %vm4098_vm15, %v4379_v21  ;;  %5067 = vmatprep.mubr.msk.f32.mxu0 %vm5203_vm14, %v7346_v39  ;;  %v7092_v39 = vld [vmem:[%s7307_s9] ss:$0 sm:$0xff] }
 0x4ec   : > { %v4374_v1 = vpop.f32.mrb[98].mxu1 }
 0x4ed   : > { %v4375_v55 = vadd.f32 %v4374_v1, %v4304_v15  ;;  %v5064_v26 = vpop.f32.mrb[99].mxu1  ;;  %v4178_v1 = vlaneseq  ;;  %v7098_v15 = vld [vmem:[%s7308_s10] ss:$0 sm:$0xff] }
 0x4ef   : > { %v4378_v48 = vmax.f32 %v4375_v55, 0.0  ;;  %v3890_v55 = vmul.f32 %v5008_v58, %v7092_v39  ;;  %v7100_v26 = vshrl.u32 %v4178_v1, 7  ;;  %v3895_v58 = vmul.f32 %v5013_v20, %v7092_v39 }
 0x4f0   : > { %v3896_v1 = vmul.f32 %v7092_v39, %v3786_v34  ;;  %v3901_v20 = vmul.f32 %v7092_v39, %v7040_v7 }
 0x4f1   : > { %5068 = vmatmul.mubr.msk.f32.vlgmr.msra.gmra.mrb[98].mxu0 %vm4094_vm0, %v4378_v48  ;;  %7369 = vst [vmem:[#allocation29_spill] sm:$0xff] %v7100_v26  ;;  %v3929_v48 = vadd.f32 %v7098_v15, %v3890_v55  ;;  %v3897_v55 = vmul.f32 %v7092_v39, %v3789_v3 }
 0x4f2   : > { %v3935_v11 = vadd.f32 %v7098_v15, %v3896_v1  ;;  %v7373_v1 = vld [vmem:[#allocation5_spill] sm:$0xff] }
 0x5a4   : > { %v4168_v44 = vpop.f32.mrb[96].mxu0 }
 0x5a5   : > { %v4169_v38 = vadd.f32 %v4168_v44, %v4093_v14  ;;  %v5053_v49 = vpop.f32.mrb[97].mxu0  ;;  %v3891_v14 = vmul.f32 %v5009_v25, %v7092_v39  ;;  %v3889_v44 = vmul.f32 %v7092_v39, %v3757_v5  ;;  %v3902_v5 = vmul.f32 %v7034_v13, %v7092_v39 }
 0x5a6   : > { %v3888_v49 = vmul.f32 %v7092_v39, %v3754_v10  ;;  %v3899_v10 = vmul.f32 %v5017_v42, %v7092_v39  ;;  %v3934_v25 = vadd.f32 %v7098_v15, %v3895_v58  ;;  %v3940_v58 = vadd.f32 %v7098_v15, %v3901_v20 }
 0x5a7   : > { %v4783_v21 = vmul.f32 -1.442695, %v4169_v38  ;;  %v3893_v38 = vmul.f32 %v7092_v39, %v3773_v62  ;;  %v3928_v34 = vadd.f32 %v7098_v15, %v3889_v44 }
 0x5a8   : > { %v3927_v62 = vadd.f32 %v7098_v15, %v3888_v49  ;;  %v3938_v7 = vadd.f32 %v7098_v15, %v3899_v10  ;;  %v3936_v49 = vadd.f32 %v7098_v15, %v3897_v55  ;;  %v7374_v10 = vld [vmem:[#allocation7_spill] sm:$0xff] }
 0x5a9   : > { %5175 = vpow2.f32 %v4783_v21  ;;  %v3898_v21 = vmul.f32 %v5016_v8, %v7092_v39  ;;  %v3930_v8 = vadd.f32 %v7098_v15, %v3891_v14  ;;  %v7370_v14 = vsub.s32 0, %v7100_v26 }
 0x5b3   : > { %v5176_v32 = vpop.eup %5175 }
 0x5b4   : > { %v4175_v50 = vadd.f32 1.0, %v5176_v32  ;;  %v3894_v32 = vmul.f32 %v5012_v41, %v7092_v39  ;;  %v3900_v41 = vmul.f32 %v7092_v39, %v7036_v17  ;;  %v3932_v17 = vadd.f32 %v7098_v15, %v3893_v38  ;;  %v7371_v38 = vld [vmem:[#allocation6_spill] sm:$0xff] }
 0x5b6   : > { %5177 = vrcp.f32 %v4175_v50  ;;  %v3892_v50 = vmul.f32 %v7092_v39, %v3770_v54  ;;  %v3903_v54 = vmul.f32 %v7038_v30, %v7092_v39  ;;  %v3933_v42 = vadd.f32 %v7098_v15, %v3894_v32 }
 0x5b7   : > { %v3937_v30 = vadd.f32 %v7098_v15, %v3898_v21  ;;  %v3941_v32 = vadd.f32 %v7098_v15, %v3902_v5  ;;  %v3939_v35 = vadd.f32 %v7098_v15, %v3900_v41  ;;  %v7372_v21 = vld [vmem:[#allocation8_spill] sm:$0xff] }
 0x5b8   : > { %v3931_v13 = vadd.f32 %v7098_v15, %v3892_v50  ;;  %v3942_v50 = vadd.f32 %v7098_v15, %v3903_v54 }
 0x5c0   : > { %v5178_v3 = vpop.eup %5177 }
 0x5c1   : > { %v4181_v44 = vrot.slane %v5178_v3, %v7370_v14 }
 0x5c3   : > { %v4182_v0 = vmul.f32 %v4181_v44, %v7371_v38  ;;  %v4183_v2 = vmul.f32 %v4181_v44, %v7372_v21  ;;  %v4184_v37 = vmul.f32 %v4181_v44, %v7373_v1  ;;  %v4185_v55 = vmul.f32 %v4181_v44, %v7374_v10  ;;  %v7375_v38 = vld [vmem:[#allocation9_spill] sm:$0xff] }
 0x5c4   : > { %v4186_v57 = vmul.f32 %v4181_v44, %v6807_v60  ;;  %v4187_v3 = vmul.f32 %v4181_v44, %v6818_v59  ;;  %v4188_v5 = vmul.f32 %v4181_v44, %v6804_v29  ;;  %v4189_v41 = vmul.f32 %v4181_v44, %v6815_v52  ;;  %v4453_v54 = vpop.f32.mrb[98].mxu0 }
 0x5c5   : > { %v4190_v20 = vmul.f32 %v4181_v44, %v6842_v6  ;;  %v4191_v14 = vmul.f32 %v4181_v44, %v6853_v43  ;;  %v4192_v21 = vmul.f32 %v4181_v44, %v7375_v38  ;;  %v4193_v1 = vmul.f32 %v4181_v44, %v6850_v12  ;;  %v5069_v33 = vpop.f32.mrb[99].mxu0 }
 0x5c6   : > { %v4194_v10 = vmul.f32 %v4181_v44, %v6877_v46  ;;  %v4195_v60 = vmul.f32 %v4181_v44, %v6887_v51  ;;  %v4196_v59 = vmul.f32 %v4181_v44, %v6874_v24  ;;  %v4197_v29 = vmul.f32 %v4181_v44, %v6884_v16 }
 0x5c7   : > { %v4198_v52 = vadd.f32 %v4182_v0, %v3927_v62  ;;  %v4199_v31 = vadd.f32 %v4183_v2, %v3928_v34  ;;  %v4200_v26 = vadd.f32 %v4184_v37, %v3929_v48  ;;  %v4201_v6 = vadd.f32 %v4185_v55, %v3930_v8 }
 0x5c8   : > { %v4202_v28 = vadd.f32 %v4186_v57, %v3931_v13  ;;  %v4203_v43 = vadd.f32 %v4187_v3, %v3932_v17  ;;  %v4204_v63 = vadd.f32 %v4188_v5, %v3933_v42  ;;  %v4205_v38 = vadd.f32 %v4189_v41, %v3934_v25  ;;  %v7376_v3 = vld [vmem:[#allocation25_spill] sm:$0xff]  ;;  %v7377_v5 = vld [vmem:[#allocation26_spill] sm:$0xff]  ;;  %v7378_v41 = vld [vmem:[#allocation27_spill] sm:$0xff] }
 0x5c9   : > { %v4206_v23 = vadd.f32 %v4190_v20, %v3935_v11  ;;  %v4207_v12 = vadd.f32 %v4191_v14, %v3936_v49  ;;  %v4208_v33 = vadd.f32 %v4192_v21, %v3937_v30  ;;  %v4209_v4 = vadd.f32 %v4193_v1, %v3938_v7 }
 0x5ca   : > { %v4210_v24 = vadd.f32 %v4194_v10, %v3939_v35  ;;  %v4211_v46 = vadd.f32 %v4195_v60, %v3940_v58  ;;  %v4212_v16 = vadd.f32 %v4196_v59, %v3941_v32  ;;  %v4213_v51 = vadd.f32 %v4197_v29, %v3942_v50  ;;  %v4380_v35 = vld [vmem:[%s7312_s14] sm:$0x1] }
 0x5cb   : > { %v4214_v57 = vmax.f32 %v4198_v52, 0.0  ;;  %v4215_v37 = vmax.f32 %v4199_v31, 0.0  ;;  %v4216_v2 = vmax.f32 %v4200_v26, 0.0  ;;  %v4217_v11 = vmax.f32 %v4201_v6, 0.0  ;;  %v7380_v6 = vld [vmem:[#allocation29_spill] sm:$0xff] }
 0x5cc   : > { %v4218_v0 = vmax.f32 %v4202_v28, 0.0  ;;  %v4219_v48 = vmax.f32 %v4203_v43, 0.0  ;;  %v4220_v25 = vmax.f32 %v4204_v63, 0.0  ;;  %v4221_v62 = vmax.f32 %v4205_v38, 0.0 }
 0x5cd   : > { %v4222_v8 = vmax.f32 %v4206_v23, 0.0  ;;  %v4223_v34 = vmax.f32 %v4207_v12, 0.0  ;;  %v4224_v42 = vmax.f32 %v4208_v33, 0.0  ;;  %v4225_v31 = vmax.f32 %v4209_v4, 0.0  ;;  %4230 = vst.msk [vmem:[%s7160_s22] sm:$0xff] %vm2184_vm10, %v4214_v57  ;;  %4231 = vst.msk [vmem:[%s7160_s22 + $0x8] sm:$0xff] %vm2184_vm10, %v4215_v37 }
 0x5ce   : > { %4232 = vst.msk [vmem:[%s7160_s22 + $0x10] sm:$0xff] %vm2184_vm10, %v4216_v2  ;;  %4233 = vst.msk [vmem:[%s7160_s22 + $0x18] sm:$0xff] %vm2184_vm10, %v4217_v11  ;;  %v4226_v63 = vmax.f32 %v4210_v24, 0.0  ;;  %v4227_v23 = vmax.f32 %v4211_v46, 0.0  ;;  %v4228_v28 = vmax.f32 %v4212_v16, 0.0  ;;  %v4229_v26 = vmax.f32 %v4213_v51, 0.0 }
 0x5cf   : > { %4234 = vst.msk [vmem:[%s7160_s22 + $0x20] sm:$0xff] %vm2184_vm10, %v4218_v0  ;;  %4235 = vst.msk [vmem:[%s7160_s22 + $0x28] sm:$0xff] %vm2184_vm10, %v4219_v48  ;;  %v4454_v4 = vadd.f32 %v4453_v54, %v4380_v35  ;;  %v3906_v7 = vmul.f32 %v7042_v22, %v7092_v39  ;;  %v3904_v49 = vmul.f32 %v7092_v39, %v7044_v53  ;;  %v7379_v54 = vld [vmem:[#allocation28_spill] sm:$0xff]  ;;  %v7381_v43 = vsub.s32 0, %v7380_v6  ;;  %v7382_v16 = vld [vmem:[#allocation11_spill] sm:$0xff] }
 0x5d0   : > { %4236 = vst.msk [vmem:[%s7160_s22 + $0x30] sm:$0xff] %vm2184_vm10, %v4220_v25  ;;  %4237 = vst.msk [vmem:[%s7160_s22 + $0x38] sm:$0xff] %vm2184_vm10, %v4221_v62  ;;  %v3907_v44 = vmul.f32 %v7046_v9, %v7092_v39  ;;  %v3905_v32 = vmul.f32 %v7092_v39, %v7048_v56  ;;  %v3910_v50 = vmul.f32 %v7050_v47, %v7092_v39  ;;  %v7383_v57 = vld [vmem:[#allocation13_spill] sm:$0xff]  ;;  %v7384_v2 = vld [vmem:[#allocation10_spill] sm:$0xff] }
 0x5d1   : > { %4238 = vst.msk [vmem:[%s7160_s22 + $0x40] sm:$0xff] %vm2184_vm10, %v4222_v8  ;;  %4239 = vst.msk [vmem:[%s7160_s22 + $0x48] sm:$0xff] %vm2184_vm10, %v4223_v34  ;;  %v4787_v13 = vmul.f32 -1.442695, %v4454_v4  ;;  %v3908_v58 = vmul.f32 %v7092_v39, %v7052_v19  ;;  %v3911_v55 = vmul.f32 %v7054_v45, %v7092_v39  ;;  %v3909_v22 = vmul.f32 %v7092_v39, %v7056_v18  ;;  %v7385_v0 = vld [vmem:[#allocation12_spill] sm:$0xff]  ;;  %v7386_v25 = vld [vmem:[#allocation15_spill] sm:$0xff] }
 0x5d2   : > { %4240 = vst.msk [vmem:[%s7160_s22 + $0x50] sm:$0xff] %vm2184_vm10, %v4224_v42  ;;  %4241 = vst.msk [vmem:[%s7160_s22 + $0x58] sm:$0xff] %vm2184_vm10, %v4225_v31  ;;  %v3914_v53 = vmul.f32 %v7058_v61, %v7092_v39  ;;  %v3945_v9 = vadd.f32 %v7098_v15, %v3906_v7  ;;  %v3912_v56 = vmul.f32 %v7092_v39, %v7060_v36  ;;  %v7387_v35 = vld [vmem:[#allocation17_spill] sm:$0xff]  ;;  %v7388_v34 = vld [vmem:[#allocation14_spill] sm:$0xff] }
 0x5d3   : > { %4242 = vst.msk [vmem:[%s7160_s22 + $0x60] sm:$0xff] %vm2184_vm10, %v4226_v63  ;;  %4243 = vst.msk [vmem:[%s7160_s22 + $0x68] sm:$0xff] %vm2184_vm10, %v4227_v23  ;;  %5179 = vpow2.f32 %v4787_v13  ;;  %v3915_v47 = vmul.f32 %v7062_v40, %v7092_v39  ;;  %v3913_v19 = vmul.f32 %v7092_v39, %v7064_v27  ;;  %v3918_v45 = vmul.f32 %v7376_v3, %v7092_v39  ;;  %v7389_v31 = vld [vmem:[#allocation16_spill] sm:$0xff]  ;;  %v7390_v23 = vld [vmem:[#allocation19_spill] sm:$0xff] }
 0x5d4   : > { %4244 = vst.msk [vmem:[%s7160_s22 + $0x70] sm:$0xff] %vm2184_vm10, %v4228_v28  ;;  %4245 = vst.msk [vmem:[%s7160_s22 + $0x78] sm:$0xff] %vm2184_vm10, %v4229_v26  ;;  %v3916_v18 = vmul.f32 %v7092_v39, %v7377_v5  ;;  %v3919_v61 = vmul.f32 %v7378_v41, %v7092_v39  ;;  %v3917_v20 = vmul.f32 %v7092_v39, %v7379_v54  ;;  %v7391_v26 = vld [vmem:[#allocation21_spill] sm:$0xff]  ;;  %v7392_v4 = vld [vmem:[#allocation18_spill] sm:$0xff] }
 0x5d5   : > { %v3943_v36 = vadd.f32 %v7098_v15, %v3904_v49  ;;  %v3946_v14 = vadd.f32 %v7098_v15, %v3907_v44  ;;  %v3944_v40 = vadd.f32 %v7098_v15, %v3905_v32  ;;  %v3949_v27 = vadd.f32 %v7098_v15, %v3910_v50  ;;  %v7394_v7 = vld [vmem:[#allocation23_spill] sm:$0xff]  ;;  %v7395_v44 = vld [vmem:[#allocation24_spill] sm:$0xff]  ;;  %v7396_v50 = vld [vmem:[#allocation22_spill] sm:$0xff] }
 0x5d6   : > { %v3947_v1 = vadd.f32 %v7098_v15, %v3908_v58  ;;  %v3950_v10 = vadd.f32 %v7098_v15, %v3911_v55  ;;  %v3948_v60 = vadd.f32 %v7098_v15, %v3909_v22  ;;  %v3953_v59 = vadd.f32 %v7098_v15, %v3914_v53  ;;  %v7397_v55 = vld [vmem:[#allocation4_spill] sm:$0xff] }
 0x5d7   : > { %v3951_v29 = vadd.f32 %v7098_v15, %v3912_v56  ;;  %v3954_v39 = vadd.f32 %v7098_v15, %v3915_v47  ;;  %v3952_v52 = vadd.f32 %v7098_v15, %v3913_v19  ;;  %v3957_v12 = vadd.f32 %v7098_v15, %v3918_v45 }
 0x5d8   : > { %v3955_v33 = vadd.f32 %v7098_v15, %v3916_v18  ;;  %v3958_v24 = vadd.f32 %v7098_v15, %v3919_v61  ;;  %v3956_v46 = vadd.f32 %v7098_v15, %v3917_v20 }
 0x5dd   : > { %v5180_v17 = vpop.eup %5179 }
 0x5de   : > { %v4460_v30 = vadd.f32 1.0, %v5180_v17  ;;  %v7393_v17 = vld [vmem:[#allocation20_spill] sm:$0xff] }
 0x5e0   : > { %5181 = vrcp.f32 %v4460_v30 }
 0x5ea   : > { %v5182_v21 = vpop.eup %5181 }
 0x5eb   : > { %v4466_v38 = vrot.slane %v5182_v21, %v7381_v43 }
 0x5ed   : > { %v4467_v51 = vmul.f32 %v4466_v38, %v7382_v16  ;;  %v4468_v37 = vmul.f32 %v4466_v38, %v7383_v57  ;;  %v4469_v11 = vmul.f32 %v4466_v38, %v7384_v2  ;;  %v4470_v48 = vmul.f32 %v4466_v38, %v7385_v0 }
 0x5ee   : > { %v4471_v62 = vmul.f32 %v4466_v38, %v7386_v25  ;;  %v4472_v8 = vmul.f32 %v4466_v38, %v7387_v35  ;;  %v4473_v42 = vmul.f32 %v4466_v38, %v7388_v34  ;;  %v4474_v63 = vmul.f32 %v4466_v38, %v7389_v31 }
 0x5ef   : > { %v4475_v28 = vmul.f32 %v4466_v38, %v7390_v23  ;;  %v4476_v15 = vmul.f32 %v4466_v38, %v7391_v26  ;;  %v4477_v13 = vmul.f32 %v4466_v38, %v7392_v4  ;;  %v4478_v30 = vmul.f32 %v4466_v38, %v7393_v17 }
 0x5f0   : > { %v4479_v49 = vmul.f32 %v4466_v38, %v7394_v7  ;;  %v4480_v32 = vmul.f32 %v4466_v38, %v7395_v44  ;;  %v4481_v58 = vmul.f32 %v4466_v38, %v7396_v50  ;;  %v4482_v22 = vmul.f32 %v4466_v38, %v7397_v55 }
 0x5f1   : > { %v4483_v53 = vadd.f32 %v4467_v51, %v3943_v36  ;;  %v4484_v56 = vadd.f32 %v4468_v37, %v3944_v40  ;;  %v4485_v47 = vadd.f32 %v4469_v11, %v3945_v9  ;;  %v4486_v19 = vadd.f32 %v4470_v48, %v3946_v14 }
 0x5f2   : > { %v4487_v3 = vadd.f32 %v4471_v62, %v3947_v1  ;;  %v4488_v45 = vadd.f32 %v4472_v8, %v3948_v60  ;;  %v4489_v5 = vadd.f32 %v4473_v42, %v3949_v27  ;;  %v4490_v18 = vadd.f32 %v4474_v63, %v3950_v10 }
 0x5f3   : > { %v4491_v41 = vadd.f32 %v4475_v28, %v3951_v29  ;;  %v4492_v61 = vadd.f32 %v4476_v15, %v3952_v52  ;;  %v4493_v54 = vadd.f32 %v4477_v13, %v3953_v59  ;;  %v4494_v20 = vadd.f32 %v4478_v30, %v3954_v39 }
 0x5f4   : > { %v4495_v21 = vadd.f32 %v4479_v49, %v3955_v33  ;;  %v4496_v6 = vadd.f32 %v4480_v32, %v3956_v46  ;;  %v4497_v43 = vadd.f32 %v4481_v58, %v3957_v12  ;;  %v4498_v16 = vadd.f32 %v4482_v22, %v3958_v24 }
 0x5f5   : > { %v4499_v36 = vmax.f32 %v4483_v53, 0.0  ;;  %v4500_v40 = vmax.f32 %v4484_v56, 0.0  ;;  %v4501_v9 = vmax.f32 %v4485_v47, 0.0  ;;  %v4502_v14 = vmax.f32 %v4486_v19, 0.0 }
 0x5f6   : > { %v4503_v1 = vmax.f32 %v4487_v3, 0.0  ;;  %v4504_v27 = vmax.f32 %v4488_v45, 0.0  ;;  %v4505_v10 = vmax.f32 %v4489_v5, 0.0  ;;  %v4506_v60 = vmax.f32 %v4490_v18, 0.0 }
 0x5f7   : > { %v4507_v59 = vmax.f32 %v4491_v41, 0.0  ;;  %v4508_v29 = vmax.f32 %v4492_v61, 0.0  ;;  %v4509_v39 = vmax.f32 %v4493_v54, 0.0  ;;  %v4510_v52 = vmax.f32 %v4494_v20, 0.0  ;;  %4788 = vst.msk [vmem:[%s7160_s22 + $0x80] sm:$0xff] %vm2184_vm10, %v4499_v36  ;;  %4789 = vst.msk [vmem:[%s7160_s22 + $0x88] sm:$0xff] %vm2184_vm10, %v4500_v40 }
 0x5f8   : > { %4790 = vst.msk [vmem:[%s7160_s22 + $0x90] sm:$0xff] %vm2184_vm10, %v4501_v9  ;;  %4791 = vst.msk [vmem:[%s7160_s22 + $0x98] sm:$0xff] %vm2184_vm10, %v4502_v14  ;;  %v4511_v38 = vmax.f32 %v4495_v21, 0.0  ;;  %v4512_v12 = vmax.f32 %v4496_v6, 0.0  ;;  %v4513_v33 = vmax.f32 %v4497_v43, 0.0  ;;  %v4514_v24 = vmax.f32 %v4498_v16, 0.0 }
 0x5f9   : > { %4792 = vst.msk [vmem:[%s7160_s22 + $0xa0] sm:$0xff] %vm2184_vm10, %v4503_v1  ;;  %4793 = vst.msk [vmem:[%s7160_s22 + $0xa8] sm:$0xff] %vm2184_vm10, %v4504_v27 }
 0x5fa   : > { %4794 = vst.msk [vmem:[%s7160_s22 + $0xb0] sm:$0xff] %vm2184_vm10, %v4505_v10  ;;  %4795 = vst.msk [vmem:[%s7160_s22 + $0xb8] sm:$0xff] %vm2184_vm10, %v4506_v60 }
 0x5fb   : > { %4796 = vst.msk [vmem:[%s7160_s22 + $0xc0] sm:$0xff] %vm2184_vm10, %v4507_v59  ;;  %4797 = vst.msk [vmem:[%s7160_s22 + $0xc8] sm:$0xff] %vm2184_vm10, %v4508_v29 }
 0x5fc   : > { %4798 = vst.msk [vmem:[%s7160_s22 + $0xd0] sm:$0xff] %vm2184_vm10, %v4509_v39  ;;  %4799 = vst.msk [vmem:[%s7160_s22 + $0xd8] sm:$0xff] %vm2184_vm10, %v4510_v52 }
 0x5fd   : > { %4800 = vst.msk [vmem:[%s7160_s22 + $0xe0] sm:$0xff] %vm2184_vm10, %v4511_v38  ;;  %4801 = vst.msk [vmem:[%s7160_s22 + $0xe8] sm:$0xff] %vm2184_vm10, %v4512_v12 }
 0x5fe   : > { %4802 = vst.msk [vmem:[%s7160_s22 + $0xf0] sm:$0xff] %vm2184_vm10, %v4513_v33  ;;  %4803 = vst.msk [vmem:[%s7160_s22 + $0xf8] sm:$0xff] %vm2184_vm10, %v4514_v24 }
 0x5ff PF: > { %s25_s18 = sadd.s32 1, %s5191_s18  }
 0x600   : > { %p22_p4 = scmp.ge.s32.totalorder %s25_s18, 4  }
 0x602   :  { %24 = sbr.rel (!%p22_p4) target bundleno = 1 (0x1), region = 112 }

</bundles_post_ra>
